<compile_context>
chip_gen: v5e
topology: v5e:2x2
jax: 0.10.0
libtpu: 0.0.40
codegen_flags: <defaults>
</compile_context>

<pallas_src>
import jax
import jax.numpy as jnp
from jax import lax
from jax.experimental import pallas as pl
from jax.experimental.pallas import tpu as pltpu

LEAKY_SLOPE = 0.01          # PyTorch nn.LeakyReLU default
SELF_INFO_LEN = 2
ENTITY_DIM = 3              # neighbor / robot feature length (= project_*_q output dim)
ATT_DIM = 64
CNN_OUT_DIM = 192
N_ACTIONS = 36
OUT_LANES = 128             # packed output slab width (lane-dense, unmasked stores)

# grid_map geometry used for the synthetic FOV encoder
GRID_C, GRID_H, GRID_W = 4, 16, 16
GRID_FLAT = GRID_C * GRID_H * GRID_W
FOV_HIDDEN = 128

DATA_NAMES = (
    "self_info", "grid_flat",
    "nb_d0", "nb_d1", "nb_d2", "neighbor_mask",
    "rb_d0", "rb_d1", "rb_d2", "robot_mask",
)

PARAM_SHAPES = dict(
    # self_encoder: Linear(2,16) LeakyReLU Linear(16,8) LeakyReLU
    w_se1=(SELF_INFO_LEN, 16), b_se1=(1, 16),
    w_se2=(16, 8), b_se2=(1, 8),
    # FOV encoder (MLP stand-in, see TODO above): 1024 -> 128 -> 192
    w_f1=(GRID_FLAT, FOV_HIDDEN), b_f1=(1, FOV_HIDDEN),
    w_f2=(FOV_HIDDEN, CNN_OUT_DIM), b_f2=(1, CNN_OUT_DIM),
    # project_ii_q / project_ir_q: Linear(2, 3)
    w_pii=(SELF_INFO_LEN, ENTITY_DIM), b_pii=(1, ENTITY_DIM),
    w_pir=(SELF_INFO_LEN, ENTITY_DIM), b_pir=(1, ENTITY_DIM),
    # neighbor attention (single head, d_k = d_v = 64)
    wq_n=(ENTITY_DIM, ATT_DIM), wk_n=(ENTITY_DIM, ATT_DIM), wv_n=(ENTITY_DIM, ATT_DIM),
    wo_n=(ATT_DIM, ATT_DIM), bo_n=(1, ATT_DIM),
    # robot (inter) attention
    wq_r=(ENTITY_DIM, ATT_DIM), wk_r=(ENTITY_DIM, ATT_DIM), wv_r=(ENTITY_DIM, ATT_DIM),
    wo_r=(ATT_DIM, ATT_DIM), bo_r=(1, ATT_DIM),
    # mlp first layer Linear(192+8+2*64+2*64 = 456, 64); kept as per-segment weights
    # so the kernel never builds a lane-concatenated (B, 256) activation.
    w_m1_self=(8, 64), w_m1_grid=(CNN_OUT_DIM, 64),
    w_m1_ally=(ATT_DIM, 64), w_m1_selfa=(ATT_DIM, 64),
    w_m1_enemy=(ATT_DIM, 64), w_m1_selfe=(ATT_DIM, 64),
    b_m1=(1, 64),
    w_m2=(64, CNN_OUT_DIM), b_m2=(1, CNN_OUT_DIM),
    # actor head: act_fc Linear(192,32) + Categorical Linear(32,36)
    w_a=(CNN_OUT_DIM, 32), b_a=(1, 32),
    w_logit=(32, N_ACTIONS), b_logit=(1, N_ACTIONS),
    # critic head: Linear(192,32) LeakyReLU Linear(32,1)
    w_c1=(CNN_OUT_DIM, 32), b_c1=(1, 32),
    w_c2=(32, 1), b_c2=(1, 1),
)
PARAM_NAMES = tuple(PARAM_SHAPES.keys())
IN_NAMES = DATA_NAMES + PARAM_NAMES


def _leaky_relu(x):
    return jnp.where(x >= 0, x, LEAKY_SLOPE * x)


def _mac(x, w, b=None):
    """x @ w (+ b) via VPU broadcast multiply-adds for tiny contraction dims (K=2/3)."""
    out = x[:, 0:1] * w[0:1, :]
    for d in range(1, w.shape[0]):
        out = out + x[:, d:d + 1] * w[d:d + 1, :]
    if b is not None:
        out = out + b
    return out


def _attention(q, info_d, mask, wq, wk, wv, wo, bo):
    """Single-head scaled dot-product attention with a length-1 query.

    q:      (TB, 3)            projected query
    info_d: 3 x (TB, N)        keys == values, feature-major planes
    mask:   (TB, N)            0 => masked out
    Returns (attended_feats (TB,64), projected_query (TB,64)).
    """
    qp = _mac(q, wq)                                                      # (TB, 64)
    # scores[b, n] = <qp[b] @ wk^T, info[b, n]> / sqrt(d_k)
    a = lax.dot_general(qp, wk, (((1,), (1,)), ((), ())),
                        preferred_element_type=jnp.float32)               # (TB, 3)
    scores = (a[:, 0:1] * info_d[0] + a[:, 1:2] * info_d[1]
              + a[:, 2:3] * info_d[2]) * 0.125                            # (TB, N)  (1/sqrt(64))
    scores = jnp.where(mask > 0, scores, -1e9)
    m = jnp.max(scores, axis=-1, keepdims=True)
    e = jnp.exp(scores - m)
    attn = e / jnp.sum(e, axis=-1, keepdims=True)                         # (TB, N)
    # attn @ V == (attn-weighted info) @ wv   (softmax weights sum to 1)
    w0 = jnp.sum(attn * info_d[0], axis=-1, keepdims=True)                # (TB, 1)
    w1 = jnp.sum(attn * info_d[1], axis=-1, keepdims=True)
    w2 = jnp.sum(attn * info_d[2], axis=-1, keepdims=True)
    v = w0 * wv[0:1, :] + w1 * wv[1:2, :] + w2 * wv[2:3, :]               # (TB, 64)
    out = jnp.dot(v, wo, preferred_element_type=jnp.float32) + bo         # (TB, 64)
    return out, qp


def inter_network_kernel(*refs):
    n_in = len(IN_NAMES)
    r = dict(zip(IN_NAMES, refs[:n_in]))
    out_ref = refs[n_in]
    f32 = jnp.float32

    self_info = r["self_info"][...]                                   # (TB, 2)  f32
    grid_bf = r["grid_flat"][...]                                     # (TB, 1024) bf16
    nb = (r["nb_d0"][...], r["nb_d1"][...], r["nb_d2"][...])          # 3 x (TB, Nn)
    nb_mask = r["neighbor_mask"][...]                                 # (TB, Nn)
    rb = (r["rb_d0"][...], r["rb_d1"][...], r["rb_d2"][...])          # 3 x (TB, Nr)
    rb_mask = r["robot_mask"][...]                                    # (TB, Nr)

    # --- self encoder ---
    h = _leaky_relu(_mac(self_info, r["w_se1"][...], r["b_se1"][...]))
    self_v = _leaky_relu(jnp.dot(h, r["w_se2"][...], preferred_element_type=f32)
                         + r["b_se2"][...])                               # (TB, 8)

    # --- FOV encoder (grid_map_v): bf16 MXU matmuls, f32 accumulation ---
    g = _leaky_relu(jnp.dot(grid_bf, r["w_f1"][...], preferred_element_type=f32)
                    + r["b_f1"][...])
    grid_v = _leaky_relu(jnp.dot(g.astype(jnp.bfloat16), r["w_f2"][...],
                                 preferred_element_type=f32)
                         + r["b_f2"][...])                                # (TB, 192)

    # --- neighbor attention ---
    q_n = _mac(self_info, r["w_pii"][...], r["b_pii"][...])               # (TB, 3)
    ally, self_a = _attention(q_n, nb, nb_mask,
                              r["wq_n"][...], r["wk_n"][...], r["wv_n"][...],
                              r["wo_n"][...], r["bo_n"][...])

    # --- robot (inter) attention ---
    q_r = _mac(self_info, r["w_pir"][...], r["b_pir"][...])               # (TB, 3)
    enemy, self_e = _attention(q_r, rb, rb_mask,
                               r["wq_r"][...], r["wk_r"][...], r["wv_r"][...],
                               r["wo_r"][...], r["bo_r"][...])

    # --- mlp: sum of per-segment matmuls (no lane concat needed) ---
    m1 = (jnp.dot(self_v, r["w_m1_self"][...], preferred_element_type=f32)
          + jnp.dot(grid_v, r["w_m1_grid"][...], preferred_element_type=f32)
          + jnp.dot(ally, r["w_m1_ally"][...], preferred_element_type=f32)
          + jnp.dot(self_a, r["w_m1_selfa"][...], preferred_element_type=f32)
          + jnp.dot(enemy, r["w_m1_enemy"][...], preferred_element_type=f32)
          + jnp.dot(self_e, r["w_m1_selfe"][...], preferred_element_type=f32)
          + r["b_m1"][...])
    m1 = _leaky_relu(m1)
    emb = _leaky_relu(jnp.dot(m1, r["w_m2"][...], preferred_element_type=f32)
                      + r["b_m2"][...])                                   # (TB, 192)

    # --- actor head: Categorical(32, 36), deterministic -> mode (argmax) ---
    a_feat = _leaky_relu(jnp.dot(emb, r["w_a"][...], preferred_element_type=f32)
                         + r["b_a"][...])                                 # (TB, 32)
    logits = (jnp.dot(a_feat, r["w_logit"][...], preferred_element_type=f32)
              + r["b_logit"][...])                                        # (TB, 36)
    idx = lax.broadcasted_iota(jnp.int32, logits.shape, 1)
    mx = jnp.max(logits, axis=-1, keepdims=True)
    action = jnp.min(jnp.where(logits == mx, idx, N_ACTIONS),
                     axis=-1, keepdims=True)                              # (TB, 1) int32
    lse = mx + jnp.log(jnp.sum(jnp.exp(logits - mx), axis=-1, keepdims=True))
    logp = jnp.sum(jnp.where(idx == action, logits - lse, 0.0),
                   axis=-1, keepdims=True)                                # (TB, 1)

    # --- critic head ---
    c = _leaky_relu(jnp.dot(emb, r["w_c1"][...], preferred_element_type=f32)
                    + r["b_c1"][...])
    value = jnp.dot(c, r["w_c2"][...], preferred_element_type=f32) + r["b_c2"][...]

    # --- packed lane-dense output: lane0=value, lane1=action, lane2=log_prob ---
    lane = lax.broadcasted_iota(jnp.int32, out_ref.shape, 1)
    packed = jnp.where(lane == 0, value,
             jnp.where(lane == 1, action.astype(f32),
             jnp.where(lane == 2, logp, 0.0)))
    out_ref[...] = packed


def _round_up(x, m):
    return ((x + m - 1) // m) * m


def _choose_tile(batch):
    # 256-row tiles (MXU-aligned) once batch is large; otherwise pad the whole
    # (tiny) batch to a multiple of 16 sublanes (bf16-packed).
    if batch >= 256:
        return 256
    return _round_up(batch, 16)


def _pad_rows(x, b_pad):
    b = x.shape[0]
    if b == b_pad:
        return x
    pad = ((0, b_pad - b),) + ((0, 0),) * (x.ndim - 1)
    return jnp.pad(x, pad)


def inter_network_forward(params, self_info, grid_map, neighbor_info, neighbor_mask,
                          robot_info, robot_mask, inter_critic_hidden):
    """Equivalent of Inter_Network.forward -> (values, actions, log_probs, hidden)."""
    batch = self_info.shape[0]
    tb = _choose_tile(batch)
    b_pad = _round_up(batch, tb)
    n_nb = neighbor_info.shape[1]
    n_rb = robot_info.shape[1]

    nb = neighbor_info.astype(jnp.float32)
    rb = robot_info.astype(jnp.float32)
    data = dict(
        self_info=self_info.astype(jnp.float32),
        # NCHW flatten (glue) + bf16 for the bandwidth-dominant stream
        grid_flat=grid_map.reshape(batch, -1).astype(jnp.bfloat16),
        nb_d0=nb[:, :, 0], nb_d1=nb[:, :, 1], nb_d2=nb[:, :, 2],
        neighbor_mask=neighbor_mask.astype(jnp.float32),
        rb_d0=rb[:, :, 0], rb_d1=rb[:, :, 1], rb_d2=rb[:, :, 2],
        robot_mask=robot_mask.astype(jnp.float32),
    )
    data = {k: _pad_rows(v, b_pad) for k, v in data.items()}

    # FOV-encoder weights on the bf16 MXU path; everything else stays f32.
    kparams = dict(params)
    kparams["w_f1"] = params["w_f1"].astype(jnp.bfloat16)
    kparams["w_f2"] = params["w_f2"].astype(jnp.bfloat16)

    flat_inputs = [data[n] for n in DATA_NAMES] + [kparams[n] for n in PARAM_NAMES]

    # Batch-tiled data specs (double-buffered pipeline); weights stay VMEM-resident.
    data_spec = lambda shape: pl.BlockSpec((tb,) + shape[1:], lambda i: (i, 0))
    weight_spec = lambda shape: pl.BlockSpec(shape, lambda i: (0, 0))
    in_specs = ([data_spec(data[n].shape) for n in DATA_NAMES]
                + [weight_spec(PARAM_SHAPES[n]) for n in PARAM_NAMES])

    out_shape = jax.ShapeDtypeStruct((b_pad, OUT_LANES), jnp.float32)
    out_spec = pl.BlockSpec((tb, OUT_LANES), lambda i: (i, 0))

    flops = 2 * b_pad * (
        GRID_FLAT * FOV_HIDDEN + FOV_HIDDEN * CNN_OUT_DIM          # FOV encoder
        + SELF_INFO_LEN * 16 + 16 * 8                              # self encoder
        + 2 * (ATT_DIM * ENTITY_DIM + ATT_DIM * ATT_DIM)           # attention blocks
        + (8 + CNN_OUT_DIM + 4 * ATT_DIM) * 64 + 64 * CNN_OUT_DIM  # mlp
        + CNN_OUT_DIM * 32 + 32 * N_ACTIONS                        # actor
        + CNN_OUT_DIM * 32 + 32)                                   # critic
    transcendentals = b_pad * (n_nb + n_rb + N_ACTIONS)
    bytes_accessed = (sum(int(x.size) * x.dtype.itemsize for x in flat_inputs)
                      + b_pad * OUT_LANES * 4)
    cost = pl.CostEstimate(flops=flops, transcendentals=transcendentals,
                           bytes_accessed=bytes_accessed)

    packed = pl.pallas_call(
        inter_network_kernel,
        grid=(b_pad // tb,),
        in_specs=in_specs,
        out_specs=out_spec,
        out_shape=out_shape,
        compiler_params=pltpu.CompilerParams(
            dimension_semantics=("parallel",),          # megacore sharding
            vmem_limit_bytes=32 * 1024 * 1024),
        cost_estimate=cost,
    )(*flat_inputs)

    values = packed[:batch, 0:1]
    actions = packed[:batch, 1:2].astype(jnp.int32)
    logps = packed[:batch, 2:3]
    # inter_critic_hidden.detach() -> stop_gradient pass-through
    return values, actions, logps, lax.stop_gradient(inter_critic_hidden)


def init_params(key):
    params = {}
    keys = jax.random.split(key, len(PARAM_NAMES))
    for k, name in zip(keys, PARAM_NAMES):
        shape = PARAM_SHAPES[name]
        if name.startswith("b"):
            params[name] = jnp.zeros(shape, jnp.float32)
        else:
            fan_in = shape[0]
            params[name] = (jax.random.normal(k, shape, dtype=jnp.float32)
                            / jnp.sqrt(jnp.float32(fan_in)))
    return params


if __name__ == "__main__":
    key = jax.random.PRNGKey(0)
    k_par, k_self, k_grid, k_nb, k_rb, k_hid = jax.random.split(key, 6)

    B, N_NB, N_RB, HID = 2, 5, 5, 64
    params = init_params(k_par)

    self_info = jax.random.normal(k_self, (B, SELF_INFO_LEN), dtype=jnp.float32)
    grid_map = jax.random.normal(k_grid, (B, GRID_C, GRID_H, GRID_W), dtype=jnp.float32)
    neighbor_info = jax.random.normal(k_nb, (B, N_NB, ENTITY_DIM), dtype=jnp.float32)
    neighbor_mask = jnp.ones((B, N_NB), jnp.float32).at[:, -1].set(0.0)
    robot_info = jax.random.normal(k_rb, (B, N_RB, ENTITY_DIM), dtype=jnp.float32)
    robot_mask = jnp.ones((B, N_RB), jnp.float32).at[:, -2:].set(0.0)
    inter_critic_hidden = jax.random.normal(k_hid, (B, HID), dtype=jnp.float32)

    values, actions, logps, hidden_out = inter_network_forward(
        params, self_info, grid_map, neighbor_info, neighbor_mask,
        robot_info, robot_mask, inter_critic_hidden)
    jax.block_until_ready((values, actions, logps, hidden_out))

    assert values.shape == (B, 1) and values.dtype == jnp.float32
    assert actions.shape == (B, 1) and actions.dtype == jnp.int32
    assert logps.shape == (B, 1) and logps.dtype == jnp.float32
    assert hidden_out.shape == (B, HID)
    assert bool(jnp.all(jnp.isfinite(values))) and bool(jnp.all(jnp.isfinite(logps)))
    assert bool(jnp.all(actions >= 0)) and bool(jnp.all(actions < N_ACTIONS))
    print("KERNEL_OK")
</pallas_src>

<mosaic_0001>
module attributes {stable_mosaic.version = 11 : i64} {
  func.func @inter_network_kernel(%arg0: i32, %arg1: memref<16x2xf32, #tpu.memory_space<vmem>>, %arg2: memref<16x1024xbf16, #tpu.memory_space<vmem>>, %arg3: memref<16x5xf32, #tpu.memory_space<vmem>>, %arg4: memref<16x5xf32, #tpu.memory_space<vmem>>, %arg5: memref<16x5xf32, #tpu.memory_space<vmem>>, %arg6: memref<16x5xf32, #tpu.memory_space<vmem>>, %arg7: memref<16x5xf32, #tpu.memory_space<vmem>>, %arg8: memref<16x5xf32, #tpu.memory_space<vmem>>, %arg9: memref<16x5xf32, #tpu.memory_space<vmem>>, %arg10: memref<16x5xf32, #tpu.memory_space<vmem>>, %arg11: memref<2x16xf32, #tpu.memory_space<vmem>>, %arg12: memref<1x16xf32, #tpu.memory_space<vmem>>, %arg13: memref<16x8xf32, #tpu.memory_space<vmem>>, %arg14: memref<1x8xf32, #tpu.memory_space<vmem>>, %arg15: memref<1024x128xbf16, #tpu.memory_space<vmem>>, %arg16: memref<1x128xf32, #tpu.memory_space<vmem>>, %arg17: memref<128x192xbf16, #tpu.memory_space<vmem>>, %arg18: memref<1x192xf32, #tpu.memory_space<vmem>>, %arg19: memref<2x3xf32, #tpu.memory_space<vmem>>, %arg20: memref<1x3xf32, #tpu.memory_space<vmem>>, %arg21: memref<2x3xf32, #tpu.memory_space<vmem>>, %arg22: memref<1x3xf32, #tpu.memory_space<vmem>>, %arg23: memref<3x64xf32, #tpu.memory_space<vmem>>, %arg24: memref<3x64xf32, #tpu.memory_space<vmem>>, %arg25: memref<3x64xf32, #tpu.memory_space<vmem>>, %arg26: memref<64x64xf32, #tpu.memory_space<vmem>>, %arg27: memref<1x64xf32, #tpu.memory_space<vmem>>, %arg28: memref<3x64xf32, #tpu.memory_space<vmem>>, %arg29: memref<3x64xf32, #tpu.memory_space<vmem>>, %arg30: memref<3x64xf32, #tpu.memory_space<vmem>>, %arg31: memref<64x64xf32, #tpu.memory_space<vmem>>, %arg32: memref<1x64xf32, #tpu.memory_space<vmem>>, %arg33: memref<8x64xf32, #tpu.memory_space<vmem>>, %arg34: memref<192x64xf32, #tpu.memory_space<vmem>>, %arg35: memref<64x64xf32, #tpu.memory_space<vmem>>, %arg36: memref<64x64xf32, #tpu.memory_space<vmem>>, %arg37: memref<64x64xf32, #tpu.memory_space<vmem>>, %arg38: memref<64x64xf32, #tpu.memory_space<vmem>>, %arg39: memref<1x64xf32, #tpu.memory_space<vmem>>, %arg40: memref<64x192xf32, #tpu.memory_space<vmem>>, %arg41: memref<1x192xf32, #tpu.memory_space<vmem>>, %arg42: memref<192x32xf32, #tpu.memory_space<vmem>>, %arg43: memref<1x32xf32, #tpu.memory_space<vmem>>, %arg44: memref<32x36xf32, #tpu.memory_space<vmem>>, %arg45: memref<1x36xf32, #tpu.memory_space<vmem>>, %arg46: memref<192x32xf32, #tpu.memory_space<vmem>>, %arg47: memref<1x32xf32, #tpu.memory_space<vmem>>, %arg48: memref<32x1xf32, #tpu.memory_space<vmem>>, %arg49: memref<1x1xf32, #tpu.memory_space<vmem>>, %arg50: memref<16x128xf32, #tpu.memory_space<vmem>>) attributes {dimension_semantics = [#tpu.dimension_semantics<parallel>], iteration_bounds = array<i64: 1>, scalar_prefetch = 0 : i64, scratch_operands = 0 : i64, tpu.core_type = #tpu.core_type<tc>, window_params = [{transform_indices = @transform_0, window_bounds = array<i64: 16, 2>}, {transform_indices = @transform_1, window_bounds = array<i64: 16, 1024>}, {transform_indices = @transform_2, window_bounds = array<i64: 16, 5>}, {transform_indices = @transform_3, window_bounds = array<i64: 16, 5>}, {transform_indices = @transform_4, window_bounds = array<i64: 16, 5>}, {transform_indices = @transform_5, window_bounds = array<i64: 16, 5>}, {transform_indices = @transform_6, window_bounds = array<i64: 16, 5>}, {transform_indices = @transform_7, window_bounds = array<i64: 16, 5>}, {transform_indices = @transform_8, window_bounds = array<i64: 16, 5>}, {transform_indices = @transform_9, window_bounds = array<i64: 16, 5>}, {pipeline_mode = #tpu.pipeline_mode<synchronous>, transform_indices = @transform_10, window_bounds = array<i64: 2, 16>}, {pipeline_mode = #tpu.pipeline_mode<synchronous>, transform_indices = @transform_11, window_bounds = array<i64: 1, 16>}, {pipeline_mode = #tpu.pipeline_mode<synchronous>, transform_indices = @transform_12, window_bounds = array<i64: 16, 8>}, {pipeline_mode = #tpu.pipeline_mode<synchronous>, transform_indices = @transform_13, window_bounds = array<i64: 1, 8>}, {pipeline_mode = #tpu.pipeline_mode<synchronous>, transform_indices = @transform_14, window_bounds = array<i64: 1024, 128>}, {pipeline_mode = #tpu.pipeline_mode<synchronous>, transform_indices = @transform_15, window_bounds = array<i64: 1, 128>}, {pipeline_mode = #tpu.pipeline_mode<synchronous>, transform_indices = @transform_16, window_bounds = array<i64: 128, 192>}, {pipeline_mode = #tpu.pipeline_mode<synchronous>, transform_indices = @transform_17, window_bounds = array<i64: 1, 192>}, {pipeline_mode = #tpu.pipeline_mode<synchronous>, transform_indices = @transform_18, window_bounds = array<i64: 2, 3>}, {pipeline_mode = #tpu.pipeline_mode<synchronous>, transform_indices = @transform_19, window_bounds = array<i64: 1, 3>}, {pipeline_mode = #tpu.pipeline_mode<synchronous>, transform_indices = @transform_20, window_bounds = array<i64: 2, 3>}, {pipeline_mode = #tpu.pipeline_mode<synchronous>, transform_indices = @transform_21, window_bounds = array<i64: 1, 3>}, {pipeline_mode = #tpu.pipeline_mode<synchronous>, transform_indices = @transform_22, window_bounds = array<i64: 3, 64>}, {pipeline_mode = #tpu.pipeline_mode<synchronous>, transform_indices = @transform_23, window_bounds = array<i64: 3, 64>}, {pipeline_mode = #tpu.pipeline_mode<synchronous>, transform_indices = @transform_24, window_bounds = array<i64: 3, 64>}, {pipeline_mode = #tpu.pipeline_mode<synchronous>, transform_indices = @transform_25, window_bounds = array<i64: 64, 64>}, {pipeline_mode = #tpu.pipeline_mode<synchronous>, transform_indices = @transform_26, window_bounds = array<i64: 1, 64>}, {pipeline_mode = #tpu.pipeline_mode<synchronous>, transform_indices = @transform_27, window_bounds = array<i64: 3, 64>}, {pipeline_mode = #tpu.pipeline_mode<synchronous>, transform_indices = @transform_28, window_bounds = array<i64: 3, 64>}, {pipeline_mode = #tpu.pipeline_mode<synchronous>, transform_indices = @transform_29, window_bounds = array<i64: 3, 64>}, {pipeline_mode = #tpu.pipeline_mode<synchronous>, transform_indices = @transform_30, window_bounds = array<i64: 64, 64>}, {pipeline_mode = #tpu.pipeline_mode<synchronous>, transform_indices = @transform_31, window_bounds = array<i64: 1, 64>}, {pipeline_mode = #tpu.pipeline_mode<synchronous>, transform_indices = @transform_32, window_bounds = array<i64: 8, 64>}, {pipeline_mode = #tpu.pipeline_mode<synchronous>, transform_indices = @transform_33, window_bounds = array<i64: 192, 64>}, {pipeline_mode = #tpu.pipeline_mode<synchronous>, transform_indices = @transform_34, window_bounds = array<i64: 64, 64>}, {pipeline_mode = #tpu.pipeline_mode<synchronous>, transform_indices = @transform_35, window_bounds = array<i64: 64, 64>}, {pipeline_mode = #tpu.pipeline_mode<synchronous>, transform_indices = @transform_36, window_bounds = array<i64: 64, 64>}, {pipeline_mode = #tpu.pipeline_mode<synchronous>, transform_indices = @transform_37, window_bounds = array<i64: 64, 64>}, {pipeline_mode = #tpu.pipeline_mode<synchronous>, transform_indices = @transform_38, window_bounds = array<i64: 1, 64>}, {pipeline_mode = #tpu.pipeline_mode<synchronous>, transform_indices = @transform_39, window_bounds = array<i64: 64, 192>}, {pipeline_mode = #tpu.pipeline_mode<synchronous>, transform_indices = @transform_40, window_bounds = array<i64: 1, 192>}, {pipeline_mode = #tpu.pipeline_mode<synchronous>, transform_indices = @transform_41, window_bounds = array<i64: 192, 32>}, {pipeline_mode = #tpu.pipeline_mode<synchronous>, transform_indices = @transform_42, window_bounds = array<i64: 1, 32>}, {pipeline_mode = #tpu.pipeline_mode<synchronous>, transform_indices = @transform_43, window_bounds = array<i64: 32, 36>}, {pipeline_mode = #tpu.pipeline_mode<synchronous>, transform_indices = @transform_44, window_bounds = array<i64: 1, 36>}, {pipeline_mode = #tpu.pipeline_mode<synchronous>, transform_indices = @transform_45, window_bounds = array<i64: 192, 32>}, {pipeline_mode = #tpu.pipeline_mode<synchronous>, transform_indices = @transform_46, window_bounds = array<i64: 1, 32>}, {pipeline_mode = #tpu.pipeline_mode<synchronous>, transform_indices = @transform_47, window_bounds = array<i64: 32, 1>}, {pipeline_mode = #tpu.pipeline_mode<synchronous>, transform_indices = @transform_48, window_bounds = array<i64: 1, 1>}, {transform_indices = @transform_49, window_bounds = array<i64: 16, 128>}]} {
    %c0 = arith.constant 0 : index
    %c0_0 = arith.constant 0 : index
    %0 = vector.load %arg1[%c0, %c0_0] : memref<16x2xf32, #tpu.memory_space<vmem>>, vector<16x2xf32>
    %c0_1 = arith.constant 0 : index
    %c0_2 = arith.constant 0 : index
    %1 = vector.load %arg2[%c0_1, %c0_2] : memref<16x1024xbf16, #tpu.memory_space<vmem>>, vector<16x1024xbf16>
    %c0_3 = arith.constant 0 : index
    %c0_4 = arith.constant 0 : index
    %2 = vector.load %arg3[%c0_3, %c0_4] : memref<16x5xf32, #tpu.memory_space<vmem>>, vector<16x5xf32>
    %c0_5 = arith.constant 0 : index
    %c0_6 = arith.constant 0 : index
    %3 = vector.load %arg4[%c0_5, %c0_6] : memref<16x5xf32, #tpu.memory_space<vmem>>, vector<16x5xf32>
    %c0_7 = arith.constant 0 : index
    %c0_8 = arith.constant 0 : index
    %4 = vector.load %arg5[%c0_7, %c0_8] : memref<16x5xf32, #tpu.memory_space<vmem>>, vector<16x5xf32>
    %c0_9 = arith.constant 0 : index
    %c0_10 = arith.constant 0 : index
    %5 = vector.load %arg6[%c0_9, %c0_10] : memref<16x5xf32, #tpu.memory_space<vmem>>, vector<16x5xf32>
    %c0_11 = arith.constant 0 : index
    %c0_12 = arith.constant 0 : index
    %6 = vector.load %arg7[%c0_11, %c0_12] : memref<16x5xf32, #tpu.memory_space<vmem>>, vector<16x5xf32>
    %c0_13 = arith.constant 0 : index
    %c0_14 = arith.constant 0 : index
    %7 = vector.load %arg8[%c0_13, %c0_14] : memref<16x5xf32, #tpu.memory_space<vmem>>, vector<16x5xf32>
    %c0_15 = arith.constant 0 : index
    %c0_16 = arith.constant 0 : index
    %8 = vector.load %arg9[%c0_15, %c0_16] : memref<16x5xf32, #tpu.memory_space<vmem>>, vector<16x5xf32>
    %c0_17 = arith.constant 0 : index
    %c0_18 = arith.constant 0 : index
    %9 = vector.load %arg10[%c0_17, %c0_18] : memref<16x5xf32, #tpu.memory_space<vmem>>, vector<16x5xf32>
    %c0_19 = arith.constant 0 : index
    %c0_20 = arith.constant 0 : index
    %10 = vector.load %arg11[%c0_19, %c0_20] : memref<2x16xf32, #tpu.memory_space<vmem>>, vector<2x16xf32>
    %c0_21 = arith.constant 0 : index
    %c0_22 = arith.constant 0 : index
    %11 = vector.load %arg12[%c0_21, %c0_22] : memref<1x16xf32, #tpu.memory_space<vmem>>, vector<1x16xf32>
    %12 = vector.extract_strided_slice %0 {offsets = [0, 0], sizes = [16, 1], strides = [1, 1]} : vector<16x2xf32> to vector<16x1xf32>
    %13 = vector.extract_strided_slice %10 {offsets = [0, 0], sizes = [1, 16], strides = [1, 1]} : vector<2x16xf32> to vector<1x16xf32>
    %14 = vector.broadcast %12 : vector<16x1xf32> to vector<16x16xf32>
    %15 = vector.broadcast %13 : vector<1x16xf32> to vector<16x16xf32>
    %16 = arith.mulf %14, %15 : vector<16x16xf32>
    %17 = vector.extract_strided_slice %0 {offsets = [0, 1], sizes = [16, 1], strides = [1, 1]} : vector<16x2xf32> to vector<16x1xf32>
    %18 = vector.extract_strided_slice %10 {offsets = [1, 0], sizes = [1, 16], strides = [1, 1]} : vector<2x16xf32> to vector<1x16xf32>
    %19 = vector.broadcast %17 : vector<16x1xf32> to vector<16x16xf32>
    %20 = vector.broadcast %18 : vector<1x16xf32> to vector<16x16xf32>
    %21 = arith.mulf %19, %20 : vector<16x16xf32>
    %22 = arith.addf %16, %21 : vector<16x16xf32>
    %23 = vector.broadcast %11 : vector<1x16xf32> to vector<16x16xf32>
    %24 = arith.addf %22, %23 : vector<16x16xf32>
    %cst = arith.constant 0.000000e+00 : f32
    %25 = vector.broadcast %cst : f32 to vector<16x16xf32>
    %26 = arith.cmpf oge, %24, %25 : vector<16x16xf32>
    %cst_23 = arith.constant 0.00999999977 : f32
    %27 = vector.broadcast %cst_23 : f32 to vector<16x16xf32>
    %28 = arith.mulf %27, %24 : vector<16x16xf32>
    %29 = arith.select %26, %24, %28 : vector<16x16xi1>, vector<16x16xf32>
    %c0_24 = arith.constant 0 : index
    %c0_25 = arith.constant 0 : index
    %30 = vector.load %arg13[%c0_24, %c0_25] : memref<16x8xf32, #tpu.memory_space<vmem>>, vector<16x8xf32>
    %cst_26 = arith.constant dense<0.000000e+00> : vector<16x8xf32>
    %31 = tpu.matmul %29, %30, %cst_26 {dimension_numbers = #tpu.dot_dimension_numbers<[1], [0], [0], [1], [0, 0, 1, 1], [], []>} : vector<16x16xf32>, vector<16x8xf32>, vector<16x8xf32> -> vector<16x8xf32>
    %c0_27 = arith.constant 0 : index
    %c0_28 = arith.constant 0 : index
    %32 = vector.load %arg14[%c0_27, %c0_28] : memref<1x8xf32, #tpu.memory_space<vmem>>, vector<1x8xf32>
    %33 = vector.broadcast %32 : vector<1x8xf32> to vector<16x8xf32>
    %34 = arith.addf %31, %33 : vector<16x8xf32>
    %cst_29 = arith.constant 0.000000e+00 : f32
    %35 = vector.broadcast %cst_29 : f32 to vector<16x8xf32>
    %36 = arith.cmpf oge, %34, %35 : vector<16x8xf32>
    %cst_30 = arith.constant 0.00999999977 : f32
    %37 = vector.broadcast %cst_30 : f32 to vector<16x8xf32>
    %38 = arith.mulf %37, %34 : vector<16x8xf32>
    %39 = arith.select %36, %34, %38 : vector<16x8xi1>, vector<16x8xf32>
    %c0_31 = arith.constant 0 : index
    %c0_32 = arith.constant 0 : index
    %40 = vector.load %arg15[%c0_31, %c0_32] : memref<1024x128xbf16, #tpu.memory_space<vmem>>, vector<1024x128xbf16>
    %cst_33 = arith.constant dense<0.000000e+00> : vector<16x128xf32>
    %41 = tpu.matmul %1, %40, %cst_33 {dimension_numbers = #tpu.dot_dimension_numbers<[1], [0], [0], [1], [0, 0, 1, 1], [], []>} : vector<16x1024xbf16>, vector<1024x128xbf16>, vector<16x128xf32> -> vector<16x128xf32>
    %c0_34 = arith.constant 0 : index
    %c0_35 = arith.constant 0 : index
    %42 = vector.load %arg16[%c0_34, %c0_35] : memref<1x128xf32, #tpu.memory_space<vmem>>, vector<1x128xf32>
    %43 = vector.broadcast %42 : vector<1x128xf32> to vector<16x128xf32>
    %44 = arith.addf %41, %43 : vector<16x128xf32>
    %cst_36 = arith.constant 0.000000e+00 : f32
    %45 = vector.broadcast %cst_36 : f32 to vector<16x128xf32>
    %46 = arith.cmpf oge, %44, %45 : vector<16x128xf32>
    %cst_37 = arith.constant 0.00999999977 : f32
    %47 = vector.broadcast %cst_37 : f32 to vector<16x128xf32>
    %48 = arith.mulf %47, %44 : vector<16x128xf32>
    %49 = arith.select %46, %44, %48 : vector<16x128xi1>, vector<16x128xf32>
    %50 = arith.truncf %49 : vector<16x128xf32> to vector<16x128xbf16>
    %c0_38 = arith.constant 0 : index
    %c0_39 = arith.constant 0 : index
    %51 = vector.load %arg17[%c0_38, %c0_39] : memref<128x192xbf16, #tpu.memory_space<vmem>>, vector<128x192xbf16>
    %cst_40 = arith.constant dense<0.000000e+00> : vector<16x192xf32>
    %52 = tpu.matmul %50, %51, %cst_40 {dimension_numbers = #tpu.dot_dimension_numbers<[1], [0], [0], [1], [0, 0, 1, 1], [], []>} : vector<16x128xbf16>, vector<128x192xbf16>, vector<16x192xf32> -> vector<16x192xf32>
    %c0_41 = arith.constant 0 : index
    %c0_42 = arith.constant 0 : index
    %53 = vector.load %arg18[%c0_41, %c0_42] : memref<1x192xf32, #tpu.memory_space<vmem>>, vector<1x192xf32>
    %54 = vector.broadcast %53 : vector<1x192xf32> to vector<16x192xf32>
    %55 = arith.addf %52, %54 : vector<16x192xf32>
    %cst_43 = arith.constant 0.000000e+00 : f32
    %56 = vector.broadcast %cst_43 : f32 to vector<16x192xf32>
    %57 = arith.cmpf oge, %55, %56 : vector<16x192xf32>
    %cst_44 = arith.constant 0.00999999977 : f32
    %58 = vector.broadcast %cst_44 : f32 to vector<16x192xf32>
    %59 = arith.mulf %58, %55 : vector<16x192xf32>
    %60 = arith.select %57, %55, %59 : vector<16x192xi1>, vector<16x192xf32>
    %c0_45 = arith.constant 0 : index
    %c0_46 = arith.constant 0 : index
    %61 = vector.load %arg19[%c0_45, %c0_46] : memref<2x3xf32, #tpu.memory_space<vmem>>, vector<2x3xf32>
    %c0_47 = arith.constant 0 : index
    %c0_48 = arith.constant 0 : index
    %62 = vector.load %arg20[%c0_47, %c0_48] : memref<1x3xf32, #tpu.memory_space<vmem>>, vector<1x3xf32>
    %63 = vector.extract_strided_slice %0 {offsets = [0, 0], sizes = [16, 1], strides = [1, 1]} : vector<16x2xf32> to vector<16x1xf32>
    %64 = vector.extract_strided_slice %61 {offsets = [0, 0], sizes = [1, 3], strides = [1, 1]} : vector<2x3xf32> to vector<1x3xf32>
    %65 = vector.broadcast %63 : vector<16x1xf32> to vector<16x3xf32>
    %66 = vector.broadcast %64 : vector<1x3xf32> to vector<16x3xf32>
    %67 = arith.mulf %65, %66 : vector<16x3xf32>
    %68 = vector.extract_strided_slice %0 {offsets = [0, 1], sizes = [16, 1], strides = [1, 1]} : vector<16x2xf32> to vector<16x1xf32>
    %69 = vector.extract_strided_slice %61 {offsets = [1, 0], sizes = [1, 3], strides = [1, 1]} : vector<2x3xf32> to vector<1x3xf32>
    %70 = vector.broadcast %68 : vector<16x1xf32> to vector<16x3xf32>
    %71 = vector.broadcast %69 : vector<1x3xf32> to vector<16x3xf32>
    %72 = arith.mulf %70, %71 : vector<16x3xf32>
    %73 = arith.addf %67, %72 : vector<16x3xf32>
    %74 = vector.broadcast %62 : vector<1x3xf32> to vector<16x3xf32>
    %75 = arith.addf %73, %74 : vector<16x3xf32>
    %c0_49 = arith.constant 0 : index
    %c0_50 = arith.constant 0 : index
    %76 = vector.load %arg23[%c0_49, %c0_50] : memref<3x64xf32, #tpu.memory_space<vmem>>, vector<3x64xf32>
    %c0_51 = arith.constant 0 : index
    %c0_52 = arith.constant 0 : index
    %77 = vector.load %arg24[%c0_51, %c0_52] : memref<3x64xf32, #tpu.memory_space<vmem>>, vector<3x64xf32>
    %c0_53 = arith.constant 0 : index
    %c0_54 = arith.constant 0 : index
    %78 = vector.load %arg25[%c0_53, %c0_54] : memref<3x64xf32, #tpu.memory_space<vmem>>, vector<3x64xf32>
    %c0_55 = arith.constant 0 : index
    %c0_56 = arith.constant 0 : index
    %79 = vector.load %arg26[%c0_55, %c0_56] : memref<64x64xf32, #tpu.memory_space<vmem>>, vector<64x64xf32>
    %c0_57 = arith.constant 0 : index
    %c0_58 = arith.constant 0 : index
    %80 = vector.load %arg27[%c0_57, %c0_58] : memref<1x64xf32, #tpu.memory_space<vmem>>, vector<1x64xf32>
    %81 = vector.extract_strided_slice %75 {offsets = [0, 0], sizes = [16, 1], strides = [1, 1]} : vector<16x3xf32> to vector<16x1xf32>
    %82 = vector.extract_strided_slice %76 {offsets = [0, 0], sizes = [1, 64], strides = [1, 1]} : vector<3x64xf32> to vector<1x64xf32>
    %83 = vector.broadcast %81 : vector<16x1xf32> to vector<16x64xf32>
    %84 = vector.broadcast %82 : vector<1x64xf32> to vector<16x64xf32>
    %85 = arith.mulf %83, %84 : vector<16x64xf32>
    %86 = vector.extract_strided_slice %75 {offsets = [0, 1], sizes = [16, 1], strides = [1, 1]} : vector<16x3xf32> to vector<16x1xf32>
    %87 = vector.extract_strided_slice %76 {offsets = [1, 0], sizes = [1, 64], strides = [1, 1]} : vector<3x64xf32> to vector<1x64xf32>
    %88 = vector.broadcast %86 : vector<16x1xf32> to vector<16x64xf32>
    %89 = vector.broadcast %87 : vector<1x64xf32> to vector<16x64xf32>
    %90 = arith.mulf %88, %89 : vector<16x64xf32>
    %91 = arith.addf %85, %90 : vector<16x64xf32>
    %92 = vector.extract_strided_slice %75 {offsets = [0, 2], sizes = [16, 1], strides = [1, 1]} : vector<16x3xf32> to vector<16x1xf32>
    %93 = vector.extract_strided_slice %76 {offsets = [2, 0], sizes = [1, 64], strides = [1, 1]} : vector<3x64xf32> to vector<1x64xf32>
    %94 = vector.broadcast %92 : vector<16x1xf32> to vector<16x64xf32>
    %95 = vector.broadcast %93 : vector<1x64xf32> to vector<16x64xf32>
    %96 = arith.mulf %94, %95 : vector<16x64xf32>
    %97 = arith.addf %91, %96 : vector<16x64xf32>
    %cst_59 = arith.constant dense<0.000000e+00> : vector<16x3xf32>
    %98 = tpu.matmul %97, %77, %cst_59 {dimension_numbers = #tpu.dot_dimension_numbers<[1], [1], [0], [0], [0, 0, 1, 0], [], []>} : vector<16x64xf32>, vector<3x64xf32>, vector<16x3xf32> -> vector<16x3xf32>
    %99 = vector.extract_strided_slice %98 {offsets = [0, 0], sizes = [16, 1], strides = [1, 1]} : vector<16x3xf32> to vector<16x1xf32>
    %100 = vector.broadcast %99 : vector<16x1xf32> to vector<16x5xf32>
    %101 = arith.mulf %100, %2 : vector<16x5xf32>
    %102 = vector.extract_strided_slice %98 {offsets = [0, 1], sizes = [16, 1], strides = [1, 1]} : vector<16x3xf32> to vector<16x1xf32>
    %103 = vector.broadcast %102 : vector<16x1xf32> to vector<16x5xf32>
    %104 = arith.mulf %103, %3 : vector<16x5xf32>
    %105 = arith.addf %101, %104 : vector<16x5xf32>
    %106 = vector.extract_strided_slice %98 {offsets = [0, 2], sizes = [16, 1], strides = [1, 1]} : vector<16x3xf32> to vector<16x1xf32>
    %107 = vector.broadcast %106 : vector<16x1xf32> to vector<16x5xf32>
    %108 = arith.mulf %107, %4 : vector<16x5xf32>
    %109 = arith.addf %105, %108 : vector<16x5xf32>
    %cst_60 = arith.constant 1.250000e-01 : f32
    %110 = vector.broadcast %cst_60 : f32 to vector<16x5xf32>
    %111 = arith.mulf %109, %110 : vector<16x5xf32>
    %cst_61 = arith.constant 0.000000e+00 : f32
    %112 = vector.broadcast %cst_61 : f32 to vector<16x5xf32>
    %113 = arith.cmpf ogt, %5, %112 : vector<16x5xf32>
    %cst_62 = arith.constant -1.000000e+09 : f32
    %114 = vector.broadcast %cst_62 : f32 to vector<16x5xf32>
    %115 = arith.select %113, %111, %114 : vector<16x5xi1>, vector<16x5xf32>
    %cst_63 = arith.constant dense<0xFF800000> : vector<16xf32>
    %116 = vector.multi_reduction <maximumf>, %115, %cst_63 [1] : vector<16x5xf32> to vector<16xf32>
    %117 = vector.shape_cast %116 : vector<16xf32> to vector<16x1xf32>
    %118 = vector.broadcast %117 : vector<16x1xf32> to vector<16x5xf32>
    %119 = arith.subf %115, %118 : vector<16x5xf32>
    %120 = math.exp %119 : vector<16x5xf32>
    %cst_64 = arith.constant dense<0.000000e+00> : vector<16xf32>
    %121 = vector.multi_reduction <add>, %120, %cst_64 [1] : vector<16x5xf32> to vector<16xf32>
    %122 = vector.shape_cast %121 : vector<16xf32> to vector<16x1xf32>
    %123 = vector.broadcast %122 : vector<16x1xf32> to vector<16x5xf32>
    %124 = arith.divf %120, %123 : vector<16x5xf32>
    %125 = arith.mulf %124, %2 : vector<16x5xf32>
    %cst_65 = arith.constant dense<0.000000e+00> : vector<16xf32>
    %126 = vector.multi_reduction <add>, %125, %cst_65 [1] : vector<16x5xf32> to vector<16xf32>
    %127 = vector.shape_cast %126 : vector<16xf32> to vector<16x1xf32>
    %128 = arith.mulf %124, %3 : vector<16x5xf32>
    %cst_66 = arith.constant dense<0.000000e+00> : vector<16xf32>
    %129 = vector.multi_reduction <add>, %128, %cst_66 [1] : vector<16x5xf32> to vector<16xf32>
    %130 = vector.shape_cast %129 : vector<16xf32> to vector<16x1xf32>
    %131 = arith.mulf %124, %4 : vector<16x5xf32>
    %cst_67 = arith.constant dense<0.000000e+00> : vector<16xf32>
    %132 = vector.multi_reduction <add>, %131, %cst_67 [1] : vector<16x5xf32> to vector<16xf32>
    %133 = vector.shape_cast %132 : vector<16xf32> to vector<16x1xf32>
    %134 = vector.extract_strided_slice %78 {offsets = [0, 0], sizes = [1, 64], strides = [1, 1]} : vector<3x64xf32> to vector<1x64xf32>
    %135 = vector.broadcast %127 : vector<16x1xf32> to vector<16x64xf32>
    %136 = vector.broadcast %134 : vector<1x64xf32> to vector<16x64xf32>
    %137 = arith.mulf %135, %136 : vector<16x64xf32>
    %138 = vector.extract_strided_slice %78 {offsets = [1, 0], sizes = [1, 64], strides = [1, 1]} : vector<3x64xf32> to vector<1x64xf32>
    %139 = vector.broadcast %130 : vector<16x1xf32> to vector<16x64xf32>
    %140 = vector.broadcast %138 : vector<1x64xf32> to vector<16x64xf32>
    %141 = arith.mulf %139, %140 : vector<16x64xf32>
    %142 = arith.addf %137, %141 : vector<16x64xf32>
    %143 = vector.extract_strided_slice %78 {offsets = [2, 0], sizes = [1, 64], strides = [1, 1]} : vector<3x64xf32> to vector<1x64xf32>
    %144 = vector.broadcast %133 : vector<16x1xf32> to vector<16x64xf32>
    %145 = vector.broadcast %143 : vector<1x64xf32> to vector<16x64xf32>
    %146 = arith.mulf %144, %145 : vector<16x64xf32>
    %147 = arith.addf %142, %146 : vector<16x64xf32>
    %cst_68 = arith.constant dense<0.000000e+00> : vector<16x64xf32>
    %148 = tpu.matmul %147, %79, %cst_68 {dimension_numbers = #tpu.dot_dimension_numbers<[1], [0], [0], [1], [0, 0, 1, 1], [], []>} : vector<16x64xf32>, vector<64x64xf32>, vector<16x64xf32> -> vector<16x64xf32>
    %149 = vector.broadcast %80 : vector<1x64xf32> to vector<16x64xf32>
    %150 = arith.addf %148, %149 : vector<16x64xf32>
    %c0_69 = arith.constant 0 : index
    %c0_70 = arith.constant 0 : index
    %151 = vector.load %arg21[%c0_69, %c0_70] : memref<2x3xf32, #tpu.memory_space<vmem>>, vector<2x3xf32>
    %c0_71 = arith.constant 0 : index
    %c0_72 = arith.constant 0 : index
    %152 = vector.load %arg22[%c0_71, %c0_72] : memref<1x3xf32, #tpu.memory_space<vmem>>, vector<1x3xf32>
    %153 = vector.extract_strided_slice %0 {offsets = [0, 0], sizes = [16, 1], strides = [1, 1]} : vector<16x2xf32> to vector<16x1xf32>
    %154 = vector.extract_strided_slice %151 {offsets = [0, 0], sizes = [1, 3], strides = [1, 1]} : vector<2x3xf32> to vector<1x3xf32>
    %155 = vector.broadcast %153 : vector<16x1xf32> to vector<16x3xf32>
    %156 = vector.broadcast %154 : vector<1x3xf32> to vector<16x3xf32>
    %157 = arith.mulf %155, %156 : vector<16x3xf32>
    %158 = vector.extract_strided_slice %0 {offsets = [0, 1], sizes = [16, 1], strides = [1, 1]} : vector<16x2xf32> to vector<16x1xf32>
    %159 = vector.extract_strided_slice %151 {offsets = [1, 0], sizes = [1, 3], strides = [1, 1]} : vector<2x3xf32> to vector<1x3xf32>
    %160 = vector.broadcast %158 : vector<16x1xf32> to vector<16x3xf32>
    %161 = vector.broadcast %159 : vector<1x3xf32> to vector<16x3xf32>
    %162 = arith.mulf %160, %161 : vector<16x3xf32>
    %163 = arith.addf %157, %162 : vector<16x3xf32>
    %164 = vector.broadcast %152 : vector<1x3xf32> to vector<16x3xf32>
    %165 = arith.addf %163, %164 : vector<16x3xf32>
    %c0_73 = arith.constant 0 : index
    %c0_74 = arith.constant 0 : index
    %166 = vector.load %arg28[%c0_73, %c0_74] : memref<3x64xf32, #tpu.memory_space<vmem>>, vector<3x64xf32>
    %c0_75 = arith.constant 0 : index
    %c0_76 = arith.constant 0 : index
    %167 = vector.load %arg29[%c0_75, %c0_76] : memref<3x64xf32, #tpu.memory_space<vmem>>, vector<3x64xf32>
    %c0_77 = arith.constant 0 : index
    %c0_78 = arith.constant 0 : index
    %168 = vector.load %arg30[%c0_77, %c0_78] : memref<3x64xf32, #tpu.memory_space<vmem>>, vector<3x64xf32>
    %c0_79 = arith.constant 0 : index
    %c0_80 = arith.constant 0 : index
    %169 = vector.load %arg31[%c0_79, %c0_80] : memref<64x64xf32, #tpu.memory_space<vmem>>, vector<64x64xf32>
    %c0_81 = arith.constant 0 : index
    %c0_82 = arith.constant 0 : index
    %170 = vector.load %arg32[%c0_81, %c0_82] : memref<1x64xf32, #tpu.memory_space<vmem>>, vector<1x64xf32>
    %171 = vector.extract_strided_slice %165 {offsets = [0, 0], sizes = [16, 1], strides = [1, 1]} : vector<16x3xf32> to vector<16x1xf32>
    %172 = vector.extract_strided_slice %166 {offsets = [0, 0], sizes = [1, 64], strides = [1, 1]} : vector<3x64xf32> to vector<1x64xf32>
    %173 = vector.broadcast %171 : vector<16x1xf32> to vector<16x64xf32>
    %174 = vector.broadcast %172 : vector<1x64xf32> to vector<16x64xf32>
    %175 = arith.mulf %173, %174 : vector<16x64xf32>
    %176 = vector.extract_strided_slice %165 {offsets = [0, 1], sizes = [16, 1], strides = [1, 1]} : vector<16x3xf32> to vector<16x1xf32>
    %177 = vector.extract_strided_slice %166 {offsets = [1, 0], sizes = [1, 64], strides = [1, 1]} : vector<3x64xf32> to vector<1x64xf32>
    %178 = vector.broadcast %176 : vector<16x1xf32> to vector<16x64xf32>
    %179 = vector.broadcast %177 : vector<1x64xf32> to vector<16x64xf32>
    %180 = arith.mulf %178, %179 : vector<16x64xf32>
    %181 = arith.addf %175, %180 : vector<16x64xf32>
    %182 = vector.extract_strided_slice %165 {offsets = [0, 2], sizes = [16, 1], strides = [1, 1]} : vector<16x3xf32> to vector<16x1xf32>
    %183 = vector.extract_strided_slice %166 {offsets = [2, 0], sizes = [1, 64], strides = [1, 1]} : vector<3x64xf32> to vector<1x64xf32>
    %184 = vector.broadcast %182 : vector<16x1xf32> to vector<16x64xf32>
    %185 = vector.broadcast %183 : vector<1x64xf32> to vector<16x64xf32>
    %186 = arith.mulf %184, %185 : vector<16x64xf32>
    %187 = arith.addf %181, %186 : vector<16x64xf32>
    %cst_83 = arith.constant dense<0.000000e+00> : vector<16x3xf32>
    %188 = tpu.matmul %187, %167, %cst_83 {dimension_numbers = #tpu.dot_dimension_numbers<[1], [1], [0], [0], [0, 0, 1, 0], [], []>} : vector<16x64xf32>, vector<3x64xf32>, vector<16x3xf32> -> vector<16x3xf32>
    %189 = vector.extract_strided_slice %188 {offsets = [0, 0], sizes = [16, 1], strides = [1, 1]} : vector<16x3xf32> to vector<16x1xf32>
    %190 = vector.broadcast %189 : vector<16x1xf32> to vector<16x5xf32>
    %191 = arith.mulf %190, %6 : vector<16x5xf32>
    %192 = vector.extract_strided_slice %188 {offsets = [0, 1], sizes = [16, 1], strides = [1, 1]} : vector<16x3xf32> to vector<16x1xf32>
    %193 = vector.broadcast %192 : vector<16x1xf32> to vector<16x5xf32>
    %194 = arith.mulf %193, %7 : vector<16x5xf32>
    %195 = arith.addf %191, %194 : vector<16x5xf32>
    %196 = vector.extract_strided_slice %188 {offsets = [0, 2], sizes = [16, 1], strides = [1, 1]} : vector<16x3xf32> to vector<16x1xf32>
    %197 = vector.broadcast %196 : vector<16x1xf32> to vector<16x5xf32>
    %198 = arith.mulf %197, %8 : vector<16x5xf32>
    %199 = arith.addf %195, %198 : vector<16x5xf32>
    %cst_84 = arith.constant 1.250000e-01 : f32
    %200 = vector.broadcast %cst_84 : f32 to vector<16x5xf32>
    %201 = arith.mulf %199, %200 : vector<16x5xf32>
    %cst_85 = arith.constant 0.000000e+00 : f32
    %202 = vector.broadcast %cst_85 : f32 to vector<16x5xf32>
    %203 = arith.cmpf ogt, %9, %202 : vector<16x5xf32>
    %cst_86 = arith.constant -1.000000e+09 : f32
    %204 = vector.broadcast %cst_86 : f32 to vector<16x5xf32>
    %205 = arith.select %203, %201, %204 : vector<16x5xi1>, vector<16x5xf32>
    %cst_87 = arith.constant dense<0xFF800000> : vector<16xf32>
    %206 = vector.multi_reduction <maximumf>, %205, %cst_87 [1] : vector<16x5xf32> to vector<16xf32>
    %207 = vector.shape_cast %206 : vector<16xf32> to vector<16x1xf32>
    %208 = vector.broadcast %207 : vector<16x1xf32> to vector<16x5xf32>
    %209 = arith.subf %205, %208 : vector<16x5xf32>
    %210 = math.exp %209 : vector<16x5xf32>
    %cst_88 = arith.constant dense<0.000000e+00> : vector<16xf32>
    %211 = vector.multi_reduction <add>, %210, %cst_88 [1] : vector<16x5xf32> to vector<16xf32>
    %212 = vector.shape_cast %211 : vector<16xf32> to vector<16x1xf32>
    %213 = vector.broadcast %212 : vector<16x1xf32> to vector<16x5xf32>
    %214 = arith.divf %210, %213 : vector<16x5xf32>
    %215 = arith.mulf %214, %6 : vector<16x5xf32>
    %cst_89 = arith.constant dense<0.000000e+00> : vector<16xf32>
    %216 = vector.multi_reduction <add>, %215, %cst_89 [1] : vector<16x5xf32> to vector<16xf32>
    %217 = vector.shape_cast %216 : vector<16xf32> to vector<16x1xf32>
    %218 = arith.mulf %214, %7 : vector<16x5xf32>
    %cst_90 = arith.constant dense<0.000000e+00> : vector<16xf32>
    %219 = vector.multi_reduction <add>, %218, %cst_90 [1] : vector<16x5xf32> to vector<16xf32>
    %220 = vector.shape_cast %219 : vector<16xf32> to vector<16x1xf32>
    %221 = arith.mulf %214, %8 : vector<16x5xf32>
    %cst_91 = arith.constant dense<0.000000e+00> : vector<16xf32>
    %222 = vector.multi_reduction <add>, %221, %cst_91 [1] : vector<16x5xf32> to vector<16xf32>
    %223 = vector.shape_cast %222 : vector<16xf32> to vector<16x1xf32>
    %224 = vector.extract_strided_slice %168 {offsets = [0, 0], sizes = [1, 64], strides = [1, 1]} : vector<3x64xf32> to vector<1x64xf32>
    %225 = vector.broadcast %217 : vector<16x1xf32> to vector<16x64xf32>
    %226 = vector.broadcast %224 : vector<1x64xf32> to vector<16x64xf32>
    %227 = arith.mulf %225, %226 : vector<16x64xf32>
    %228 = vector.extract_strided_slice %168 {offsets = [1, 0], sizes = [1, 64], strides = [1, 1]} : vector<3x64xf32> to vector<1x64xf32>
    %229 = vector.broadcast %220 : vector<16x1xf32> to vector<16x64xf32>
    %230 = vector.broadcast %228 : vector<1x64xf32> to vector<16x64xf32>
    %231 = arith.mulf %229, %230 : vector<16x64xf32>
    %232 = arith.addf %227, %231 : vector<16x64xf32>
    %233 = vector.extract_strided_slice %168 {offsets = [2, 0], sizes = [1, 64], strides = [1, 1]} : vector<3x64xf32> to vector<1x64xf32>
    %234 = vector.broadcast %223 : vector<16x1xf32> to vector<16x64xf32>
    %235 = vector.broadcast %233 : vector<1x64xf32> to vector<16x64xf32>
    %236 = arith.mulf %234, %235 : vector<16x64xf32>
    %237 = arith.addf %232, %236 : vector<16x64xf32>
    %cst_92 = arith.constant dense<0.000000e+00> : vector<16x64xf32>
    %238 = tpu.matmul %237, %169, %cst_92 {dimension_numbers = #tpu.dot_dimension_numbers<[1], [0], [0], [1], [0, 0, 1, 1], [], []>} : vector<16x64xf32>, vector<64x64xf32>, vector<16x64xf32> -> vector<16x64xf32>
    %239 = vector.broadcast %170 : vector<1x64xf32> to vector<16x64xf32>
    %240 = arith.addf %238, %239 : vector<16x64xf32>
    %c0_93 = arith.constant 0 : index
    %c0_94 = arith.constant 0 : index
    %241 = vector.load %arg33[%c0_93, %c0_94] : memref<8x64xf32, #tpu.memory_space<vmem>>, vector<8x64xf32>
    %cst_95 = arith.constant dense<0.000000e+00> : vector<16x64xf32>
    %242 = tpu.matmul %39, %241, %cst_95 {dimension_numbers = #tpu.dot_dimension_numbers<[1], [0], [0], [1], [0, 0, 1, 1], [], []>} : vector<16x8xf32>, vector<8x64xf32>, vector<16x64xf32> -> vector<16x64xf32>
    %c0_96 = arith.constant 0 : index
    %c0_97 = arith.constant 0 : index
    %243 = vector.load %arg34[%c0_96, %c0_97] : memref<192x64xf32, #tpu.memory_space<vmem>>, vector<192x64xf32>
    %cst_98 = arith.constant dense<0.000000e+00> : vector<16x64xf32>
    %244 = tpu.matmul %60, %243, %cst_98 {dimension_numbers = #tpu.dot_dimension_numbers<[1], [0], [0], [1], [0, 0, 1, 1], [], []>} : vector<16x192xf32>, vector<192x64xf32>, vector<16x64xf32> -> vector<16x64xf32>
    %245 = arith.addf %242, %244 : vector<16x64xf32>
    %c0_99 = arith.constant 0 : index
    %c0_100 = arith.constant 0 : index
    %246 = vector.load %arg35[%c0_99, %c0_100] : memref<64x64xf32, #tpu.memory_space<vmem>>, vector<64x64xf32>
    %cst_101 = arith.constant dense<0.000000e+00> : vector<16x64xf32>
    %247 = tpu.matmul %150, %246, %cst_101 {dimension_numbers = #tpu.dot_dimension_numbers<[1], [0], [0], [1], [0, 0, 1, 1], [], []>} : vector<16x64xf32>, vector<64x64xf32>, vector<16x64xf32> -> vector<16x64xf32>
    %248 = arith.addf %245, %247 : vector<16x64xf32>
    %c0_102 = arith.constant 0 : index
    %c0_103 = arith.constant 0 : index
    %249 = vector.load %arg36[%c0_102, %c0_103] : memref<64x64xf32, #tpu.memory_space<vmem>>, vector<64x64xf32>
    %cst_104 = arith.constant dense<0.000000e+00> : vector<16x64xf32>
    %250 = tpu.matmul %97, %249, %cst_104 {dimension_numbers = #tpu.dot_dimension_numbers<[1], [0], [0], [1], [0, 0, 1, 1], [], []>} : vector<16x64xf32>, vector<64x64xf32>, vector<16x64xf32> -> vector<16x64xf32>
    %251 = arith.addf %248, %250 : vector<16x64xf32>
    %c0_105 = arith.constant 0 : index
    %c0_106 = arith.constant 0 : index
    %252 = vector.load %arg37[%c0_105, %c0_106] : memref<64x64xf32, #tpu.memory_space<vmem>>, vector<64x64xf32>
    %cst_107 = arith.constant dense<0.000000e+00> : vector<16x64xf32>
    %253 = tpu.matmul %240, %252, %cst_107 {dimension_numbers = #tpu.dot_dimension_numbers<[1], [0], [0], [1], [0, 0, 1, 1], [], []>} : vector<16x64xf32>, vector<64x64xf32>, vector<16x64xf32> -> vector<16x64xf32>
    %254 = arith.addf %251, %253 : vector<16x64xf32>
    %c0_108 = arith.constant 0 : index
    %c0_109 = arith.constant 0 : index
    %255 = vector.load %arg38[%c0_108, %c0_109] : memref<64x64xf32, #tpu.memory_space<vmem>>, vector<64x64xf32>
    %cst_110 = arith.constant dense<0.000000e+00> : vector<16x64xf32>
    %256 = tpu.matmul %187, %255, %cst_110 {dimension_numbers = #tpu.dot_dimension_numbers<[1], [0], [0], [1], [0, 0, 1, 1], [], []>} : vector<16x64xf32>, vector<64x64xf32>, vector<16x64xf32> -> vector<16x64xf32>
    %257 = arith.addf %254, %256 : vector<16x64xf32>
    %c0_111 = arith.constant 0 : index
    %c0_112 = arith.constant 0 : index
    %258 = vector.load %arg39[%c0_111, %c0_112] : memref<1x64xf32, #tpu.memory_space<vmem>>, vector<1x64xf32>
    %259 = vector.broadcast %258 : vector<1x64xf32> to vector<16x64xf32>
    %260 = arith.addf %257, %259 : vector<16x64xf32>
    %cst_113 = arith.constant 0.000000e+00 : f32
    %261 = vector.broadcast %cst_113 : f32 to vector<16x64xf32>
    %262 = arith.cmpf oge, %260, %261 : vector<16x64xf32>
    %cst_114 = arith.constant 0.00999999977 : f32
    %263 = vector.broadcast %cst_114 : f32 to vector<16x64xf32>
    %264 = arith.mulf %263, %260 : vector<16x64xf32>
    %265 = arith.select %262, %260, %264 : vector<16x64xi1>, vector<16x64xf32>
    %c0_115 = arith.constant 0 : index
    %c0_116 = arith.constant 0 : index
    %266 = vector.load %arg40[%c0_115, %c0_116] : memref<64x192xf32, #tpu.memory_space<vmem>>, vector<64x192xf32>
    %cst_117 = arith.constant dense<0.000000e+00> : vector<16x192xf32>
    %267 = tpu.matmul %265, %266, %cst_117 {dimension_numbers = #tpu.dot_dimension_numbers<[1], [0], [0], [1], [0, 0, 1, 1], [], []>} : vector<16x64xf32>, vector<64x192xf32>, vector<16x192xf32> -> vector<16x192xf32>
    %c0_118 = arith.constant 0 : index
    %c0_119 = arith.constant 0 : index
    %268 = vector.load %arg41[%c0_118, %c0_119] : memref<1x192xf32, #tpu.memory_space<vmem>>, vector<1x192xf32>
    %269 = vector.broadcast %268 : vector<1x192xf32> to vector<16x192xf32>
    %270 = arith.addf %267, %269 : vector<16x192xf32>
    %cst_120 = arith.constant 0.000000e+00 : f32
    %271 = vector.broadcast %cst_120 : f32 to vector<16x192xf32>
    %272 = arith.cmpf oge, %270, %271 : vector<16x192xf32>
    %cst_121 = arith.constant 0.00999999977 : f32
    %273 = vector.broadcast %cst_121 : f32 to vector<16x192xf32>
    %274 = arith.mulf %273, %270 : vector<16x192xf32>
    %275 = arith.select %272, %270, %274 : vector<16x192xi1>, vector<16x192xf32>
    %c0_122 = arith.constant 0 : index
    %c0_123 = arith.constant 0 : index
    %276 = vector.load %arg42[%c0_122, %c0_123] : memref<192x32xf32, #tpu.memory_space<vmem>>, vector<192x32xf32>
    %cst_124 = arith.constant dense<0.000000e+00> : vector<16x32xf32>
    %277 = tpu.matmul %275, %276, %cst_124 {dimension_numbers = #tpu.dot_dimension_numbers<[1], [0], [0], [1], [0, 0, 1, 1], [], []>} : vector<16x192xf32>, vector<192x32xf32>, vector<16x32xf32> -> vector<16x32xf32>
    %c0_125 = arith.constant 0 : index
    %c0_126 = arith.constant 0 : index
    %278 = vector.load %arg43[%c0_125, %c0_126] : memref<1x32xf32, #tpu.memory_space<vmem>>, vector<1x32xf32>
    %279 = vector.broadcast %278 : vector<1x32xf32> to vector<16x32xf32>
    %280 = arith.addf %277, %279 : vector<16x32xf32>
    %cst_127 = arith.constant 0.000000e+00 : f32
    %281 = vector.broadcast %cst_127 : f32 to vector<16x32xf32>
    %282 = arith.cmpf oge, %280, %281 : vector<16x32xf32>
    %cst_128 = arith.constant 0.00999999977 : f32
    %283 = vector.broadcast %cst_128 : f32 to vector<16x32xf32>
    %284 = arith.mulf %283, %280 : vector<16x32xf32>
    %285 = arith.select %282, %280, %284 : vector<16x32xi1>, vector<16x32xf32>
    %c0_129 = arith.constant 0 : index
    %c0_130 = arith.constant 0 : index
    %286 = vector.load %arg44[%c0_129, %c0_130] : memref<32x36xf32, #tpu.memory_space<vmem>>, vector<32x36xf32>
    %cst_131 = arith.constant dense<0.000000e+00> : vector<16x36xf32>
    %287 = tpu.matmul %285, %286, %cst_131 {dimension_numbers = #tpu.dot_dimension_numbers<[1], [0], [0], [1], [0, 0, 1, 1], [], []>} : vector<16x32xf32>, vector<32x36xf32>, vector<16x36xf32> -> vector<16x36xf32>
    %c0_132 = arith.constant 0 : index
    %c0_133 = arith.constant 0 : index
    %288 = vector.load %arg45[%c0_132, %c0_133] : memref<1x36xf32, #tpu.memory_space<vmem>>, vector<1x36xf32>
    %289 = vector.broadcast %288 : vector<1x36xf32> to vector<16x36xf32>
    %290 = arith.addf %287, %289 : vector<16x36xf32>
    %291 = tpu.iota {dimensions = array<i32: 1>} : vector<16x36xi32>
    %cst_134 = arith.constant dense<0xFF800000> : vector<16xf32>
    %292 = vector.multi_reduction <maximumf>, %290, %cst_134 [1] : vector<16x36xf32> to vector<16xf32>
    %293 = vector.shape_cast %292 : vector<16xf32> to vector<16x1xf32>
    %294 = vector.broadcast %293 : vector<16x1xf32> to vector<16x36xf32>
    %295 = arith.cmpf oeq, %290, %294 : vector<16x36xf32>
    %c36_i32 = arith.constant 36 : i32
    %296 = vector.broadcast %c36_i32 : i32 to vector<16x36xi32>
    %297 = arith.select %295, %291, %296 : vector<16x36xi1>, vector<16x36xi32>
    %cst_135 = arith.constant dense<2147483647> : vector<16xi32>
    %298 = vector.multi_reduction <minsi>, %297, %cst_135 [1] : vector<16x36xi32> to vector<16xi32>
    %299 = vector.shape_cast %298 : vector<16xi32> to vector<16x1xi32>
    %300 = vector.broadcast %293 : vector<16x1xf32> to vector<16x36xf32>
    %301 = arith.subf %290, %300 : vector<16x36xf32>
    %302 = math.exp %301 : vector<16x36xf32>
    %cst_136 = arith.constant dense<0.000000e+00> : vector<16xf32>
    %303 = vector.multi_reduction <add>, %302, %cst_136 [1] : vector<16x36xf32> to vector<16xf32>
    %304 = vector.shape_cast %303 : vector<16xf32> to vector<16x1xf32>
    %305 = math.log %304 : vector<16x1xf32>
    %306 = arith.addf %293, %305 : vector<16x1xf32>
    %307 = vector.broadcast %299 : vector<16x1xi32> to vector<16x36xi32>
    %308 = arith.cmpi eq, %291, %307 : vector<16x36xi32>
    %309 = vector.broadcast %306 : vector<16x1xf32> to vector<16x36xf32>
    %310 = arith.subf %290, %309 : vector<16x36xf32>
    %cst_137 = arith.constant 0.000000e+00 : f32
    %311 = vector.broadcast %cst_137 : f32 to vector<16x36xf32>
    %312 = arith.select %308, %310, %311 : vector<16x36xi1>, vector<16x36xf32>
    %cst_138 = arith.constant dense<0.000000e+00> : vector<16xf32>
    %313 = vector.multi_reduction <add>, %312, %cst_138 [1] : vector<16x36xf32> to vector<16xf32>
    %314 = vector.shape_cast %313 : vector<16xf32> to vector<16x1xf32>
    %c0_139 = arith.constant 0 : index
    %c0_140 = arith.constant 0 : index
    %315 = vector.load %arg46[%c0_139, %c0_140] : memref<192x32xf32, #tpu.memory_space<vmem>>, vector<192x32xf32>
    %cst_141 = arith.constant dense<0.000000e+00> : vector<16x32xf32>
    %316 = tpu.matmul %275, %315, %cst_141 {dimension_numbers = #tpu.dot_dimension_numbers<[1], [0], [0], [1], [0, 0, 1, 1], [], []>} : vector<16x192xf32>, vector<192x32xf32>, vector<16x32xf32> -> vector<16x32xf32>
    %c0_142 = arith.constant 0 : index
    %c0_143 = arith.constant 0 : index
    %317 = vector.load %arg47[%c0_142, %c0_143] : memref<1x32xf32, #tpu.memory_space<vmem>>, vector<1x32xf32>
    %318 = vector.broadcast %317 : vector<1x32xf32> to vector<16x32xf32>
    %319 = arith.addf %316, %318 : vector<16x32xf32>
    %cst_144 = arith.constant 0.000000e+00 : f32
    %320 = vector.broadcast %cst_144 : f32 to vector<16x32xf32>
    %321 = arith.cmpf oge, %319, %320 : vector<16x32xf32>
    %cst_145 = arith.constant 0.00999999977 : f32
    %322 = vector.broadcast %cst_145 : f32 to vector<16x32xf32>
    %323 = arith.mulf %322, %319 : vector<16x32xf32>
    %324 = arith.select %321, %319, %323 : vector<16x32xi1>, vector<16x32xf32>
    %c0_146 = arith.constant 0 : index
    %c0_147 = arith.constant 0 : index
    %325 = vector.load %arg48[%c0_146, %c0_147] : memref<32x1xf32, #tpu.memory_space<vmem>>, vector<32x1xf32>
    %cst_148 = arith.constant dense<0.000000e+00> : vector<16x1xf32>
    %326 = tpu.matmul %324, %325, %cst_148 {dimension_numbers = #tpu.dot_dimension_numbers<[1], [0], [0], [1], [0, 0, 1, 1], [], []>} : vector<16x32xf32>, vector<32x1xf32>, vector<16x1xf32> -> vector<16x1xf32>
    %c0_149 = arith.constant 0 : index
    %c0_150 = arith.constant 0 : index
    %327 = vector.load %arg49[%c0_149, %c0_150] : memref<1x1xf32, #tpu.memory_space<vmem>>, vector<1x1xf32>
    %328 = vector.broadcast %327 : vector<1x1xf32> to vector<16x1xf32>
    %329 = arith.addf %326, %328 : vector<16x1xf32>
    %330 = tpu.iota {dimensions = array<i32: 1>} : vector<16x128xi32>
    %c0_i32 = arith.constant 0 : i32
    %331 = vector.broadcast %c0_i32 : i32 to vector<16x128xi32>
    %332 = arith.cmpi eq, %330, %331 : vector<16x128xi32>
    %c1_i32 = arith.constant 1 : i32
    %333 = vector.broadcast %c1_i32 : i32 to vector<16x128xi32>
    %334 = arith.cmpi eq, %330, %333 : vector<16x128xi32>
    %335 = arith.sitofp %299 : vector<16x1xi32> to vector<16x1xf32>
    %c2_i32 = arith.constant 2 : i32
    %336 = vector.broadcast %c2_i32 : i32 to vector<16x128xi32>
    %337 = arith.cmpi eq, %330, %336 : vector<16x128xi32>
    %cst_151 = arith.constant 0.000000e+00 : f32
    %338 = vector.shape_cast %314 : vector<16x1xf32> to vector<16x1xf32>
    %339 = vector.broadcast %338 : vector<16x1xf32> to vector<16x128xf32>
    %340 = vector.broadcast %cst_151 : f32 to vector<16x128xf32>
    %341 = arith.select %337, %339, %340 : vector<16x128xi1>, vector<16x128xf32>
    %342 = vector.shape_cast %335 : vector<16x1xf32> to vector<16x1xf32>
    %343 = vector.broadcast %342 : vector<16x1xf32> to vector<16x128xf32>
    %344 = arith.select %334, %343, %341 : vector<16x128xi1>, vector<16x128xf32>
    %345 = vector.shape_cast %329 : vector<16x1xf32> to vector<16x1xf32>
    %346 = vector.broadcast %345 : vector<16x1xf32> to vector<16x128xf32>
    %347 = arith.select %332, %346, %344 : vector<16x128xi1>, vector<16x128xf32>
    %c0_152 = arith.constant 0 : index
    %c0_153 = arith.constant 0 : index
    %348 = vector.load %arg50[%c0_152, %c0_153] : memref<16x128xf32, #tpu.memory_space<vmem>>, vector<16x128xf32>
    tpu.vector_store %arg50[%c0_152, %c0_153], %347 {strides = array<i32>} : memref<16x128xf32, #tpu.memory_space<vmem>>, vector<16x128xf32>,
    return
  }
  func.func @transform_0(%arg0: i32) -> (i32, i32) {
    %c0_i32 = arith.constant 0 : i32
    %c0_i32_0 = arith.constant 0 : i32
    return %arg0, %c0_i32 : i32, i32
  }
  func.func @transform_1(%arg0: i32) -> (i32, i32) {
    %c0_i32 = arith.constant 0 : i32
    %c0_i32_0 = arith.constant 0 : i32
    return %arg0, %c0_i32 : i32, i32
  }
  func.func @transform_2(%arg0: i32) -> (i32, i32) {
    %c0_i32 = arith.constant 0 : i32
    %c0_i32_0 = arith.constant 0 : i32
    return %arg0, %c0_i32 : i32, i32
  }
  func.func @transform_3(%arg0: i32) -> (i32, i32) {
    %c0_i32 = arith.constant 0 : i32
    %c0_i32_0 = arith.constant 0 : i32
    return %arg0, %c0_i32 : i32, i32
  }
  func.func @transform_4(%arg0: i32) -> (i32, i32) {
    %c0_i32 = arith.constant 0 : i32
    %c0_i32_0 = arith.constant 0 : i32
    return %arg0, %c0_i32 : i32, i32
  }
  func.func @transform_5(%arg0: i32) -> (i32, i32) {
    %c0_i32 = arith.constant 0 : i32
    %c0_i32_0 = arith.constant 0 : i32
    return %arg0, %c0_i32 : i32, i32
  }
  func.func @transform_6(%arg0: i32) -> (i32, i32) {
    %c0_i32 = arith.constant 0 : i32
    %c0_i32_0 = arith.constant 0 : i32
    return %arg0, %c0_i32 : i32, i32
  }
  func.func @transform_7(%arg0: i32) -> (i32, i32) {
    %c0_i32 = arith.constant 0 : i32
    %c0_i32_0 = arith.constant 0 : i32
    return %arg0, %c0_i32 : i32, i32
  }
  func.func @transform_8(%arg0: i32) -> (i32, i32) {
    %c0_i32 = arith.constant 0 : i32
    %c0_i32_0 = arith.constant 0 : i32
    return %arg0, %c0_i32 : i32, i32
  }
  func.func @transform_9(%arg0: i32) -> (i32, i32) {
    %c0_i32 = arith.constant 0 : i32
    %c0_i32_0 = arith.constant 0 : i32
    return %arg0, %c0_i32 : i32, i32
  }
  func.func @transform_10(%arg0: i32) -> (i32, i32) {
    %c0_i32 = arith.constant 0 : i32
    %c0_i32_0 = arith.constant 0 : i32
    %c0_i32_1 = arith.constant 0 : i32
    return %c0_i32, %c0_i32_0 : i32, i32
  }
  func.func @transform_11(%arg0: i32) -> (i32, i32) {
    %c0_i32 = arith.constant 0 : i32
    %c0_i32_0 = arith.constant 0 : i32
    %c0_i32_1 = arith.constant 0 : i32
    return %c0_i32, %c0_i32_0 : i32, i32
  }
  func.func @transform_12(%arg0: i32) -> (i32, i32) {
    %c0_i32 = arith.constant 0 : i32
    %c0_i32_0 = arith.constant 0 : i32
    %c0_i32_1 = arith.constant 0 : i32
    return %c0_i32, %c0_i32_0 : i32, i32
  }
  func.func @transform_13(%arg0: i32) -> (i32, i32) {
    %c0_i32 = arith.constant 0 : i32
    %c0_i32_0 = arith.constant 0 : i32
    %c0_i32_1 = arith.constant 0 : i32
    return %c0_i32, %c0_i32_0 : i32, i32
  }
  func.func @transform_14(%arg0: i32) -> (i32, i32) {
    %c0_i32 = arith.constant 0 : i32
    %c0_i32_0 = arith.constant 0 : i32
    %c0_i32_1 = arith.constant 0 : i32
    return %c0_i32, %c0_i32_0 : i32, i32
  }
  func.func @transform_15(%arg0: i32) -> (i32, i32) {
    %c0_i32 = arith.constant 0 : i32
    %c0_i32_0 = arith.constant 0 : i32
    %c0_i32_1 = arith.constant 0 : i32
    return %c0_i32, %c0_i32_0 : i32, i32
  }
  func.func @transform_16(%arg0: i32) -> (i32, i32) {
    %c0_i32 = arith.constant 0 : i32
    %c0_i32_0 = arith.constant 0 : i32
    %c0_i32_1 = arith.constant 0 : i32
    return %c0_i32, %c0_i32_0 : i32, i32
  }
  func.func @transform_17(%arg0: i32) -> (i32, i32) {
    %c0_i32 = arith.constant 0 : i32
    %c0_i32_0 = arith.constant 0 : i32
    %c0_i32_1 = arith.constant 0 : i32
    return %c0_i32, %c0_i32_0 : i32, i32
  }
  func.func @transform_18(%arg0: i32) -> (i32, i32) {
    %c0_i32 = arith.constant 0 : i32
    %c0_i32_0 = arith.constant 0 : i32
    %c0_i32_1 = arith.constant 0 : i32
    return %c0_i32, %c0_i32_0 : i32, i32
  }
  func.func @transform_19(%arg0: i32) -> (i32, i32) {
    %c0_i32 = arith.constant 0 : i32
    %c0_i32_0 = arith.constant 0 : i32
    %c0_i32_1 = arith.constant 0 : i32
    return %c0_i32, %c0_i32_0 : i32, i32
  }
  func.func @transform_20(%arg0: i32) -> (i32, i32) {
    %c0_i32 = arith.constant 0 : i32
    %c0_i32_0 = arith.constant 0 : i32
    %c0_i32_1 = arith.constant 0 : i32
    return %c0_i32, %c0_i32_0 : i32, i32
  }
  func.func @transform_21(%arg0: i32) -> (i32, i32) {
    %c0_i32 = arith.constant 0 : i32
    %c0_i32_0 = arith.constant 0 : i32
    %c0_i32_1 = arith.constant 0 : i32
    return %c0_i32, %c0_i32_0 : i32, i32
  }
  func.func @transform_22(%arg0: i32) -> (i32, i32) {
    %c0_i32 = arith.constant 0 : i32
    %c0_i32_0 = arith.constant 0 : i32
    %c0_i32_1 = arith.constant 0 : i32
    return %c0_i32, %c0_i32_0 : i32, i32
  }
  func.func @transform_23(%arg0: i32) -> (i32, i32) {
    %c0_i32 = arith.constant 0 : i32
    %c0_i32_0 = arith.constant 0 : i32
    %c0_i32_1 = arith.constant 0 : i32
    return %c0_i32, %c0_i32_0 : i32, i32
  }
  func.func @transform_24(%arg0: i32) -> (i32, i32) {
    %c0_i32 = arith.constant 0 : i32
    %c0_i32_0 = arith.constant 0 : i32
    %c0_i32_1 = arith.constant 0 : i32
    return %c0_i32, %c0_i32_0 : i32, i32
  }
  func.func @transform_25(%arg0: i32) -> (i32, i32) {
    %c0_i32 = arith.constant 0 : i32
    %c0_i32_0 = arith.constant 0 : i32
    %c0_i32_1 = arith.constant 0 : i32
    return %c0_i32, %c0_i32_0 : i32, i32
  }
  func.func @transform_26(%arg0: i32) -> (i32, i32) {
    %c0_i32 = arith.constant 0 : i32
    %c0_i32_0 = arith.constant 0 : i32
    %c0_i32_1 = arith.constant 0 : i32
    return %c0_i32, %c0_i32_0 : i32, i32
  }
  func.func @transform_27(%arg0: i32) -> (i32, i32) {
    %c0_i32 = arith.constant 0 : i32
    %c0_i32_0 = arith.constant 0 : i32
    %c0_i32_1 = arith.constant 0 : i32
    return %c0_i32, %c0_i32_0 : i32, i32
  }
  func.func @transform_28(%arg0: i32) -> (i32, i32) {
    %c0_i32 = arith.constant 0 : i32
    %c0_i32_0 = arith.constant 0 : i32
    %c0_i32_1 = arith.constant 0 : i32
    return %c0_i32, %c0_i32_0 : i32, i32
  }
  func.func @transform_29(%arg0: i32) -> (i32, i32) {
    %c0_i32 = arith.constant 0 : i32
    %c0_i32_0 = arith.constant 0 : i32
    %c0_i32_1 = arith.constant 0 : i32
    return %c0_i32, %c0_i32_0 : i32, i32
  }
  func.func @transform_30(%arg0: i32) -> (i32, i32) {
    %c0_i32 = arith.constant 0 : i32
    %c0_i32_0 = arith.constant 0 : i32
    %c0_i32_1 = arith.constant 0 : i32
    return %c0_i32, %c0_i32_0 : i32, i32
  }
  func.func @transform_31(%arg0: i32) -> (i32, i32) {
    %c0_i32 = arith.constant 0 : i32
    %c0_i32_0 = arith.constant 0 : i32
    %c0_i32_1 = arith.constant 0 : i32
    return %c0_i32, %c0_i32_0 : i32, i32
  }
  func.func @transform_32(%arg0: i32) -> (i32, i32) {
    %c0_i32 = arith.constant 0 : i32
    %c0_i32_0 = arith.constant 0 : i32
    %c0_i32_1 = arith.constant 0 : i32
    return %c0_i32, %c0_i32_0 : i32, i32
  }
  func.func @transform_33(%arg0: i32) -> (i32, i32) {
    %c0_i32 = arith.constant 0 : i32
    %c0_i32_0 = arith.constant 0 : i32
    %c0_i32_1 = arith.constant 0 : i32
    return %c0_i32, %c0_i32_0 : i32, i32
  }
  func.func @transform_34(%arg0: i32) -> (i32, i32) {
    %c0_i32 = arith.constant 0 : i32
    %c0_i32_0 = arith.constant 0 : i32
    %c0_i32_1 = arith.constant 0 : i32
    return %c0_i32, %c0_i32_0 : i32, i32
  }
  func.func @transform_35(%arg0: i32) -> (i32, i32) {
    %c0_i32 = arith.constant 0 : i32
    %c0_i32_0 = arith.constant 0 : i32
    %c0_i32_1 = arith.constant 0 : i32
    return %c0_i32, %c0_i32_0 : i32, i32
  }
  func.func @transform_36(%arg0: i32) -> (i32, i32) {
    %c0_i32 = arith.constant 0 : i32
    %c0_i32_0 = arith.constant 0 : i32
    %c0_i32_1 = arith.constant 0 : i32
    return %c0_i32, %c0_i32_0 : i32, i32
  }
  func.func @transform_37(%arg0: i32) -> (i32, i32) {
    %c0_i32 = arith.constant 0 : i32
    %c0_i32_0 = arith.constant 0 : i32
    %c0_i32_1 = arith.constant 0 : i32
    return %c0_i32, %c0_i32_0 : i32, i32
  }
  func.func @transform_38(%arg0: i32) -> (i32, i32) {
    %c0_i32 = arith.constant 0 : i32
    %c0_i32_0 = arith.constant 0 : i32
    %c0_i32_1 = arith.constant 0 : i32
    return %c0_i32, %c0_i32_0 : i32, i32
  }
  func.func @transform_39(%arg0: i32) -> (i32, i32) {
    %c0_i32 = arith.constant 0 : i32
    %c0_i32_0 = arith.constant 0 : i32
    %c0_i32_1 = arith.constant 0 : i32
    return %c0_i32, %c0_i32_0 : i32, i32
  }
  func.func @transform_40(%arg0: i32) -> (i32, i32) {
    %c0_i32 = arith.constant 0 : i32
    %c0_i32_0 = arith.constant 0 : i32
    %c0_i32_1 = arith.constant 0 : i32
    return %c0_i32, %c0_i32_0 : i32, i32
  }
  func.func @transform_41(%arg0: i32) -> (i32, i32) {
    %c0_i32 = arith.constant 0 : i32
    %c0_i32_0 = arith.constant 0 : i32
    %c0_i32_1 = arith.constant 0 : i32
    return %c0_i32, %c0_i32_0 : i32, i32
  }
  func.func @transform_42(%arg0: i32) -> (i32, i32) {
    %c0_i32 = arith.constant 0 : i32
    %c0_i32_0 = arith.constant 0 : i32
    %c0_i32_1 = arith.constant 0 : i32
    return %c0_i32, %c0_i32_0 : i32, i32
  }
  func.func @transform_43(%arg0: i32) -> (i32, i32) {
    %c0_i32 = arith.constant 0 : i32
    %c0_i32_0 = arith.constant 0 : i32
    %c0_i32_1 = arith.constant 0 : i32
    return %c0_i32, %c0_i32_0 : i32, i32
  }
  func.func @transform_44(%arg0: i32) -> (i32, i32) {
    %c0_i32 = arith.constant 0 : i32
    %c0_i32_0 = arith.constant 0 : i32
    %c0_i32_1 = arith.constant 0 : i32
    return %c0_i32, %c0_i32_0 : i32, i32
  }
  func.func @transform_45(%arg0: i32) -> (i32, i32) {
    %c0_i32 = arith.constant 0 : i32
    %c0_i32_0 = arith.constant 0 : i32
    %c0_i32_1 = arith.constant 0 : i32
    return %c0_i32, %c0_i32_0 : i32, i32
  }
  func.func @transform_46(%arg0: i32) -> (i32, i32) {
    %c0_i32 = arith.constant 0 : i32
    %c0_i32_0 = arith.constant 0 : i32
    %c0_i32_1 = arith.constant 0 : i32
    return %c0_i32, %c0_i32_0 : i32, i32
  }
  func.func @transform_47(%arg0: i32) -> (i32, i32) {
    %c0_i32 = arith.constant 0 : i32
    %c0_i32_0 = arith.constant 0 : i32
    %c0_i32_1 = arith.constant 0 : i32
    return %c0_i32, %c0_i32_0 : i32, i32
  }
  func.func @transform_48(%arg0: i32) -> (i32, i32) {
    %c0_i32 = arith.constant 0 : i32
    %c0_i32_0 = arith.constant 0 : i32
    %c0_i32_1 = arith.constant 0 : i32
    return %c0_i32, %c0_i32_0 : i32, i32
  }
  func.func @transform_49(%arg0: i32) -> (i32, i32) {
    %c0_i32 = arith.constant 0 : i32
    %c0_i32_0 = arith.constant 0 : i32
    return %arg0, %c0_i32 : i32, i32
  }
}

</mosaic_0001>

<bundles_post_ra>
// kernel: tpu_custom_call.1
= control target key start
LH: loop header
LB: loop body
LE: loop exit
PB: predicated region body
PF: predicated region fallthrough
CT: control target
= control target key end

     0   :  { %s3851_s6 = smov 1   ;;  %s3852_s10 = smov 2   ;;  %s4717_s0 = inlined_call_operand.smem [shape: u32[50], index: -1, kind: input, shape index: {}] }
   0x1   :  { %s3935_s5 = sld [smem:[%s4717_s0]]   ;;  %s3853_s14 = smov 3  }
   0x2   :  { %s3940_s9 = sld [smem:[%s4717_s0 + %s3851_s6]]   ;;  %s3854_s18 = smov 4  }
   0x3   :  { %s3945_s13 = sld [smem:[%s4717_s0 + %s3852_s10]]   ;;  %s3855_s22 = smov 5  }
   0x4   :  { %s3950_s17 = sld [smem:[%s4717_s0 + %s3853_s14]]   ;;  %s3856_s26 = smov 6  }
   0x5   :  { %s3955_s21 = sld [smem:[%s4717_s0 + %s3854_s18]]   ;;  %s3857_s30 = smov 7  }
   0x6   :  { %s3960_s25 = sld [smem:[%s4717_s0 + %s3855_s22]]   ;;  %s3858_s4 = smov 8  }
   0x7   :  { %4747 = sst [smem:[#allocation49_spill]] %s3935_s5  ;;  %s3859_s10 = smov 9  }
   0x8   :  { %4748 = sst [smem:[#allocation50_spill]] %s3940_s9  ;;  %s3860_s15 = smov 10  }
   0x9   :  { %4749 = sst [smem:[#allocation51_spill]] %s3945_s13  ;;  %s3861_s20 = smov 11  }
   0xa   :  { %4750 = sst [smem:[#allocation52_spill]] %s3950_s17  ;;  %s3863_s1 = smov 13  }
   0xb   :  { %4751 = sst [smem:[#allocation53_spill]] %s3955_s21  ;;  %s3864_s7 = smov 14  }
   0xc   :  { %4752 = sst [smem:[#allocation54_spill]] %s3960_s25  ;;  %s3866_s22 = smov 16  }
   0xd   :  { %s3965_s29 = sld [smem:[%s4717_s0 + %s3856_s26]]   ;;  %s3862_s26 = smov 12  }
   0xe   :  { %s3970_s3 = sld [smem:[%s4717_s0 + %s3857_s30]]   ;;  %s3867_s28 = smov 17  }
   0xf   :  { %s3975_s8 = sld [smem:[%s4717_s0 + %s3858_s4]]  }
  0x10   :  { %s3980_s14 = sld [smem:[%s4717_s0 + %s3859_s10]]  }
  0x11   :  { %s3985_s19 = sld [smem:[%s4717_s0 + %s3860_s15]]   ;;  %s3865_s15 = smov 15  }
  0x12   :  { %s3990_s24 = sld [smem:[%s4717_s0 + %s3861_s20]]  }
  0x13   :  { %4753 = sst [smem:[#allocation55_spill]] %s3965_s29 }
  0x14   :  { %4754 = sst [smem:[#allocation56_spill]] %s3970_s3 }
  0x15   :  { %4755 = sst [smem:[#allocation57_spill]] %s3975_s8 }
  0x16   :  { %4756 = sst [smem:[#allocation58_spill]] %s3980_s14 }
  0x17   :  { %4757 = sst [smem:[#allocation59_spill]] %s3985_s19 }
  0x18   :  { %s3995_s30 = sld [smem:[%s4717_s0 + %s3862_s26]]  }
  0x19   :  { %s4000_s6 = sld [smem:[%s4717_s0 + %s3863_s1]]   ;;  %s3899_s1 = smov 49  }
  0x1a   :  { %s4005_s12 = sld [smem:[%s4717_s0 + %s3864_s7]]   ;;  %s3868_s7 = smov 18  }
  0x1b   :  { %s4010_s20 = sld [smem:[%s4717_s0 + %s3865_s15]]   ;;  %s3869_s15 = smov 19  }
  0x1c   :  { %s4015_s27 = sld [smem:[%s4717_s0 + %s3866_s22]]   ;;  %s3870_s22 = smov 20  }
  0x1d   :  { %s4020_s4 = sld [smem:[%s4717_s0 + %s3867_s28]]   ;;  %s3871_s28 = smov 21  }
  0x1e   :  { %4758 = sst [smem:[#allocation60_spill]] %s3995_s30 }
  0x1f   :  { %s4025_s14 = sld [smem:[%s4717_s0 + %s3868_s7]]   ;;  %s3872_s7 = smov 22  }
  0x20   :  { %4759 = sst [smem:[#allocation61_spill]] %s4005_s12 }
  0x21   :  { %s4030_s8 = sld [smem:[%s4717_s0 + %s3869_s15]]   ;;  %s3873_s15 = smov 23  }
  0x22   :  { %4760 = sst [smem:[#allocation62_spill]] %s4015_s27 }
  0x23   :  { %s4035_s3 = sld [smem:[%s4717_s0 + %s3870_s22]]   ;;  %s3874_s22 = smov 24  }
  0x24   :  { %s4040_s29 = sld [smem:[%s4717_s0 + %s3871_s28]]   ;;  %s3875_s28 = smov 25  }
  0x25   :  { %s4045_s25 = sld [smem:[%s4717_s0 + %s3872_s7]]   ;;  %s3876_s7 = smov 26  }
  0x26   :  { %s4050_s21 = sld [smem:[%s4717_s0 + %s3873_s15]]   ;;  %s3877_s15 = smov 27  }
  0x27   :  { %s4055_s17 = sld [smem:[%s4717_s0 + %s3874_s22]]   ;;  %s3878_s22 = smov 28  }
  0x28   :  { %s4060_s13 = sld [smem:[%s4717_s0 + %s3875_s28]]   ;;  %s3879_s28 = smov 29  }
  0x29   :  { %s4065_s27 = sld [smem:[%s4717_s0 + %s3876_s7]]   ;;  %s3880_s7 = smov 30  }
  0x2a   :  { %s4075_s19 = sld [smem:[%s4717_s0 + %s3878_s22]]   ;;  %s3882_s22 = smov 32  }
  0x2b   :  { %4761 = sst [smem:[#allocation63_spill]] %s4045_s25 }
  0x2c   :  { %4762 = sst [smem:[#allocation64_spill]] %s4050_s21 }
  0x2d   :  { %s4070_s25 = sld [smem:[%s4717_s0 + %s3877_s15]]   ;;  %s3881_s15 = smov 31  }
  0x2e   :  { %4763 = sst [smem:[#allocation65_spill]] %s4060_s13 }
  0x2f   :  { %4764 = sst [smem:[#allocation66_spill]] %s4065_s27 }
  0x30   :  { %4765 = sst [smem:[#allocation67_spill]] %s4075_s19 }
  0x31   :  { %s4080_s13 = sld [smem:[%s4717_s0 + %s3879_s28]]   ;;  %s3883_s28 = smov 33  }
  0x32   :  { %s4085_s9 = sld [smem:[%s4717_s0 + %s3880_s7]]   ;;  %s3884_s7 = smov 34  }
  0x33   :  { %s4090_s30 = sld [smem:[%s4717_s0 + %s3881_s15]]   ;;  %s3885_s15 = smov 35  }
  0x34   :  { %s4095_s12 = sld [smem:[%s4717_s0 + %s3882_s22]]   ;;  %s3886_s22 = smov 36  }
  0x35   :  { %s4100_s5 = sld [smem:[%s4717_s0 + %s3883_s28]]   ;;  %s3887_s28 = smov 37  }
  0x36   :  { %s4115_s19 = sld [smem:[%s4717_s0 + %s3886_s22]]   ;;  %s3890_s22 = smov 40  }
  0x38   :  { %4766 = sst [smem:[#allocation68_spill]] %s4085_s9 }
  0x39   :  { %4767 = sst [smem:[#allocation69_spill]] %s4090_s30 }
  0x3a   :  { %s4105_s9 = sld [smem:[%s4717_s0 + %s3884_s7]]   ;;  %s3888_s7 = smov 38  }
  0x3b   :  { %4768 = sst [smem:[#allocation70_spill]] %s4100_s5 }
  0x3c   :  { %s4110_s30 = sld [smem:[%s4717_s0 + %s3885_s15]]   ;;  %s3889_s15 = smov 39  }
  0x3d   :  { %4771 = sst [smem:[#allocation73_spill]] %s4115_s19 }
  0x3e   :  { %s4120_s5 = sld [smem:[%s4717_s0 + %s3887_s28]]   ;;  %s3891_s28 = smov 41  }
  0x3f   :  { %s4135_s19 = sld [smem:[%s4717_s0 + %s3890_s22]]   ;;  %s3894_s22 = smov 44  }
  0x40   :  { %4769 = sst [smem:[#allocation71_spill]] %s4105_s9 }
  0x41   :  { %s4125_s9 = sld [smem:[%s4717_s0 + %s3888_s7]]   ;;  %s3892_s7 = smov 42  }
  0x42   :  { %4770 = sst [smem:[#allocation72_spill]] %s4110_s30 }
  0x43   :  { %s4130_s30 = sld [smem:[%s4717_s0 + %s3889_s15]]   ;;  %s3893_s15 = smov 43  }
  0x44   :  { %s4140_s27 = sld [smem:[%s4717_s0 + %s3891_s28]]   ;;  %s3895_s28 = smov 45  }
  0x45   :  { %s4155_s21 = sld [smem:[%s4717_s0 + %s3894_s22]]   ;;  %s3898_s22 = smov 48  }
  0x47   :  { %4772 = sst [smem:[#allocation74_spill]] %s4125_s9 }
  0x48   :  { %s4145_s9 = sld [smem:[%s4717_s0 + %s3892_s7]]   ;;  %s3896_s7 = smov 46  }
  0x49   :  { %4773 = sst [smem:[#allocation75_spill]] %s4130_s30 }
  0x4a   :  { %4774 = sst [smem:[#allocation76_spill]] %s4140_s27 }
  0x4b   :  { %s4150_s30 = sld [smem:[%s4717_s0 + %s3893_s15]]   ;;  %s3897_s15 = smov 47  }
  0x4c   :  { %4777 = sst [smem:[#allocation79_spill]] %s4155_s21 }
  0x4d   :  { %s4160_s27 = sld [smem:[%s4717_s0 + %s3895_s28]]  }
  0x4e   :  { %4775 = sst [smem:[#allocation77_spill]] %s4145_s9 }
  0x4f   :  { %s4165_s9 = sld [smem:[%s4717_s0 + %s3896_s7]]  }
  0x50   :  { %s2695_s21 = sld [smem:[%s4717_s0 + %s3898_s22]]  }
  0x51   :  { %4776 = sst [smem:[#allocation78_spill]] %s4150_s30 }
  0x52   :  { %s4170_s30 = sld [smem:[%s4717_s0 + %s3897_s15]]  }
  0x53   :  { %4778 = sst [smem:[#allocation80_spill]] %s4160_s27 }
  0x54   :  { %s4178_s27 = sld [smem:[%s4717_s0 + %s3899_s1]]  }
  0x56   :  { %v104_v0 = vstv %s2695_s21 }
  0x57   :  { %105 = vst [vmem:[#allocation2] sm:$0x1] %v104_v0 }
  0x58   :  { %106 = vsyncpa [#allocation4], 0 }
  0x59   :  { %107 = vsyncpa [#allocation7], 0 }
  0x5a   :  { %108 = vsyncpa [#allocation10], 0 }
  0x5b   :  { %109 = vsyncpa [#allocation13], 0 }
  0x5c   :  { %110 = vsyncpa [#allocation16], 0 }
  0x5d   :  { %111 = vsyncpa [#allocation19], 0 }
  0x5e   :  { %112 = vsyncpa [#allocation22], 0 }
  0x5f   :  { %113 = vsyncpa [#allocation25], 0 }
  0x60   :  { %114 = vsyncpa [#allocation28], 0 }
  0x61   :  { %115 = vsyncpa [#allocation31], 0 }
  0x62   :  { %116 = vsyncpa [#allocation34], 0  ;;  %s158_s7 = sshll.u32 %s4000_s6, 4  ;;  %s159_s7 = int_to_ptr.hbm [resolvable:$true] %s158_s7 }
  0x63   :  { %117 = vsyncpa [#allocation5], 0  ;;  %s3900_s0 = smov [#allocation6]   ;;  %s184_s10 = sshll.u32 %s4020_s4, 4  ;;  %s185_s10 = int_to_ptr.hbm [resolvable:$true] %s184_s10 }
  0x64   :  { %s160_s21 = sshll.u32 %s3900_s0, 4  ;;  %s3299_s11 = sshra.s32 %s159_s7, 4  ;;  %s161_s21 = int_to_ptr.vmem [resolvable:$true] %s160_s21  ;;  %s3300_s11 = int_to_ptr.hbm [resolvable:$true] %s3299_s11 }
  0x65   :  { %s3301_s15 = scalar_lea.hbm %s3300_s11, 1  ;;  %s3303_s16 = scalar_lea.hbm %s4000_s6, 1 }
  0x66   :  { %p3302_p0 = scmp.ne.s32.totalorder %s3300_s11, %s3301_s15  ;;  %p3304_p1 = scmp.lt.s32.totalorder %s3300_s11, %s4000_s6 }
  0x67   :  { %p3305_p2 = scmp.lt.s32.totalorder %s3303_s16, %s3301_s15 }
  0x69   :  { %p3306_p3 = por %p3305_p2, %p3304_p1 }
  0x6b   :  { %p3307_p4 = pnand %p3306_p3, %p3302_p0 }
  0x6d   :  { %3310 = shalt.err (!%p3307_p4)
}
  0x6e   :  { %163 = dma.hbm_to_vmem [thread:$0]  %s159_s7, 16, %s161_s21, [#allocation7]  }
  0x6f   :  { %s3901_s18 = smov [#allocation9]   ;;  %s206_s23 = sshll.u32 %s4030_s8, 4  ;;  %s207_s23 = int_to_ptr.hbm [resolvable:$true] %s206_s23 }
  0x70   :  { %s186_s22 = sshll.u32 %s3901_s18, 4  ;;  %s3323_s26 = sshra.s32 %s185_s10, 4  ;;  %s187_s22 = int_to_ptr.vmem [resolvable:$true] %s186_s22  ;;  %s3324_s26 = int_to_ptr.hbm [resolvable:$true] %s3323_s26 }
  0x71   :  { %s3325_s1 = scalar_lea.hbm %s3324_s26, 2  ;;  %s3327_s28 = scalar_lea.hbm %s4020_s4, 2 }
  0x72   :  { %p3326_p5 = scmp.ne.s32.totalorder %s3324_s26, %s3325_s1  ;;  %p3328_p6 = scmp.lt.s32.totalorder %s3324_s26, %s4020_s4 }
  0x73   :  { %p3329_p7 = scmp.lt.s32.totalorder %s3327_s28, %s3325_s1 }
  0x75   :  { %p3330_p8 = por %p3329_p7, %p3328_p6 }
  0x77   :  { %p3331_p9 = pnand %p3330_p8, %p3326_p5 }
  0x79   :  { %3334 = shalt.err (!%p3331_p9)
}
  0x7a   :  { %189 = dma.hbm_to_vmem [thread:$0]  %s185_s10, 32, %s187_s22, [#allocation10]  }
  0x7b   :  { %s228_s6 = sshll.u32 %s4040_s29, 4  ;;  %s3902_s2 = smov [#allocation12]   ;;  %s229_s6 = int_to_ptr.hbm [resolvable:$true] %s228_s6 }
  0x7c   :  { %s208_s7 = sshll.u32 %s3902_s2, 4  ;;  %s3347_s0 = sshra.s32 %s207_s23, 4  ;;  %s209_s7 = int_to_ptr.vmem [resolvable:$true] %s208_s7  ;;  %s3348_s0 = int_to_ptr.hbm [resolvable:$true] %s3347_s0 }
  0x7d   :  { %s3349_s21 = scalar_lea.hbm %s3348_s0, 1  ;;  %s3351_s11 = scalar_lea.hbm %s4030_s8, 1 }
  0x7e   :  { %p3350_p10 = scmp.ne.s32.totalorder %s3348_s0, %s3349_s21  ;;  %p3352_p11 = scmp.lt.s32.totalorder %s3348_s0, %s4030_s8 }
  0x7f   :  { %p3353_p12 = scmp.lt.s32.totalorder %s3351_s11, %s3349_s21 }
  0x81   :  { %p3354_p13 = por %p3353_p12, %p3352_p11 }
  0x83   :  { %p3355_p0 = pnand %p3354_p13, %p3350_p10 }
  0x85   :  { %3358 = shalt.err (!%p3355_p0)
}
  0x86   :  { %211 = dma.hbm_to_vmem [thread:$0]  %s207_s23, 16, %s209_s7, [#allocation13]  }
  0x87   :  { %s3903_s4 = smov [#allocation15]   ;;  %s252_s15 = sshll.u32 %s4055_s17, 4  ;;  %s253_s15 = int_to_ptr.hbm [resolvable:$true] %s252_s15 }
  0x88   :  { %s230_s10 = sshll.u32 %s3903_s4, 4  ;;  %s3371_s16 = sshra.s32 %s229_s6, 4  ;;  %s231_s10 = int_to_ptr.vmem [resolvable:$true] %s230_s10  ;;  %s3372_s16 = int_to_ptr.hbm [resolvable:$true] %s3371_s16 }
  0x89   :  { %s3373_s18 = scalar_lea.hbm %s3372_s16, 1  ;;  %s3375_s22 = scalar_lea.hbm %s4040_s29, 1 }
  0x8a   :  { %p3374_p1 = scmp.ne.s32.totalorder %s3372_s16, %s3373_s18  ;;  %p3376_p2 = scmp.lt.s32.totalorder %s3372_s16, %s4040_s29 }
  0x8b   :  { %p3377_p3 = scmp.lt.s32.totalorder %s3375_s22, %s3373_s18 }
  0x8d   :  { %p3378_p4 = por %p3377_p3, %p3376_p2 }
  0x8f   :  { %p3379_p5 = pnand %p3378_p4, %p3374_p1 }
  0x91   :  { %3382 = shalt.err (!%p3379_p5)
}
  0x92   :  { %233 = dma.hbm_to_vmem [thread:$0]  %s229_s6, 16, %s231_s10, [#allocation16]  }
  0x93   :  { %s276_s8 = sshll.u32 %s4070_s25, 4  ;;  %s3904_s23 = smov [#allocation18]   ;;  %s277_s8 = int_to_ptr.hbm [resolvable:$true] %s276_s8 }
  0x94   :  { %s254_s26 = sshll.u32 %s3904_s23, 4  ;;  %s3395_s1 = sshra.s32 %s253_s15, 4  ;;  %s255_s26 = int_to_ptr.vmem [resolvable:$true] %s254_s26  ;;  %s3396_s1 = int_to_ptr.hbm [resolvable:$true] %s3395_s1 }
  0x95   :  { %s3397_s28 = scalar_lea.hbm %s3396_s1, 4  ;;  %s3399_s2 = scalar_lea.hbm %s4055_s17, 4 }
  0x96   :  { %p3398_p6 = scmp.ne.s32.totalorder %s3396_s1, %s3397_s28  ;;  %p3400_p7 = scmp.lt.s32.totalorder %s3396_s1, %s4055_s17 }
  0x97   :  { %p3401_p8 = scmp.lt.s32.totalorder %s3399_s2, %s3397_s28 }
  0x99   :  { %p3402_p9 = por %p3401_p8, %p3400_p7 }
  0x9b   :  { %p3403_p10 = pnand %p3402_p9, %p3398_p6 }
  0x9d   :  { %3406 = shalt.err (!%p3403_p10)
}
  0x9e   :  { %257 = dma.hbm_to_vmem [thread:$0]  %s253_s15, 64, %s255_s26, [#allocation19]  }
  0x9f   :  { %s3905_s29 = smov [#allocation21]   ;;  %s298_s7 = sshll.u32 %s4080_s13, 4  ;;  %s299_s7 = int_to_ptr.hbm [resolvable:$true] %s298_s7 }
  0xa0   :  { %s278_s6 = sshll.u32 %s3905_s29, 4  ;;  %s3419_s0 = sshra.s32 %s277_s8, 4  ;;  %s279_s6 = int_to_ptr.vmem [resolvable:$true] %s278_s6  ;;  %s3420_s0 = int_to_ptr.hbm [resolvable:$true] %s3419_s0 }
  0xa1   :  { %s3421_s21 = scalar_lea.hbm %s3420_s0, 4  ;;  %s3423_s11 = scalar_lea.hbm %s4070_s25, 4 }
  0xa2   :  { %p3422_p11 = scmp.ne.s32.totalorder %s3420_s0, %s3421_s21  ;;  %p3424_p12 = scmp.lt.s32.totalorder %s3420_s0, %s4070_s25 }
  0xa3   :  { %p3425_p13 = scmp.lt.s32.totalorder %s3423_s11, %s3421_s21 }
  0xa5   :  { %p3426_p0 = por %p3425_p13, %p3424_p12 }
  0xa7   :  { %p3427_p1 = pnand %p3426_p0, %p3422_p11 }
  0xa9   :  { %3430 = shalt.err (!%p3427_p1)
}
  0xaa   :  { %281 = dma.hbm_to_vmem [thread:$0]  %s277_s8, 64, %s279_s6, [#allocation22]  }
  0xab   :  { %s322_s17 = sshll.u32 %s4095_s12, 4  ;;  %s3906_s4 = smov [#allocation24]   ;;  %s323_s17 = int_to_ptr.hbm [resolvable:$true] %s322_s17 }
  0xac   :  { %s300_s10 = sshll.u32 %s3906_s4, 4  ;;  %s3443_s15 = sshra.s32 %s299_s7, 4  ;;  %s301_s10 = int_to_ptr.vmem [resolvable:$true] %s300_s10  ;;  %s3444_s15 = int_to_ptr.hbm [resolvable:$true] %s3443_s15 }
  0xad   :  { %s3445_s16 = scalar_lea.hbm %s3444_s15, 4  ;;  %s3447_s18 = scalar_lea.hbm %s4080_s13, 4 }
  0xae   :  { %p3446_p2 = scmp.ne.s32.totalorder %s3444_s15, %s3445_s16  ;;  %p3448_p3 = scmp.lt.s32.totalorder %s3444_s15, %s4080_s13 }
  0xaf   :  { %p3449_p4 = scmp.lt.s32.totalorder %s3447_s18, %s3445_s16 }
  0xb1   :  { %p3450_p5 = por %p3449_p4, %p3448_p3 }
  0xb3   :  { %p3451_p6 = pnand %p3450_p5, %p3446_p2 }
  0xb5   :  { %3454 = shalt.err (!%p3451_p6)
}
  0xb6   :  { %303 = dma.hbm_to_vmem [thread:$0]  %s299_s7, 64, %s301_s10, [#allocation25]  }
  0xb7   :  { %s3907_s25 = smov [#allocation27]   ;;  %s3467_s8 = sshra.s32 %s323_s17, 4  ;;  %s3468_s8 = int_to_ptr.hbm [resolvable:$true] %s3467_s8 }
  0xb8   :  { %s324_s22 = sshll.u32 %s3907_s25, 4  ;;  %s3469_s23 = scalar_lea.hbm %s3468_s8, 8  ;;  %s325_s22 = int_to_ptr.vmem [resolvable:$true] %s324_s22 }
  0xb9   :  { %p3470_p7 = scmp.ne.s32.totalorder %s3468_s8, %s3469_s23  ;;  %s3471_s26 = scalar_lea.hbm %s4095_s12, 8 }
  0xba   :  { %p3472_p8 = scmp.lt.s32.totalorder %s3468_s8, %s4095_s12  ;;  %p3473_p9 = scmp.lt.s32.totalorder %s3471_s26, %s3469_s23 }
  0xbc   :  { %p3474_p10 = por %p3473_p9, %p3472_p8 }
  0xbe   :  { %p3475_p11 = pnand %p3474_p10, %p3470_p7 }
  0xc0   :  { %3478 = shalt.err (!%p3475_p11)
}
  0xc1   :  { %327 = dma.hbm_to_vmem [thread:$0]  %s323_s17, 128, %s325_s22, [#allocation28]  }
  0xc2   :  { %s351_s13 = sshll.u32 %s4120_s5, 4  ;;  %s3908_s1 = smov [#allocation30]   ;;  %s352_s13 = int_to_ptr.hbm [resolvable:$true] %s351_s13 }
  0xc3   :  { %s353_s28 = sshll.u32 %s3908_s1, 4  ;;  %s378_s2 = sshll.u32 %s4135_s19, 4  ;;  %s354_s28 = int_to_ptr.vmem [resolvable:$true] %s353_s28  ;;  %s379_s2 = int_to_ptr.hbm [resolvable:$true] %s378_s2 }
  0xc4   :  { %s3491_s29 = sshra.s32 %s352_s13, 4  ;;  %s3495_s12 = scalar_lea.hbm %s4120_s5, 64  ;;  %s3492_s29 = int_to_ptr.hbm [resolvable:$true] %s3491_s29 }
  0xc5   :  { %s3493_s6 = scalar_lea.hbm %s3492_s29, 64  ;;  %p3496_p13 = scmp.lt.s32.totalorder %s3492_s29, %s4120_s5 }
  0xc6   :  { %p3494_p12 = scmp.ne.s32.totalorder %s3492_s29, %s3493_s6  ;;  %p3497_p0 = scmp.lt.s32.totalorder %s3495_s12, %s3493_s6 }
  0xc8   :  { %p3498_p1 = por %p3497_p0, %p3496_p13 }
  0xca   :  { %p3499_p2 = pnand %p3498_p1, %p3494_p12 }
  0xcc   :  { %3502 = shalt.err (!%p3499_p2)
}
  0xcd   :  { %s3909_s7 = smov 128   ;;  %s3910_s0 = smov 8  }
  0xce   :  { %359 = dma.hbm_to_vmem [thread:$0]  %s352_s13, 1024, %s354_s28, [#allocation31], %s3909_s7, %s3909_s7, %s3910_s0  }
  0xcf   :  { %s3911_s21 = smov [#allocation33]   ;;  %s145_s17 = sshll.u32 %s3990_s24, 4  ;;  %s146_s17 = int_to_ptr.hbm [resolvable:$true] %s145_s17 }
  0xd0   :  { %s380_s11 = sshll.u32 %s3911_s21, 4  ;;  %s3515_s5 = sshra.s32 %s379_s2, 4  ;;  %s381_s11 = int_to_ptr.vmem [resolvable:$true] %s380_s11  ;;  %s3516_s5 = int_to_ptr.hbm [resolvable:$true] %s3515_s5 }
  0xd1   :  { %s3517_s4 = scalar_lea.hbm %s3516_s5, 2  ;;  %s3519_s10 = scalar_lea.hbm %s4135_s19, 2 }
  0xd2   :  { %p3518_p3 = scmp.ne.s32.totalorder %s3516_s5, %s3517_s4  ;;  %p3520_p4 = scmp.lt.s32.totalorder %s3516_s5, %s4135_s19 }
  0xd3   :  { %p3521_p5 = scmp.lt.s32.totalorder %s3519_s10, %s3517_s4 }
  0xd5   :  { %p3522_p6 = por %p3521_p5, %p3520_p4 }
  0xd7   :  { %p3523_p7 = pnand %p3522_p6, %p3518_p3 }
  0xd9   :  { %3526 = shalt.err (!%p3523_p7)
}
  0xda   :  { %383 = dma.hbm_to_vmem [thread:$0]  %s379_s2, 32, %s381_s11, [#allocation34]  }
  0xdb   :  { %s171_s15 = sshll.u32 %s4010_s20, 4  ;;  %s3912_s16 = smov [#allocation3]   ;;  %s172_s15 = int_to_ptr.hbm [resolvable:$true] %s171_s15 }
  0xdc   :  { %s147_s18 = sshll.u32 %s3912_s16, 4  ;;  %s3539_s25 = sshra.s32 %s146_s17, 4  ;;  %s148_s18 = int_to_ptr.vmem [resolvable:$true] %s147_s18  ;;  %s3540_s25 = int_to_ptr.hbm [resolvable:$true] %s3539_s25 }
  0xdd   :  { %s3541_s22 = scalar_lea.hbm %s3540_s25, 1  ;;  %s3543_s8 = scalar_lea.hbm %s3990_s24, 1 }
  0xde   :  { %p3542_p8 = scmp.ne.s32.totalorder %s3540_s25, %s3541_s22  ;;  %p3544_p9 = scmp.lt.s32.totalorder %s3540_s25, %s3990_s24 }
  0xdf   :  { %p3545_p10 = scmp.lt.s32.totalorder %s3543_s8, %s3541_s22 }
  0xe1   :  { %p3546_p11 = por %p3545_p10, %p3544_p9 }
  0xe3   :  { %p3547_p12 = pnand %p3546_p11, %p3542_p8 }
  0xe5   :  { %3550 = shalt.err (!%p3547_p12)
}
  0xe6   :  { %150 = dma.hbm_to_vmem [thread:$0]  %s146_s17, 16, %s148_s18, [#allocation4]  }
  0xe7   :  { %s3913_s19 = smov [#allocation8]   ;;  %s195_s26 = sshll.u32 %s4025_s14, 4  ;;  %s196_s26 = int_to_ptr.hbm [resolvable:$true] %s195_s26 }
  0xe8   :  { %s173_s23 = sshll.u32 %s3913_s19, 4  ;;  %s3563_s13 = sshra.s32 %s172_s15, 4  ;;  %s174_s23 = int_to_ptr.vmem [resolvable:$true] %s173_s23  ;;  %s3564_s13 = int_to_ptr.hbm [resolvable:$true] %s3563_s13 }
  0xe9   :  { %s3565_s1 = scalar_lea.hbm %s3564_s13, 1  ;;  %s3567_s28 = scalar_lea.hbm %s4010_s20, 1 }
  0xea   :  { %p3566_p13 = scmp.ne.s32.totalorder %s3564_s13, %s3565_s1  ;;  %p3568_p0 = scmp.lt.s32.totalorder %s3564_s13, %s4010_s20 }
  0xeb   :  { %p3569_p1 = scmp.lt.s32.totalorder %s3567_s28, %s3565_s1 }
  0xed   :  { %p3570_p2 = por %p3569_p1, %p3568_p0 }
  0xef   :  { %p3571_p3 = pnand %p3570_p2, %p3566_p13 }
  0xf1   :  { %3574 = shalt.err (!%p3571_p3)
}
  0xf2   :  { %176 = dma.hbm_to_vmem [thread:$0]  %s172_s15, 16, %s174_s23, [#allocation7]  }
  0xf3   :  { %s217_s24 = sshll.u32 %s4035_s3, 4  ;;  %s3914_s2 = smov [#allocation11]   ;;  %s218_s24 = int_to_ptr.hbm [resolvable:$true] %s217_s24 }
  0xf4   :  { %s197_s29 = sshll.u32 %s3914_s2, 4  ;;  %s3587_s6 = sshra.s32 %s196_s26, 4  ;;  %s198_s29 = int_to_ptr.vmem [resolvable:$true] %s197_s29  ;;  %s3588_s6 = int_to_ptr.hbm [resolvable:$true] %s3587_s6 }
  0xf5   :  { %s3589_s12 = scalar_lea.hbm %s3588_s6, 2  ;;  %s3591_s21 = scalar_lea.hbm %s4025_s14, 2 }
  0xf6   :  { %p3590_p4 = scmp.ne.s32.totalorder %s3588_s6, %s3589_s12  ;;  %p3592_p5 = scmp.lt.s32.totalorder %s3588_s6, %s4025_s14 }
  0xf7   :  { %p3593_p6 = scmp.lt.s32.totalorder %s3591_s21, %s3589_s12 }
  0xf9   :  { %p3594_p7 = por %p3593_p6, %p3592_p5 }
  0xfb   :  { %p3595_p8 = pnand %p3594_p7, %p3590_p4 }
  0xfd   :  { %3598 = shalt.err (!%p3595_p8)
}
  0xfe   :  { %200 = dma.hbm_to_vmem [thread:$0]  %s196_s26, 32, %s198_s29, [#allocation10]  }
  0xff   :  { %s4779_s20 = sld [smem:[#allocation64_spill]]  ;;  %s3915_s11 = smov [#allocation14]  }
 0x100   :  { %s219_s17 = sshll.u32 %s3915_s11, 4  ;;  %s3611_s4 = sshra.s32 %s218_s24, 4  ;;  %s220_s17 = int_to_ptr.vmem [resolvable:$true] %s219_s17  ;;  %s3612_s4 = int_to_ptr.hbm [resolvable:$true] %s3611_s4 }
 0x101   :  { %s3613_s10 = scalar_lea.hbm %s3612_s4, 2  ;;  %s3615_s15 = scalar_lea.hbm %s4035_s3, 2 }
 0x102   :  { %p3614_p9 = scmp.ne.s32.totalorder %s3612_s4, %s3613_s10  ;;  %p3616_p10 = scmp.lt.s32.totalorder %s3612_s4, %s4035_s3 }
 0x103   :  { %p3617_p11 = scmp.lt.s32.totalorder %s3615_s15, %s3613_s10 }
 0x105   :  { %s241_s5 = sshll.u32 %s4779_s20, 4  ;;  %p3618_p12 = por %p3617_p11, %p3616_p10  ;;  %s242_s5 = int_to_ptr.hbm [resolvable:$true] %s241_s5 }
 0x107   :  { %p3619_p13 = pnand %p3618_p12, %p3614_p9 }
 0x109   :  { %3622 = shalt.err (!%p3619_p13)
}
 0x10a   :  { %222 = dma.hbm_to_vmem [thread:$0]  %s218_s24, 32, %s220_s17, [#allocation13]  }
 0x10b   :  { %s4780_s14 = sld [smem:[#allocation66_spill]]  ;;  %s3916_s18 = smov [#allocation17]  }
 0x10c   :  { %s243_s25 = sshll.u32 %s3916_s18, 4  ;;  %s3635_s22 = sshra.s32 %s242_s5, 4  ;;  %s244_s25 = int_to_ptr.vmem [resolvable:$true] %s243_s25  ;;  %s3636_s22 = int_to_ptr.hbm [resolvable:$true] %s3635_s22 }
 0x10d   :  { %s3637_s8 = scalar_lea.hbm %s3636_s22, 4  ;;  %s3639_s19 = scalar_lea.hbm %s4779_s20, 4 }
 0x10e   :  { %p3638_p0 = scmp.ne.s32.totalorder %s3636_s22, %s3637_s8  ;;  %p3640_p1 = scmp.lt.s32.totalorder %s3636_s22, %s4779_s20 }
 0x10f   :  { %p3641_p2 = scmp.lt.s32.totalorder %s3639_s19, %s3637_s8 }
 0x111   :  { %s265_s16 = sshll.u32 %s4780_s14, 4  ;;  %p3642_p3 = por %p3641_p2, %p3640_p1  ;;  %s266_s16 = int_to_ptr.hbm [resolvable:$true] %s265_s16 }
 0x113   :  { %p3643_p4 = pnand %p3642_p3, %p3638_p0 }
 0x115   :  { %3646 = shalt.err (!%p3643_p4)
}
 0x116   :  { %246 = dma.hbm_to_vmem [thread:$0]  %s242_s5, 64, %s244_s25, [#allocation16]  }
 0x117   :  { %s4781_s3 = sld [smem:[#allocation67_spill]]  ;;  %s3917_s23 = smov [#allocation20]  }
 0x118   :  { %s267_s26 = sshll.u32 %s3917_s23, 4  ;;  %s3659_s1 = sshra.s32 %s266_s16, 4  ;;  %s268_s26 = int_to_ptr.vmem [resolvable:$true] %s267_s26  ;;  %s3660_s1 = int_to_ptr.hbm [resolvable:$true] %s3659_s1 }
 0x119   :  { %s3661_s28 = scalar_lea.hbm %s3660_s1, 1  ;;  %s3663_s24 = scalar_lea.hbm %s4780_s14, 1 }
 0x11a   :  { %p3662_p5 = scmp.ne.s32.totalorder %s3660_s1, %s3661_s28  ;;  %p3664_p6 = scmp.lt.s32.totalorder %s3660_s1, %s4780_s14 }
 0x11b   :  { %p3665_p7 = scmp.lt.s32.totalorder %s3663_s24, %s3661_s28 }
 0x11d   :  { %s287_s13 = sshll.u32 %s4781_s3, 4  ;;  %p3666_p8 = por %p3665_p7, %p3664_p6  ;;  %s288_s13 = int_to_ptr.hbm [resolvable:$true] %s287_s13 }
 0x11f   :  { %p3667_p9 = pnand %p3666_p8, %p3662_p5 }
 0x121   :  { %3670 = shalt.err (!%p3667_p9)
}
 0x122   :  { %270 = dma.hbm_to_vmem [thread:$0]  %s266_s16, 16, %s268_s26, [#allocation19]  }
 0x123   :  { %s4782_s2 = sld [smem:[#allocation69_spill]]  ;;  %s3918_s6 = smov [#allocation23]  }
 0x124   :  { %s289_s12 = sshll.u32 %s3918_s6, 4  ;;  %s3683_s21 = sshra.s32 %s288_s13, 4  ;;  %s290_s12 = int_to_ptr.vmem [resolvable:$true] %s289_s12  ;;  %s3684_s21 = int_to_ptr.hbm [resolvable:$true] %s3683_s21 }
 0x125   :  { %s3685_s20 = scalar_lea.hbm %s3684_s21, 4  ;;  %s3687_s11 = scalar_lea.hbm %s4781_s3, 4 }
 0x126   :  { %p3686_p10 = scmp.ne.s32.totalorder %s3684_s21, %s3685_s20  ;;  %p3688_p11 = scmp.lt.s32.totalorder %s3684_s21, %s4781_s3 }
 0x127   :  { %p3689_p12 = scmp.lt.s32.totalorder %s3687_s11, %s3685_s20 }
 0x129   :  { %s311_s29 = sshll.u32 %s4782_s2, 4  ;;  %p3690_p13 = por %p3689_p12, %p3688_p11  ;;  %s312_s29 = int_to_ptr.hbm [resolvable:$true] %s311_s29 }
 0x12b   :  { %p3691_p0 = pnand %p3690_p13, %p3686_p10 }
 0x12d   :  { %3694 = shalt.err (!%p3691_p0)
}
 0x12e   :  { %292 = dma.hbm_to_vmem [thread:$0]  %s288_s13, 64, %s290_s12, [#allocation22]  }
 0x12f   :  { %s4783_s17 = sld [smem:[#allocation73_spill]]  ;;  %s3919_s5 = smov [#allocation26]  }
 0x130   :  { %s313_s4 = sshll.u32 %s3919_s5, 4  ;;  %s3707_s15 = sshra.s32 %s312_s29, 4  ;;  %s314_s4 = int_to_ptr.vmem [resolvable:$true] %s313_s4  ;;  %s3708_s15 = int_to_ptr.hbm [resolvable:$true] %s3707_s15 }
 0x131   :  { %s3709_s14 = scalar_lea.hbm %s3708_s15, 1  ;;  %s3711_s16 = scalar_lea.hbm %s4782_s2, 1 }
 0x132   :  { %p3710_p1 = scmp.ne.s32.totalorder %s3708_s15, %s3709_s14  ;;  %p3712_p2 = scmp.lt.s32.totalorder %s3708_s15, %s4782_s2 }
 0x133   :  { %p3713_p3 = scmp.lt.s32.totalorder %s3711_s16, %s3709_s14 }
 0x135   :  { %s338_s10 = sshll.u32 %s4783_s17, 4  ;;  %p3714_p4 = por %p3713_p3, %p3712_p2  ;;  %s4236_s10 = int_to_ptr.hbm [resolvable:$true] %s338_s10 }
 0x137   :  { %p3715_p5 = pnand %p3714_p4, %p3710_p1 }
 0x139   :  { %3718 = shalt.err (!%p3715_p5)
}
 0x13a   :  { %316 = dma.hbm_to_vmem [thread:$0]  %s312_s29, 16, %s314_s4, [#allocation25]  }
 0x13b   :  { %s4784_s18 = sld [smem:[#allocation74_spill]]  ;;  %s3920_s22 = smov [#allocation29]  }
 0x13c   :  { %s340_s8 = sshll.u32 %s3920_s22, 4  ;;  %s3731_s19 = sshra.s32 %s4236_s10, 4  ;;  %s341_s8 = int_to_ptr.vmem [resolvable:$true] %s340_s8  ;;  %s3732_s19 = int_to_ptr.hbm [resolvable:$true] %s3731_s19 }
 0x13d   :  { %s3733_s3 = scalar_lea.hbm %s3732_s19, 64  ;;  %s3735_s23 = scalar_lea.hbm %s4783_s17, 64 }
 0x13e   :  { %p3734_p6 = scmp.ne.s32.totalorder %s3732_s19, %s3733_s3  ;;  %p3736_p7 = scmp.lt.s32.totalorder %s3732_s19, %s4783_s17 }
 0x13f   :  { %p3737_p8 = scmp.lt.s32.totalorder %s3735_s23, %s3733_s3 }
 0x141   :  { %s365_s25 = sshll.u32 %s4784_s18, 4  ;;  %p3738_p9 = por %p3737_p8, %p3736_p7  ;;  %s366_s25 = int_to_ptr.hbm [resolvable:$true] %s365_s25 }
 0x143   :  { %p3739_p10 = pnand %p3738_p9, %p3734_p6 }
 0x145   :  { %3742 = shalt.err (!%p3739_p10)
}
 0x146   :  { %s4785_s26 = sld [smem:[#allocation77_spill]]  ;;  %s3921_s13 = smov [#allocation32]  }
 0x147   :  { %346 = dma.hbm_to_vmem [thread:$0]  %s4236_s10, 1024, %s341_s8, [#allocation28], %s3909_s7, %s3909_s7, %s3910_s0  }
 0x148   :  { %s367_s1 = sshll.u32 %s3921_s13, 4  ;;  %s3755_s24 = sshra.s32 %s366_s25, 4  ;;  %s368_s1 = int_to_ptr.vmem [resolvable:$true] %s367_s1  ;;  %s3756_s24 = int_to_ptr.hbm [resolvable:$true] %s3755_s24 }
 0x149   :  { %s3757_s2 = scalar_lea.hbm %s3756_s24, 1  ;;  %s3759_s29 = scalar_lea.hbm %s4784_s18, 1 }
 0x14a   :  { %p3758_p11 = scmp.ne.s32.totalorder %s3756_s24, %s3757_s2  ;;  %p3760_p12 = scmp.lt.s32.totalorder %s3756_s24, %s4784_s18 }
 0x14b   :  { %p3761_p13 = scmp.lt.s32.totalorder %s3759_s29, %s3757_s2 }
 0x14c   :  { %s391_s28 = sshll.u32 %s4785_s26, 4  ;;  %s392_s28 = int_to_ptr.hbm [resolvable:$true] %s391_s28 }
 0x14d   :  { %p3762_p0 = por %p3761_p13, %p3760_p12 }
 0x14f   :  { %p3763_p1 = pnand %p3762_p0, %p3758_p11 }
 0x151   :  { %3766 = shalt.err (!%p3763_p1)
}
 0x152   :  { %370 = dma.hbm_to_vmem [thread:$0]  %s366_s25, 16, %s368_s1, [#allocation31]  }
 0x153   :  { %s3922_s6 = smov [#allocation35]   ;;  %s3779_s21 = sshra.s32 %s392_s28, 4  ;;  %s3780_s21 = int_to_ptr.hbm [resolvable:$true] %s3779_s21 }
 0x154   :  { %s393_s12 = sshll.u32 %s3922_s6, 4  ;;  %s3781_s20 = scalar_lea.hbm %s3780_s21, 1  ;;  %s394_s12 = int_to_ptr.vmem [resolvable:$true] %s393_s12 }
 0x155   :  { %p3782_p2 = scmp.ne.s32.totalorder %s3780_s21, %s3781_s20  ;;  %s3783_s11 = scalar_lea.hbm %s4785_s26, 1 }
 0x156   :  { %p3784_p3 = scmp.lt.s32.totalorder %s3780_s21, %s4785_s26  ;;  %p3785_p4 = scmp.lt.s32.totalorder %s3783_s11, %s3781_s20 }
 0x158   :  { %p3786_p5 = por %p3785_p4, %p3784_p3 }
 0x15a   :  { %p3787_p6 = pnand %p3786_p5, %p3782_p2 }
 0x15c   :  { %3790 = shalt.err (!%p3787_p6)
}
 0x15d   :  { %396 = dma.hbm_to_vmem [thread:$0]  %s392_s28, 16, %s394_s12, [#allocation34]  }
 0x15e   :  { %3827 = dma.done.wait [#allocation4], 16  }
 0x15f   :  { %3828 = vsyncadd [#allocation4], 4294967280 }
 0x160   :  { %3829 = dma.done.wait [#allocation7], 32  }
 0x161   :  { %3830 = vsyncadd [#allocation7], 4294967264 }
 0x162   :  { %3831 = dma.done.wait [#allocation10], 64  }
 0x163   :  { %3832 = vsyncadd [#allocation10], 4294967232 }
 0x164   :  { %3833 = dma.done.wait [#allocation13], 48  }
 0x165   :  { %3834 = vsyncadd [#allocation13], 4294967248 }
 0x166   :  { %3835 = dma.done.wait [#allocation16], 80  }
 0x167   :  { %3836 = vsyncadd [#allocation16], 4294967216 }
 0x168   :  { %3837 = dma.done.wait [#allocation19], 80  }
 0x169   :  { %3838 = vsyncadd [#allocation19], 4294967216 }
 0x16a   :  { %3839 = dma.done.wait [#allocation22], 128  }
 0x16b   :  { %3840 = vsyncadd [#allocation22], 4294967168 }
 0x16c   :  { %3841 = dma.done.wait [#allocation25], 80  }
 0x16d   :  { %3842 = vsyncadd [#allocation25], 4294967216 }
 0x16e   :  { %3843 = dma.done.wait [#allocation28], 1152  }
 0x16f   :  { %3844 = vsyncadd [#allocation28], 4294966144 }
 0x170   :  { %3845 = dma.done.wait [#allocation31], 1040  }
 0x171   :  { %3846 = vsyncadd [#allocation31], 4294966256 }
 0x172   :  { %3847 = dma.done.wait [#allocation34], 48  }
 0x173   :  { %3848 = vsyncadd [#allocation34], 4294967248  ;;  %s4786_s17 = sld [smem:[#allocation49_spill]]  ;;  %v3923_v1 = vmov 0   ;;  %v3924_v17 = vmov 1   ;;  %v3925_v42 = vmov 2  }
 0x174   :  { %s4787_s5 = sld [smem:[#allocation61_spill]]  ;;  %3255 = vset.pattern.permute.xlu1 %v3923_v1  ;;  %3253 = vset.pattern.permute.xlu0 %v3923_v1  ;;  %vm564_vm1 = vcmask 130048   ;;  %vm1483_vm3 = vcmask 523264   ;;  %vm2010_vm5 = vcmask 64512   ;;  %vm1558_vm14 = vcmask 39936   ;;  %s2625_s11 = sshll.u32 %s4178_s27, 4  ;;  %s2626_s11 = int_to_ptr.hbm [resolvable:$true] %s2625_s11 }
 0x175   :  { %s4788_s4 = sld [smem:[#allocation60_spill]]  ;;  %3257 = vset.pattern.permute.xlu2 %v3923_v1 }
 0x176   :  { %s4789_s10 = sld [smem:[#allocation50_spill]] }
 0x177   :  { %s4790_s15 = sld [smem:[#allocation59_spill]] }
 0x178   :  { %s4791_s14 = sld [smem:[#allocation63_spill]] }
 0x179   :  { %v494_v2 = vld [vmem:[%s4786_s17 + $0x8] sm:$0xff]  ;;  %v493_v3 = vld [vmem:[%s4786_s17] sm:$0xff]  ;;  %s4792_s16 = sld [smem:[#allocation62_spill]]  ;;  %s3815_s17 = sshra.s32 %s2626_s11, 4  ;;  %s3816_s17 = int_to_ptr.hbm [resolvable:$true] %s3815_s17 }
 0x17a   :  { %v3108_v4 = vld [vmem:[%s4787_s5 + $0x78] sm:$0xff]  ;;  %528 = vperm.xlu1 %3255, %v494_v2   ;;  %523 = vperm.xlu0 %3253, %v493_v3   ;;  %v3107_v7 = vld [vmem:[%s4787_s5 + $0x70] sm:$0xff]  ;;  %v3106_v13 = vld [vmem:[%s4787_s5 + $0x68] sm:$0xff]  ;;  %s4793_s18 = sld [smem:[#allocation70_spill]]  ;;  %p3820_p8 = scmp.lt.s32.totalorder %s3816_s17, %s4178_s27 }
 0x17b   :  { %v3116_v5 = vld [vmem:[%s4787_s5 + $0xb8] sm:$0xff]  ;;  %1170 = vmatpush.bf16.msra.mxu2 %v3108_v4  ;;  %v559_v8 = vld [vmem:[%s4788_s4 + $0x8] sm:$0xff]  ;;  %v3115_v9 = vld [vmem:[%s4787_s5 + $0xb0] sm:$0xff]  ;;  %s4794_s25 = sld [smem:[#allocation72_spill]] }
 0x17c   :  { %v3100_v6 = vld [vmem:[%s4787_s5 + $0x38] sm:$0xff]  ;;  %1184 = vmatpush.bf16.msra.mxu3 %v3116_v5  ;;  %v3099_v10 = vld [vmem:[%s4787_s5 + $0x30] sm:$0xff]  ;;  %v558_v11 = vld [vmem:[%s4788_s4] sm:$0xff]  ;;  %585 = vmatpush.msra.mxu0 %v559_v8  ;;  %s4795_s22 = sld [smem:[#allocation51_spill]]  ;;  %s3819_s4 = scalar_lea.hbm %s4178_s27, 16 }
 0x17d   :  { %1156 = vmatpush.bf16.msra.mxu1 %v3100_v6  ;;  %v3124_v12 = vld [vmem:[%s4787_s5 + $0xf8] sm:$0xff]  ;;  %v3114_v14 = vld [vmem:[%s4787_s5 + $0xa8] sm:$0xff]  ;;  %v3123_v16 = vld [vmem:[%s4787_s5 + $0xf0] sm:$0xff]  ;;  %s4796_s8 = sld [smem:[#allocation52_spill]] }
 0x17e   :  { %586 = vmatpush.msra.mxu0 %v558_v11  ;;  %v3098_v15 = vld [vmem:[%s4787_s5 + $0x28] sm:$0xff]  ;;  %v3105_v18 = vld [vmem:[%s4787_s5 + $0x60] sm:$0xff]  ;;  %v3104_v22 = vld [vmem:[%s4787_s5 + $0x58] sm:$0xff]  ;;  %s4797_s19 = sld [smem:[#allocation53_spill]] }
 0x17f   :  { %1171 = vmatpush.bf16.msra.mxu2 %v3107_v7  ;;  %v3113_v19 = vld [vmem:[%s4787_s5 + $0xa0] sm:$0xff]  ;;  %v3122_v21 = vld [vmem:[%s4787_s5 + $0xe8] sm:$0xff]  ;;  %v3112_v23 = vld [vmem:[%s4787_s5 + $0x98] sm:$0xff]  ;;  %s4798_s3 = sld [smem:[#allocation54_spill]] }
 0x180   :  { %1185 = vmatpush.bf16.msra.mxu3 %v3115_v9  ;;  %1198 = vmatpush.bf16.msrb.mxu0 %v3124_v12  ;;  %v3097_v20 = vld [vmem:[%s4787_s5 + $0x20] sm:$0xff]  ;;  %v3096_v24 = vld [vmem:[%s4787_s5 + $0x18] sm:$0xff]  ;;  %v3103_v25 = vld [vmem:[%s4787_s5 + $0x50] sm:$0xff]  ;;  %s4799_s23 = sld [smem:[#allocation55_spill]] }
 0x181   :  { %1157 = vmatpush.bf16.msra.mxu1 %v3099_v10  ;;  %v3111_v26 = vld [vmem:[%s4787_s5 + $0x90] sm:$0xff]  ;;  %v3121_v27 = vld [vmem:[%s4787_s5 + $0xe0] sm:$0xff]  ;;  %v3102_v29 = vld [vmem:[%s4787_s5 + $0x48] sm:$0xff]  ;;  %s4800_s26 = sld [smem:[#allocation56_spill]] }
 0x182   :  { %3256 = vset.pattern.permute.xlu1 %v3924_v17  ;;  %3254 = vset.pattern.permute.xlu0 %v3924_v17  ;;  %v3095_v28 = vld [vmem:[%s4787_s5 + $0x10] sm:$0xff]  ;;  %v3110_v30 = vld [vmem:[%s4787_s5 + $0x88] sm:$0xff]  ;;  %v3120_v31 = vld [vmem:[%s4787_s5 + $0xd8] sm:$0xff]  ;;  %s4801_s13 = sld [smem:[#allocation57_spill]] }
 0x183   :  { %539 = vperm.xlu1 %3256, %v494_v2   ;;  %535 = vperm.xlu0 %3254, %v493_v3   ;;  %v3094_v32 = vld [vmem:[%s4787_s5 + $0x8] sm:$0xff]  ;;  %v3101_v33 = vld [vmem:[%s4787_s5 + $0x40] sm:$0xff]  ;;  %v3140_v34 = vld [vmem:[%s4787_s5 + $0x178] sm:$0xff]  ;;  %s4802_s1 = sld [smem:[#allocation58_spill]] }
 0x184   :  { %1172 = vmatpush.bf16.msra.mxu2 %v3106_v13  ;;  %1186 = vmatpush.bf16.msra.mxu3 %v3114_v14  ;;  %v3109_v35 = vld [vmem:[%s4787_s5 + $0x80] sm:$0xff]  ;;  %v3119_v36 = vld [vmem:[%s4787_s5 + $0xd0] sm:$0xff]  ;;  %v3148_v37 = vld [vmem:[%s4787_s5 + $0x1b8] sm:$0xff]  ;;  %s4803_s28 = sld [smem:[#allocation65_spill]] }
 0x185   :  { %1158 = vmatpush.bf16.msra.mxu1 %v3098_v15  ;;  %1199 = vmatpush.bf16.msrb.mxu0 %v3123_v16  ;;  %v3093_v38 = vld [vmem:[%s4787_s5] sm:$0xff]  ;;  %v3132_v39 = vld [vmem:[%s4787_s5 + $0x138] sm:$0xff]  ;;  %v3139_v40 = vld [vmem:[%s4787_s5 + $0x170] sm:$0xff]  ;;  %s4806_s24 = sld [smem:[#allocation68_spill]] }
 0x186   :  { %v3118_v41 = vld [vmem:[%s4787_s5 + $0xc8] sm:$0xff]  ;;  %v3147_v43 = vld [vmem:[%s4787_s5 + $0x1b0] sm:$0xff]  ;;  %v3117_v46 = vld [vmem:[%s4787_s5 + $0xc0] sm:$0xff]  ;;  %s4807_s2 = sld [smem:[#allocation71_spill]] }
 0x187   :  { %v3131_v44 = vld [vmem:[%s4787_s5 + $0x130] sm:$0xff]  ;;  %v3138_v45 = vld [vmem:[%s4787_s5 + $0x168] sm:$0xff]  ;;  %v3137_v49 = vld [vmem:[%s4787_s5 + $0x160] sm:$0xff]  ;;  %s4808_s29 = sld [smem:[#allocation75_spill]] }
 0x188   :  { %1173 = vmatpush.bf16.msra.mxu2 %v3105_v18  ;;  %1187 = vmatpush.bf16.msra.mxu3 %v3113_v19  ;;  %v3146_v47 = vld [vmem:[%s4787_s5 + $0x1a8] sm:$0xff]  ;;  %v3145_v50 = vld [vmem:[%s4787_s5 + $0x1a0] sm:$0xff]  ;;  %v3136_v55 = vld [vmem:[%s4787_s5 + $0x158] sm:$0xff]  ;;  %s4809_s6 = sld [smem:[#allocation76_spill]] }
 0x189   :  { %1159 = vmatpush.bf16.msra.mxu1 %v3097_v20  ;;  %1200 = vmatpush.bf16.msrb.mxu0 %v3122_v21  ;;  %v3130_v48 = vld [vmem:[%s4787_s5 + $0x128] sm:$0xff]  ;;  %v3085_v51 = vld [vmem:[%s4789_s10 + $0x4] sm:$0xf]  ;;  %v3144_v59 = vld [vmem:[%s4787_s5 + $0x198] sm:$0xff]  ;;  %s4810_s12 = sld [smem:[#allocation80_spill]] }
 0x18a   :  { %v2703_v52 = vld [vmem:[%s4789_s10 + $0x20] sm:$0xf0]  ;;  %v2709_v56 = vld [vmem:[%s4789_s10 + $0x8] sm:$0xf]  ;;  %v2701_v60 = vld [vmem:[%s4789_s10] sm:$0xf] }
 0x18b   :  { %3259 = vset.pattern.permute.xlu1 %v3925_v42  ;;  %v2706_v53 = vor.u32 %v3085_v51, %v2703_v52  ;;  %v3129_v54 = vld [vmem:[%s4787_s5 + $0x120] sm:$0xff]  ;;  %v3090_v57 = vld [vmem:[%s4789_s10 + $0x24] sm:$0xf0]  ;;  %v3128_v62 = vld [vmem:[%s4787_s5 + $0x118] sm:$0xff]  ;;  %s4811_s21 = sld [smem:[#allocation78_spill]] }
 0x18c   :  { %1174 = vmatpush.bf16.msra.mxu2 %v3104_v22  ;;  %1188 = vmatpush.bf16.msra.mxu3 %v3112_v23  ;;  %v2710_v58 = vor.u32 %v3090_v57, %v2709_v56  ;;  %v3089_v61 = vld [vmem:[%s4789_s10 + $0x1c] sm:$0xf0]  ;;  %v3135_v63 = vld [vmem:[%s4787_s5 + $0x150] sm:$0xff]  ;;  %v3134_v6 = vld [vmem:[%s4787_s5 + $0x148] sm:$0xff] }
 0x18d   :  { %1160 = vmatpush.bf16.msra.mxu1 %v3096_v24  ;;  %1201 = vmatpush.bf16.msrb.mxu0 %v3121_v27  ;;  %v2702_v0 = vor.u32 %v3089_v61, %v2701_v60  ;;  %v3143_v2 = vld [vmem:[%s4787_s5 + $0x190] sm:$0xff]  ;;  %v519_v7 = vld [vmem:[%s4790_s15] sm:$0x3]  ;;  %v3142_v8 = vld [vmem:[%s4787_s5 + $0x188] sm:$0xff] }
 0x18e   :  { %v3127_v5 = vld [vmem:[%s4787_s5 + $0x110] sm:$0xff]  ;;  %v1417_v9 = vld [vmem:[#allocation11] sm:$0x3]  ;;  %v3133_v11 = vld [vmem:[%s4787_s5 + $0x140] sm:$0xff]  ;;  %v531_v12 = vperm.slane %v519_v7, 0  ;;  %v542_v13 = vperm.slane %v519_v7, 1 }
 0x18f   :  { %v3126_v10 = vld [vmem:[%s4787_s5 + $0x108] sm:$0xff]  ;;  %v1422_v14 = vperm.slane %v1417_v9, 1  ;;  %v3141_v15 = vld [vmem:[%s4787_s5 + $0x180] sm:$0xff]  ;;  %v1419_v16 = vperm.slane %v1417_v9, 0  ;;  %v3087_v18 = vld [vmem:[%s4789_s10 + $0x14] sm:$0xf] }
 0x190   :  { %1175 = vmatpush.bf16.msra.mxu2 %v3103_v25  ;;  %1189 = vmatpush.bf16.msra.mxu3 %v3111_v26  ;;  %v2719_v19 = vld [vmem:[%s4789_s10 + $0x30] sm:$0xf0]  ;;  %v1676_v20 = vld [vmem:[#allocation14] sm:$0x3]  ;;  %v3125_v26 = vld [vmem:[%s4787_s5 + $0x100] sm:$0xff] }
 0x191   :  { %1161 = vmatpush.bf16.msra.mxu1 %v3095_v28  ;;  %1202 = vmatpush.bf16.msrb.mxu0 %v3120_v31  ;;  %v2722_v21 = vor.u32 %v3087_v18, %v2719_v19  ;;  %v1681_v23 = vperm.slane %v1676_v20, 1  ;;  %v2725_v27 = vld [vmem:[%s4789_s10 + $0x18] sm:$0xf]  ;;  %v3265_v56 = vld [vmem:[#allocation15] ss:$0 sm:$0xff] }
 0x192   :  { %v3092_v28 = vld [vmem:[%s4789_s10 + $0x34] sm:$0xf0]  ;;  %v3150_v9 = vld [vmem:[%s4787_s5 + $0x1c8] sm:$0xff]  ;;  %v1432_v19 = vld [vmem:[%s4791_s14] sm:$0x7] }
 0x194   :  { %1176 = vmatpush.bf16.msra.mxu2 %v3102_v29  ;;  %1190 = vmatpush.bf16.msra.mxu3 %v3110_v30 }
 0x195   :  { %1162 = vmatpush.bf16.msra.mxu1 %v3094_v32  ;;  %1203 = vmatpush.bf16.msrb.mxu0 %v3119_v36 }
 0x198   :  { %1177 = vmatpush.bf16.msra.mxu2 %v3101_v33  ;;  %1191 = vmatpush.bf16.msra.mxu3 %v3109_v35  ;;  %v3263_v33 = vld [vmem:[#allocation12] ss:$0 sm:$0xff] }
 0x199   :  { %1163 = vmatpush.bf16.msra.mxu1 %v3093_v38  ;;  %1204 = vmatpush.bf16.msrb.mxu0 %v3118_v41  ;;  %v2717_v38 = vld [vmem:[%s4789_s10 + $0x10] sm:$0xf] }
 0x19b   :  { %1178 = vmatmul.bf16.vlgmr.msra.gmra.mxu2 %v2706_v53  ;;  %1192 = vmatmul.bf16.vlgmr.msra.gmra.mxu3 %v2710_v58  ;;  %v3156_v53 = vld [vmem:[%s4787_s5 + $0x1f8] sm:$0xff]  ;;  %v3155_v58 = vld [vmem:[%s4787_s5 + $0x1f0] sm:$0xff] }
 0x19c   :  { %1226 = vmatpush.bf16.msrb.mxu2 %v3140_v34  ;;  %1240 = vmatpush.bf16.msrb.mxu3 %v3148_v37  ;;  %v3264_v34 = vld [vmem:[#allocation3] ss:$0 sm:$0xff]  ;;  %v2726_v37 = vor.u32 %v3092_v28, %v2725_v27  ;;  %v3169_v27 = vld [vmem:[%s4792_s16 + $0x64] sm:$0xf]  ;;  %v3039_v28 = vld [vmem:[%s4792_s16 + $0x68] sm:$0xf0] }
 0x19d   :  { %1212 = vmatpush.bf16.msrb.mxu1 %v3132_v39  ;;  %1205 = vmatpush.bf16.msrb.mxu0 %v3117_v46  ;;  %v3091_v39 = vld [vmem:[%s4789_s10 + $0x2c] sm:$0xf0] }
 0x19e   :  { %1164 = vmatmul.bf16.vlgmr.msra.gmra.mxu1 %v2702_v0 }
 0x1a0   :  { %1227 = vmatpush.bf16.msrb.mxu2 %v3139_v40  ;;  %1241 = vmatpush.bf16.msrb.mxu3 %v3147_v43  ;;  %v1678_v40 = vperm.slane %v1676_v20, 0  ;;  %v1465_v20 = vperm.slane %v1432_v19, 1 }
 0x1a1   :  { %1213 = vmatpush.bf16.msrb.mxu1 %v3131_v44 }
 0x1a4   :  { %1228 = vmatpush.bf16.msrb.mxu2 %v3138_v45  ;;  %1242 = vmatpush.bf16.msrb.mxu3 %v3146_v47  ;;  %v2718_v45 = vor.u32 %v3091_v39, %v2717_v38  ;;  %v3167_v38 = vld [vmem:[%s4792_s16 + $0x54] sm:$0xf]  ;;  %v3031_v39 = vld [vmem:[%s4792_s16 + $0x58] sm:$0xf0] }
 0x1a5   :  { %1214 = vmatpush.bf16.msrb.mxu1 %v3130_v48 }
 0x1a8   :  { %1229 = vmatpush.bf16.msrb.mxu2 %v3137_v49  ;;  %1243 = vmatpush.bf16.msrb.mxu3 %v3145_v50 }
 0x1a9   :  { %1215 = vmatpush.bf16.msrb.mxu1 %v3129_v54 }
 0x1ac   :  { %1230 = vmatpush.bf16.msrb.mxu2 %v3136_v55  ;;  %1244 = vmatpush.bf16.msrb.mxu3 %v3144_v59 }
 0x1ad   :  { %1216 = vmatpush.bf16.msrb.mxu1 %v3128_v62 }
 0x1b0   :  { %1231 = vmatpush.bf16.msrb.mxu2 %v3135_v63  ;;  %1245 = vmatpush.bf16.msrb.mxu3 %v3143_v2  ;;  %v3154_v63 = vld [vmem:[%s4787_s5 + $0x1e8] sm:$0xff] }
 0x1b1   :  { %1217 = vmatpush.bf16.msrb.mxu1 %v3127_v5  ;;  %v3086_v5 = vld [vmem:[%s4789_s10 + $0xc] sm:$0xf] }
 0x1b4   :  { %1232 = vmatpush.bf16.msrb.mxu2 %v3134_v6  ;;  %1246 = vmatpush.bf16.msrb.mxu3 %v3142_v8  ;;  %v2711_v6 = vld [vmem:[%s4789_s10 + $0x28] sm:$0xf0]  ;;  %v3152_v8 = vld [vmem:[%s4787_s5 + $0x1d8] sm:$0xff] }
 0x1b5   :  { %1218 = vmatpush.bf16.msrb.mxu1 %v3126_v10  ;;  %v3149_v10 = vld [vmem:[%s4787_s5 + $0x1c0] sm:$0xff] }
 0x1b8   :  { %1233 = vmatpush.bf16.msrb.mxu2 %v3133_v11  ;;  %1247 = vmatpush.bf16.msrb.mxu3 %v3141_v15  ;;  %v3088_v11 = vld [vmem:[%s4789_s10 + $0x1c] sm:$0xf] }
 0x1b9   :  { %1219 = vmatpush.bf16.msrb.mxu1 %v3125_v26  ;;  %v1692_v15 = vld [vmem:[#allocation23] sm:$0x7] }
 0x1bb   :  { %1234 = vmatmul.bf16.vlgmr.msrb.gmra.mxu2 %v2722_v21  ;;  %1248 = vmatmul.bf16.vlgmr.msrb.gmra.mxu3 %v2726_v37  ;;  %v1454_v21 = vperm.slane %v1432_v19, 0  ;;  %v1933_v37 = vld [vmem:[#allocation27] sm:$0xff] }
 0x1bc   :  { %1220 = vmatmul.bf16.vlgmr.msrb.gmra.mxu1 %v2718_v45 }
 0x1ec   :  { %v524_v3 = vpop.permute.xlu0 %523  ;;  %v4317_v4 = vpop.permute.xlu1 %528 }
 0x1ed   :  { %v532_v22 = vmul.f32 %v531_v12, %v524_v3  ;;  %v1421_v29 = vmul.f32 %v1419_v16, %v4317_v4  ;;  %v1420_v35 = vmul.f32 %v1419_v16, %v524_v3  ;;  %v533_v41 = vmul.f32 %v531_v12, %v4317_v4  ;;  %v2727_v12 = vld [vmem:[%s4789_s10 + $0x38] sm:$0xf0] }
 0x1ee   :  { %v1679_v51 = vmul.f32 %v1678_v40, %v524_v3  ;;  %v1680_v62 = vmul.f32 %v1678_v40, %v4317_v4  ;;  %v3153_v3 = vld [vmem:[%s4787_s5 + $0x1e0] sm:$0xff]  ;;  %v2714_v4 = vor.u32 %v3086_v5, %v2711_v6  ;;  %v3015_v5 = vld [vmem:[%s4792_s16 + $0x38] sm:$0xf0] }
 0x1f5   :  { %v540_v24 = vpop.permute.xlu1 %539  ;;  %v536_v25 = vpop.permute.xlu0 %535 }
 0x1f6   :  { %v544_v30 = vmul.f32 %v542_v13, %v540_v24  ;;  %v1424_v31 = vmul.f32 %v1422_v14, %v540_v24  ;;  %v543_v32 = vmul.f32 %v542_v13, %v536_v25  ;;  %v1423_v36 = vmul.f32 %v1422_v14, %v536_v25  ;;  %v1433_v14 = vld [vmem:[#allocation17] sm:$0x7] }
 0x1f7   :  { %v1682_v47 = vmul.f32 %v1681_v23, %v536_v25  ;;  %v1683_v59 = vmul.f32 %v1681_v23, %v540_v24  ;;  %v2730_v13 = vor.u32 %v3088_v11, %v2727_v12  ;;  %3051 = vmatpush.xpose.msk.msra.mxu3 %vm1483_vm3, %v1433_v14  ;;  %v3047_v23 = vld [vmem:[%s4792_s16 + $0x78] sm:$0xf0]  ;;  %v1478_v25 = vperm.slane %v1432_v19, 2  ;;  %v3168_v12 = vld [vmem:[%s4792_s16 + $0x54] sm:$0xf0] }
 0x1f8   :  { %v1426_v42 = vadd.f32 %v1424_v31, %v1421_v29  ;;  %v545_v43 = vadd.f32 %v543_v32, %v532_v22  ;;  %v1425_v44 = vadd.f32 %v1423_v36, %v1420_v35  ;;  %v546_v46 = vadd.f32 %v544_v30, %v533_v41  ;;  %v3171_v22 = vld [vmem:[%s4792_s16 + $0x74] sm:$0xf]  ;;  %v3007_v14 = vld [vmem:[%s4792_s16 + $0x28] sm:$0xf0] }
 0x1f9   :  { %v1684_v54 = vadd.f32 %v1682_v47, %v1679_v51  ;;  %v1685_v0 = vadd.f32 %v1683_v59, %v1680_v62  ;;  %v3050_v26 = vor.u32 %v3171_v22, %v3047_v23  ;;  %v3042_v31 = vor.u32 %v3169_v27, %v3039_v28  ;;  %v3023_v47 = vld [vmem:[%s4792_s16 + $0x48] sm:$0xf0]  ;;  %v3037_v59 = vld [vmem:[%s4792_s16 + $0x60] sm:$0xf] }
 0x1fa   :  { %v1431_v48 = vadd.f32 %v3263_v33, %v1426_v42  ;;  %v550_v49 = vadd.f32 %v3264_v34, %v545_v43  ;;  %v1430_v50 = vadd.f32 %v3263_v33, %v1425_v44  ;;  %v551_v57 = vadd.f32 %v3264_v34, %v546_v46  ;;  %v3045_v42 = vld [vmem:[%s4792_s16 + $0x70] sm:$0xf]  ;;  %v3172_v43 = vld [vmem:[%s4792_s16 + $0x74] sm:$0xf0]  ;;  %v3165_v44 = vld [vmem:[%s4792_s16 + $0x44] sm:$0xf] }
 0x1fb   :  { %v1689_v60 = vadd.f32 %v3265_v56, %v1684_v54  ;;  %v1690_v7 = vadd.f32 %v3265_v56, %v1685_v0  ;;  %3056 = vmatpush.xpose.msk.msrb.mxu3 %vm1483_vm3, %v1692_v15  ;;  %1391 = vmatpush.bf16.msra.mxu2 %v3050_v26  ;;  %v3034_v41 = vor.u32 %v3167_v38, %v3031_v39  ;;  %v3021_v23 = vld [vmem:[%s4792_s16 + $0x40] sm:$0xf] }
 0x1fc   :  { %1462 = vperm.xlu0 %3254, %v1431_v48   ;;  %vm552_vm0 = vcmp.ge.f32.partialorder %v550_v49, 0.0  ;;  %v554_v52 = vmul.f32 0.01, %v550_v49  ;;  %1471 = vperm.xlu1 %3259, %v1430_v50   ;;  %v555_v61 = vmul.f32 0.01, %v551_v57  ;;  %vm553_vm2 = vcmp.ge.f32.partialorder %v551_v57, 0.0 }
 0x1fd   :  { %1446 = vperm.xlu2 %3257, %v1430_v50   ;;  %v3046_v46 = vor.u32 %v3172_v43, %v3045_v42  ;;  %v3026_v51 = vor.u32 %v3165_v44, %v3023_v47  ;;  %v2991_v42 = vld [vmem:[%s4792_s16 + $0x8] sm:$0xf0] }
 0x1fe   :  { %v556_v55 = vsel %vm552_vm0, %v550_v49, %v554_v52  ;;  %v557_v2 = vsel %vm553_vm2, %v551_v57, %v555_v61  ;;  %v3163_v61 = vld [vmem:[%s4792_s16 + $0x34] sm:$0xf] }
 0x1ff   :  { %2697 = vmatmul.msk.f32.vlgmr.msra.gmra.mxu0 %vm564_vm1, %v556_v55  ;;  %1392 = vmatpush.bf16.msra.mxu2 %v3042_v31  ;;  %v3018_v6 = vor.u32 %v3163_v61, %v3015_v5 }
 0x200   :  { %1254 = vmatpush.bf16.msra.mxu0 %v3156_v53  ;;  %1377 = vmatpush.bf16.msra.mxu1 %v3046_v46 }
 0x203   :  { %1393 = vmatpush.bf16.msra.mxu2 %v3034_v41  ;;  %v3157_v41 = vld [vmem:[%s4792_s16 + $0x4] sm:$0xf] }
 0x204   :  { %1717 = vperm.xlu0 %3254, %v1689_v60   ;;  %1255 = vmatpush.bf16.msra.mxu0 %v3155_v58 }
 0x205   :  { %1475 = vperm.xlu1 %3259, %v1431_v48   ;;  %3258 = vset.pattern.permute.xlu2 %v3924_v17  ;;  %v3151_v17 = vld [vmem:[%s4787_s5 + $0x1d0] sm:$0xff]  ;;  %s3817_s5 = scalar_lea.hbm %s3816_s17, 16 }
 0x206   :  { %1458 = vperm.xlu2 %3258, %v1430_v50   ;;  %p3818_p7 = scmp.ne.s32.totalorder %s3816_s17, %s3817_s5  ;;  %p3821_p9 = scmp.lt.s32.totalorder %s3819_s4, %s3817_s5 }
 0x207   :  { %2698 = vmatmul.msk.f32.gmra.mxu0 %vm564_vm1, %v557_v2  ;;  %1394 = vmatpush.bf16.msra.mxu2 %v3026_v51  ;;  %v3162_v51 = vld [vmem:[%s4792_s16 + $0x24] sm:$0xf0] }
 0x208   :  { %1256 = vmatpush.bf16.msra.mxu0 %v3154_v63  ;;  %p3822_p10 = por %p3821_p9, %p3820_p8 }
 0x20a   :  { %p3823_p11 = pnand %p3822_p10, %p3818_p7 }
 0x20b   :  { %1395 = vmatpush.bf16.msra.mxu2 %v3018_v6 }
 0x20c   :  { %1721 = vperm.xlu0 %3254, %v1690_v7   ;;  %1257 = vmatpush.bf16.msra.mxu0 %v3153_v3 }
 0x20d   :  { %1730 = vperm.xlu1 %3259, %v1689_v60  }
 0x20e   :  { %3260 = vset.pattern.permute.xlu2 %v3923_v1 }
 0x20f   :  { %1451 = vperm.xlu2 %3260, %v1431_v48   ;;  %1206 = vmatmul.bf16.vlgmr.msrb.gmra.mxu0 %v2714_v4  ;;  %v4369_v48 = vld [vmem:[#allocation21] sm:$0x7] }
 0x210   :  { %1258 = vmatpush.bf16.msra.mxu0 %v3152_v8  ;;  %v1724_v54 = vperm.slane %v4369_v48, 1  ;;  %v1713_v57 = vperm.slane %v4369_v48, 0  ;;  %v1737_v0 = vperm.slane %v4369_v48, 2  ;;  %v3267_v8 = vld [vmem:[#allocation8] ss:$0 sm:$0xff] }
 0x214   :  { %1259 = vmatpush.bf16.msra.mxu0 %v3151_v17  ;;  %v3029_v17 = vld [vmem:[%s4792_s16 + $0x50] sm:$0xf] }
 0x215   :  { %1734 = vperm.xlu1 %3259, %v1690_v7  }
 0x217   :  { %1705 = vperm.xlu2 %3260, %v1689_v60   ;;  %v3170_v60 = vld [vmem:[%s4792_s16 + $0x64] sm:$0xf0] }
 0x218   :  { %1260 = vmatpush.bf16.msra.mxu0 %v3150_v9  ;;  %v3038_v3 = vor.u32 %v3170_v60, %v3037_v59 }
 0x21a   :  { %1378 = vmatpush.bf16.msra.mxu1 %v3038_v3 }
 0x21b   :  { %v1165_v55 = vpop.f32.mrf.mxu1 }
 0x21c   :  { %1261 = vmatpush.bf16.msra.mxu0 %v3149_v10  ;;  %v1166_v22 = vadd.f32 %v3267_v8, %v1165_v55  ;;  %v2997_v55 = vld [vmem:[%s4792_s16 + $0x10] sm:$0xf] }
 0x21e   :  { %v1179_v2 = vpop.f32.mrf.mxu2  ;;  %v1193_v11 = vpop.f32.mrf.mxu3 }
 0x21f   :  { %1710 = vperm.xlu2 %3260, %v1690_v7   ;;  %1262 = vmatmul.bf16.vlgmr.msra.gmra.mxu0 %v2730_v13  ;;  %v3161_v13 = vld [vmem:[%s4792_s16 + $0x24] sm:$0xf] }
 0x226   :  { %v1195_v47 = vpop.f32.mrf.mxu3 }
 0x257   :  { %v1447_v16 = vpop.permute.xlu2 %1446 }
 0x258   :  { %v1455_v29 = vmul.f32 %v1454_v21, %v1447_v16  ;;  %v3030_v16 = vor.u32 %v3168_v12, %v3029_v17 }
 0x25a   :  { %1379 = vmatpush.bf16.msra.mxu1 %v3030_v16 }
 0x260   :  { %v1459_v18 = vpop.permute.xlu2 %1458 }
 0x261   :  { %v1466_v24 = vmul.f32 %v1465_v20, %v1459_v18  ;;  %v3010_v18 = vor.u32 %v3161_v13, %v3007_v14 }
 0x263   :  { %v1468_v34 = vadd.f32 %v1466_v24, %v1455_v29  ;;  %1396 = vmatpush.bf16.msra.mxu2 %v3010_v18  ;;  %v3166_v24 = vld [vmem:[%s4792_s16 + $0x44] sm:$0xf0]  ;;  %v2999_v29 = vld [vmem:[%s4792_s16 + $0x18] sm:$0xf0] }
 0x264   :  { %v3022_v28 = vor.u32 %v3166_v24, %v3021_v23 }
 0x266   :  { %1380 = vmatpush.bf16.msra.mxu1 %v3022_v28 }
 0x269   :  { %v1452_v32 = vpop.permute.xlu2 %1451 }
 0x26a   :  { %v1456_v45 = vmul.f32 %v1454_v21, %v1452_v32  ;;  %v1181_v32 = vpop.f32.mrf.mxu2 }
 0x26e   :  { %v1463_v30 = vpop.permute.xlu0 %1462  ;;  %v1472_v33 = vpop.permute.xlu1 %1471 }
 0x26f   :  { %v1479_v35 = vmul.f32 %v1478_v25, %v1472_v33  ;;  %v1467_v40 = vmul.f32 %v1465_v20, %v1463_v30  ;;  %v1167_v20 = vpop.f32.mrf.mxu1  ;;  %v3266_v33 = vld [vmem:[#allocation6] ss:$0 sm:$0xff] }
 0x270   :  { %v1168_v43 = vadd.f32 %v3267_v8, %v1167_v20  ;;  %v1249_v8 = vpop.f32.mrf.mxu3 }
 0x271   :  { %v4359_v36 = vadd.f32 %v1479_v35, %v1468_v34  ;;  %v1469_v52 = vadd.f32 %v1467_v40, %v1456_v45  ;;  %v1706_v56 = vpop.permute.xlu2 %1705  ;;  %v1180_v35 = vadd.f32 %v1179_v2, %v1166_v22  ;;  %v3164_v40 = vld [vmem:[%s4792_s16 + $0x34] sm:$0xf0]  ;;  %v2994_v45 = vor.u32 %v3157_v41, %v2991_v42  ;;  %v1944_v41 = vld [vmem:[%s4793_s18 + $0x50] sm:$0xff]  ;;  %v1943_v42 = vld [vmem:[%s4793_s18 + $0x48] sm:$0xff] }
 0x272   :  { %v1714_v7 = vmul.f32 %v1713_v57, %v1706_v56  ;;  %v3160_v56 = vld [vmem:[%s4792_s16 + $0x14] sm:$0xf0] }
 0x273   :  { %3052 = vmatmul.msk.f32.vlgmr.msra.gmra.mxu3 %vm1483_vm3, %v4359_v36  ;;  %v2998_v61 = vor.u32 %v3160_v56, %v2997_v55  ;;  %v1937_v55 = vld [vmem:[%s4793_s18 + $0x18] sm:$0xff]  ;;  %v1950_v56 = vld [vmem:[%s4793_s18 + $0x80] sm:$0xff] }
 0x274   :  { %2032 = vmatpush.msra.mxu3 %v1933_v37  ;;  %v3013_v37 = vld [vmem:[%s4792_s16 + $0x30] sm:$0xf] }
 0x275   :  { %v3014_v44 = vor.u32 %v3164_v40, %v3013_v37  ;;  %v1957_v37 = vld [vmem:[%s4793_s18 + $0xb8] sm:$0xff]  ;;  %v1955_v40 = vld [vmem:[%s4793_s18 + $0xa8] sm:$0xff] }
 0x276   :  { %v1718_v50 = vpop.permute.xlu0 %1717 }
 0x277   :  { %v1476_v49 = vpop.permute.xlu1 %1475  ;;  %v1725_v62 = vmul.f32 %v1724_v54, %v1718_v50  ;;  %1381 = vmatpush.bf16.msra.mxu1 %v3014_v44  ;;  %v3005_v50 = vld [vmem:[%s4792_s16 + $0x20] sm:$0xf] }
 0x278   :  { %v1480_v53 = vmul.f32 %v1478_v25, %v1476_v49  ;;  %v3159_v25 = vld [vmem:[%s4792_s16 + $0x14] sm:$0xf]  ;;  %v1194_v49 = vadd.f32 %v1193_v11, %v1180_v35  ;;  %v1251_v20 = vpop.f32.mrf.mxu3  ;;  %v1946_v35 = vld [vmem:[%s4793_s18 + $0x60] sm:$0xff] }
 0x279   :  { %v1727_v9 = vadd.f32 %v1725_v62, %v1714_v7  ;;  %v1711_v21 = vpop.permute.xlu2 %1710  ;;  %v3002_v30 = vor.u32 %v3159_v25, %v2999_v29  ;;  %v1235_v62 = vpop.f32.mrf.mxu2  ;;  %v1954_v44 = vld [vmem:[%s4793_s18 + $0xa0] sm:$0xff] }
 0x27a   :  { %v4373_v58 = vadd.f32 %v1480_v53, %v1469_v52  ;;  %v1715_v31 = vmul.f32 %v1713_v57, %v1711_v21  ;;  %v1221_v53 = vpop.f32.mrf.mxu1  ;;  %v1182_v57 = vadd.f32 %v1181_v32, %v1168_v43  ;;  %v1948_v32 = vld [vmem:[%s4793_s18 + $0x70] sm:$0xff] }
 0x27b   :  { %1397 = vmatpush.bf16.msra.mxu2 %v3002_v30 }
 0x27c   :  { %3053 = vmatmul.msk.f32.gmra.mxu3 %vm1483_vm3, %v4373_v58  ;;  %v588_v63 = vpop.f32.mrf.mxu0  ;;  %v1196_v2 = vadd.f32 %v1195_v47, %v1182_v57  ;;  %v1953_v47 = vld [vmem:[%s4793_s18 + $0x98] sm:$0xff]  ;;  %v1936_v57 = vld [vmem:[%s4793_s18 + $0x10] sm:$0xff] }
 0x27d   :  { %v589_v48 = vadd.f32 %v3266_v33, %v588_v63  ;;  %v2989_v63 = vld [vmem:[%s4792_s16] sm:$0xf] }
 0x27e   :  { %v1722_v15 = vpop.permute.xlu0 %1721 }
 0x27f   :  { %v1731_v4 = vpop.permute.xlu1 %1730  ;;  %v1726_v26 = vmul.f32 %v1724_v54, %v1722_v15  ;;  %1398 = vmatpush.bf16.msra.mxu2 %v2994_v45  ;;  %v3006_v54 = vor.u32 %v3162_v51, %v3005_v50  ;;  %v596_v59 = vmul.f32 0.01, %v589_v48  ;;  %vm594_vm4 = vcmp.ge.f32.partialorder %v589_v48, 0.0  ;;  %v1942_v45 = vld [vmem:[%s4793_s18 + $0x40] sm:$0xff]  ;;  %v1939_v51 = vld [vmem:[%s4793_s18 + $0x28] sm:$0xff] }
 0x280   :  { %v1738_v10 = vmul.f32 %v1737_v0, %v1731_v4 }
 0x281   :  { %v1728_v38 = vadd.f32 %v1726_v26, %v1715_v31  ;;  %1382 = vmatpush.bf16.msra.mxu1 %v3006_v54  ;;  %v598_v3 = vsel %vm594_vm4, %v589_v48, %v596_v59  ;;  %v1237_v13 = vpop.f32.mrf.mxu2  ;;  %v1949_v31 = vld [vmem:[%s4793_s18 + $0x78] sm:$0xff]  ;;  %v1951_v54 = vld [vmem:[%s4793_s18 + $0x88] sm:$0xff] }
 0x282   :  { %v4386_v19 = vadd.f32 %v1738_v10, %v1727_v9  ;;  %v1223_v9 = vpop.f32.mrf.mxu1  ;;  %v1941_v48 = vld [vmem:[%s4793_s18 + $0x38] sm:$0xff] }
 0x283   :  { %1995 = vmatpush.msrb.mxu2 %v1957_v37  ;;  %v2086_v59 = vld [vmem:[%s4794_s25 + $0x38] sm:$0xff]  ;;  %v4464_v37 = vld [vmem:[%s4795_s22 + $0x8] sm:$0xff] }
 0x284   :  { %3057 = vmatmul.msk.f32.vlgmr.msrb.gmra.mxu3 %vm1483_vm3, %v4386_v19  ;;  %v591_v27 = vpop.f32.mrf.mxu0 }
 0x285   :  { %v592_v5 = vadd.f32 %v3266_v33, %v591_v27  ;;  %1383 = vmatpush.bf16.msra.mxu1 %v2998_v61  ;;  %v2085_v61 = vld [vmem:[%s4794_s25 + $0x30] sm:$0xff] }
 0x287   :  { %v1735_v34 = vpop.permute.xlu1 %1734  ;;  %v597_v10 = vmul.f32 0.01, %v592_v5  ;;  %vm595_vm6 = vcmp.ge.f32.partialorder %v592_v5, 0.0 }
 0x288   :  { %v1739_v39 = vmul.f32 %v1737_v0, %v1735_v34  ;;  %v3158_v0 = vld [vmem:[%s4792_s16 + $0x4] sm:$0xf0] }
 0x289   :  { %v2990_v7 = vor.u32 %v3158_v0, %v2989_v63  ;;  %v599_v15 = vsel %vm595_vm6, %v592_v5, %v597_v10  ;;  %v1947_v34 = vld [vmem:[%s4793_s18 + $0x68] sm:$0xff]  ;;  %v2083_v0 = vld [vmem:[%s4794_s25 + $0x20] sm:$0xff] }
 0x28a   :  { %v4398_v46 = vadd.f32 %v1739_v39, %v1728_v38  ;;  %v1956_v38 = vld [vmem:[%s4793_s18 + $0xb0] sm:$0xff]  ;;  %v1945_v39 = vld [vmem:[%s4793_s18 + $0x58] sm:$0xff]  ;;  %v2084_v63 = vld [vmem:[%s4794_s25 + $0x28] sm:$0xff] }
 0x28b   :  { %1384 = vmatpush.bf16.msra.mxu1 %v2990_v7  ;;  %1996 = vmatpush.msrb.mxu2 %v1956_v38  ;;  %v2080_v5 = vld [vmem:[%s4794_s25 + $0x8] sm:$0xff] }
 0x28c   :  { %3058 = vmatmul.msk.f32.gmra.mxu3 %vm1483_vm3, %v4398_v46  ;;  %v1207_v52 = vpop.f32.mrf.mxu0  ;;  %v1291_v7 = vld [vmem:[#allocation9] sm:$0x3] }
 0x28d   :  { %v1208_v60 = vadd.f32 %v1207_v52, %v1194_v49  ;;  %1997 = vmatpush.msrb.mxu2 %v1955_v40  ;;  %v1940_v49 = vld [vmem:[%s4793_s18 + $0x30] sm:$0xff]  ;;  %v4467_v38 = vld [vmem:[%s4796_s8 + $0x8] sm:$0xff] }
 0x28e   :  { %v1952_v52 = vld [vmem:[%s4793_s18 + $0x90] sm:$0xff]  ;;  %v4470_v40 = vld [vmem:[%s4797_s19 + $0x8] sm:$0xff] }
 0x28f   :  { %v1222_v6 = vadd.f32 %v1221_v53, %v1208_v60  ;;  %1964 = vmatpush.msrb.mxu1 %v1949_v31  ;;  %1998 = vmatpush.msrb.mxu2 %v1954_v44  ;;  %v1938_v53 = vld [vmem:[%s4793_s18 + $0x20] sm:$0xff]  ;;  %v1935_v60 = vld [vmem:[%s4793_s18 + $0x8] sm:$0xff] }
 0x291   :  { %v1236_v11 = vadd.f32 %v1235_v62, %v1222_v6  ;;  %1965 = vmatpush.msrb.mxu1 %v1948_v32  ;;  %1999 = vmatpush.msrb.mxu2 %v1953_v47  ;;  %v1934_v62 = vld [vmem:[%s4793_s18] sm:$0xff] }
 0x292   :  { %v2079_v6 = vld [vmem:[%s4794_s25] sm:$0xff] }
 0x293   :  { %v1250_v14 = vadd.f32 %v1249_v8, %v1236_v11  ;;  %1966 = vmatpush.msrb.mxu1 %v1947_v34  ;;  %2000 = vmatpush.msrb.mxu2 %v1952_v52 }
 0x294   :  { %3063 = vmatmul.msk.f32.vlgmr.msra.gmra.mxu3 %vm2010_vm5, %v598_v3  ;;  %v1209_v4 = vpop.f32.mrf.mxu0  ;;  %v2081_v3 = vld [vmem:[%s4794_s25 + $0x10] sm:$0xff] }
 0x295   :  { %v1210_v17 = vadd.f32 %v1209_v4, %v1196_v2  ;;  %1967 = vmatpush.msrb.mxu1 %v1946_v35  ;;  %2001 = vmatpush.msrb.mxu2 %v1951_v54  ;;  %v2082_v2 = vld [vmem:[%s4794_s25 + $0x18] sm:$0xff]  ;;  %v1293_v4 = vperm.slane %v1291_v7, 0  ;;  %v509_v35 = vld [vmem:[%s4798_s3] sm:$0xff] }
 0x296   :  { %vm1554_vm13 = vcmp.gt.f32.partialorder %v509_v35, 0.0  ;;  %v4481_v54 = vld [vmem:[%s4800_s26] sm:$0xff] }
 0x297   :  { %v1224_v12 = vadd.f32 %v1223_v9, %v1210_v17  ;;  %1968 = vmatpush.msrb.mxu1 %v1945_v39  ;;  %2002 = vmatpush.msrb.mxu2 %v1950_v56  ;;  %v1294_v17 = vperm.slane %v1291_v7, 1  ;;  %v4484_v56 = vld [vmem:[%s4801_s13] sm:$0xff] }
 0x299   :  { %v1238_v18 = vadd.f32 %v1237_v13, %v1224_v12  ;;  %1969 = vmatpush.msrb.mxu1 %v1944_v41 }
 0x29b   :  { %v1252_v22 = vadd.f32 %v1251_v20, %v1238_v18  ;;  %1970 = vmatpush.msrb.mxu1 %v1943_v42 }
 0x29c   :  { %3064 = vmatmul.msk.f32.gmra.mxu3 %vm2010_vm5, %v599_v15  ;;  %v1263_v16 = vpop.f32.mrf.mxu0 }
 0x29d   :  { %v1264_v21 = vadd.f32 %v1263_v16, %v1250_v14  ;;  %1971 = vmatpush.msrb.mxu1 %v1942_v45 }
 0x29f   :  { %v1270_v23 = vmul.f32 0.01, %v1264_v21  ;;  %vm1268_vm7 = vcmp.ge.f32.partialorder %v1264_v21, 0.0  ;;  %1972 = vmatpush.msrb.mxu1 %v1941_v48 }
 0x2a1   :  { %v1272_v26 = vsel %vm1268_vm7, %v1264_v21, %v1270_v23  ;;  %1973 = vmatpush.msrb.mxu1 %v1940_v49 }
 0x2a3   :  { %1974 = vmatpush.msrb.mxu1 %v1939_v51 }
 0x2a4   :  { %v1265_v24 = vpop.f32.mrf.mxu0 }
 0x2a5   :  { %v1266_v25 = vadd.f32 %v1265_v24, %v1252_v22  ;;  %1975 = vmatpush.msrb.mxu1 %v1938_v53  ;;  %v4478_v53 = vld [vmem:[%s4799_s23] sm:$0xff] }
 0x2a7   :  { %vm1269_vm8 = vcmp.ge.f32.partialorder %v1266_v25, 0.0  ;;  %v1271_v27 = vmul.f32 0.01, %v1266_v25  ;;  %1976 = vmatpush.msrb.mxu1 %v1937_v55 }
 0x2a9   :  { %v1273_v28 = vsel %vm1269_vm8, %v1266_v25, %v1271_v27  ;;  %1977 = vmatpush.msrb.mxu1 %v1936_v57  ;;  %v4454_v27 = vld [vmem:[%s4796_s8] sm:$0xff] }
 0x2aa   :  { %v1274_v29 = vpack.c.bf16 %v1273_v28, %v1272_v26  ;;  %v4451_v26 = vld [vmem:[%s4795_s22] sm:$0xff] }
 0x2ab   :  { %1978 = vmatpush.msrb.mxu1 %v1935_v60  ;;  %v4457_v28 = vld [vmem:[%s4797_s19] sm:$0xff] }
 0x2ac   :  { %1399 = vmatmul.bf16.vlgmr.msra.gmra.mxu2 %v1274_v29  ;;  %1385 = vmatmul.bf16.vlgmr.msra.gmra.mxu1 %v1274_v29 }
 0x2ad   :  { %2095 = vmatpush.msra.mxu2 %v2086_v59  ;;  %1979 = vmatpush.msrb.mxu1 %v1934_v62 }
 0x2af   :  { %2096 = vmatpush.msra.mxu2 %v2085_v61 }
 0x2b1   :  { %2097 = vmatpush.msra.mxu2 %v2084_v63 }
 0x2b3   :  { %2098 = vmatpush.msra.mxu2 %v2083_v0 }
 0x2b5   :  { %2099 = vmatpush.msra.mxu2 %v2082_v2 }
 0x2b7   :  { %2100 = vmatpush.msra.mxu2 %v2081_v3  ;;  %v517_v3 = vld [vmem:[%s4802_s1] sm:$0xff] }
 0x2b8   :  { %vm1812_vm0 = vcmp.gt.f32.partialorder %v517_v3, 0.0 }
 0x2b9   :  { %2101 = vmatpush.msra.mxu2 %v2080_v5 }
 0x2bb   :  { %2102 = vmatpush.msra.mxu2 %v2079_v6  ;;  %v4492_v6 = vld [vmem:[%s4799_s23 + $0x8] sm:$0xff] }
 0x2f6   :  { %v1510_v30 = vpop.f32.mrf.mxu3 }
 0x2f7   :  { %1541 = vperm.xlu1 %3259, %v1510_v30   ;;  %1529 = vperm.xlu0 %3254, %v1510_v30  }
 0x2f8   :  { %1518 = vperm.xlu2 %3260, %v1510_v30  }
 0x2ff   :  { %v1513_v33 = vpop.f32.mrf.mxu3 }
 0x300   :  { %1545 = vperm.xlu1 %3259, %v1513_v33   ;;  %1533 = vperm.xlu0 %3254, %v1513_v33  }
 0x301   :  { %1523 = vperm.xlu2 %3260, %v1513_v33  }
 0x307   :  { %v1768_v43 = vpop.f32.mrf.mxu3 }
 0x308   :  { %1799 = vperm.xlu1 %3259, %v1768_v43   ;;  %1787 = vperm.xlu0 %3254, %v1768_v43  }
 0x309   :  { %1776 = vperm.xlu2 %3260, %v1768_v43  }
 0x30f   :  { %v1771_v50 = vpop.f32.mrf.mxu3 }
 0x310   :  { %1803 = vperm.xlu1 %3259, %v1771_v50   ;;  %1791 = vperm.xlu0 %3254, %v1771_v50  }
 0x311   :  { %1781 = vperm.xlu2 %3260, %v1771_v50   ;;  %v510_v50 = vld [vmem:[%s4798_s3 + $0x8] sm:$0xff] }
 0x312   :  { %vm1555_vm15 = vcmp.gt.f32.partialorder %v510_v50, 0.0 }
 0x318   :  { %3261 = vset.pattern.permute.xlu1 %v3923_v1  ;;  %3262 = vset.pattern.permute.xlu0 %v3923_v1 }
 0x329   :  { %v1386_v8 = vpop.f32.mrf.mxu1 }
 0x32a   :  { %v1387_v1 = vadd.f32 %v1386_v8, %v1293_v4 }
 0x32c   :  { %vm1405_vm9 = vcmp.ge.f32.partialorder %v1387_v1, 0.0  ;;  %v1409_v9 = vmul.f32 0.01, %v1387_v1 }
 0x32e   :  { %v1413_v10 = vsel %vm1405_vm9, %v1387_v1, %v1409_v9  ;;  %v4498_v1 = vld [vmem:[%s4801_s13 + $0x8] sm:$0xff] }
 0x32f   :  { %v1400_v11 = vpop.f32.mrf.mxu2  ;;  %1980 = vmatmul.f32.vlgmr.msrb.gmra.mxu1 %v1413_v10 }
 0x330   :  { %v1401_v12 = vadd.f32 %v1400_v11, %v1294_v17 }
 0x331   :  { %v1388_v13 = vpop.f32.mrf.mxu1 }
 0x332   :  { %vm1406_vm10 = vcmp.ge.f32.partialorder %v1401_v12, 0.0  ;;  %v1410_v14 = vmul.f32 0.01, %v1401_v12  ;;  %v1389_v15 = vadd.f32 %v1388_v13, %v1293_v4  ;;  %v4495_v4 = vld [vmem:[%s4800_s26 + $0x8] sm:$0xff] }
 0x334   :  { %v1414_v16 = vsel %vm1406_vm10, %v1401_v12, %v1410_v14  ;;  %vm1407_vm11 = vcmp.ge.f32.partialorder %v1389_v15, 0.0  ;;  %v1411_v18 = vmul.f32 0.01, %v1389_v15 }
 0x335   :  { %3061 = vmatmul.msk.f32.vlgmr.msrb.gmra.mxu2 %vm1483_vm3, %v1414_v16  ;;  %v518_v16 = vld [vmem:[%s4802_s1 + $0x8] sm:$0xff] }
 0x336   :  { %v1415_v20 = vsel %vm1407_vm11, %v1389_v15, %v1411_v18  ;;  %vm1813_vm1 = vcmp.gt.f32.partialorder %v518_v16, 0.0 }
 0x337   :  { %v1402_v21 = vpop.f32.mrf.mxu2  ;;  %1983 = vmatmul.f32.gmra.mxu1 %v1415_v20 }
 0x338   :  { %v1403_v22 = vadd.f32 %v1402_v21, %v1294_v17 }
 0x33a   :  { %v1412_v23 = vmul.f32 0.01, %v1403_v22  ;;  %vm1408_vm12 = vcmp.ge.f32.partialorder %v1403_v22, 0.0 }
 0x33c   :  { %v1416_v24 = vsel %vm1408_vm12, %v1403_v22, %v1412_v23 }
 0x33d   :  { %3062 = vmatmul.msk.f32.gmra.mxu2 %vm1483_vm3, %v1416_v24 }
 0x345   :  { %3067 = vmatmul.msk.f32.vlgmr.msra.gmra.mxu2 %vm1483_vm3, %v4359_v36 }
 0x34d   :  { %3068 = vmatmul.msk.f32.gmra.mxu2 %vm1483_vm3, %v4373_v58 }
 0x352   :  { %v1519_v25 = vpop.permute.xlu2 %1518 }
 0x353   :  { %v1526_v31 = vmul.f32 %v1519_v25, %v4451_v26 }
 0x35b   :  { %v1524_v33 = vpop.permute.xlu2 %1523 }
 0x35c   :  { %v1527_v43 = vmul.f32 %v1524_v33, %v4464_v37 }
 0x363   :  { %v1777_v51 = vpop.permute.xlu2 %1776 }
 0x364   :  { %v1784_v60 = vmul.f32 %v1777_v51, %v4478_v53 }
 0x369   :  { %v1542_v29 = vpop.permute.xlu1 %1541  ;;  %v1530_v30 = vpop.permute.xlu0 %1529 }
 0x36a   :  { %v1536_v32 = vmul.f32 %v1530_v30, %v4454_v27  ;;  %v1548_v36 = vmul.f32 %v1542_v29, %v4457_v28 }
 0x36b   :  { %v1782_v7 = vpop.permute.xlu2 %1781 }
 0x36c   :  { %v1538_v34 = vadd.f32 %v1536_v32, %v1526_v31  ;;  %v1785_v10 = vmul.f32 %v1782_v7, %v4492_v6  ;;  %v1441_v7 = vld [vmem:[%s4803_s28 + $0x30] sm:$0xff] }
 0x36e   :  { %v1550_v58 = vadd.f32 %v1548_v36, %v1538_v34 }
 0x370   :  { %v1552_v39 = vmul.f32 0.125, %v1550_v58 }
 0x372   :  { %v1546_v41 = vpop.permute.xlu1 %1545  ;;  %v1534_v42 = vpop.permute.xlu0 %1533  ;;  %v1556_v45 = vsel %vm1554_vm13, %v1552_v39, -1e+09 }
 0x373   :  { %v1537_v44 = vmul.f32 %v1534_v42, %v4467_v38  ;;  %v1559_v47 = vsel %vm1558_vm14, %v1556_v45, -inf  ;;  %v1549_v48 = vmul.f32 %v1546_v41, %v4470_v40 }
 0x374   :  { %1560 = vmax.xlane.f32.xlu2 %v1559_v47 }
 0x375   :  { %v1539_v49 = vadd.f32 %v1537_v44, %v1527_v43 }
 0x377   :  { %v1551_v52 = vadd.f32 %v1549_v48, %v1539_v49 }
 0x379   :  { %v1553_v55 = vmul.f32 0.125, %v1551_v52 }
 0x37a   :  { %v1800_v57 = vpop.permute.xlu1 %1799  ;;  %v1788_v59 = vpop.permute.xlu0 %1787 }
 0x37b   :  { %v1794_v61 = vmul.f32 %v1788_v59, %v4481_v54  ;;  %v1557_v62 = vsel %vm1555_vm15, %v1553_v55, -1e+09  ;;  %v1806_v0 = vmul.f32 %v1800_v57, %v4484_v56 }
 0x37c   :  { %v1562_v63 = vsel %vm1558_vm14, %v1557_v62, -inf }
 0x37d   :  { %v1796_v2 = vadd.f32 %v1794_v61, %v1784_v60  ;;  %1563 = vmax.xlane.f32.xlu0 %v1562_v63 }
 0x37f   :  { %v1808_v5 = vadd.f32 %v1806_v0, %v1796_v2 }
 0x381   :  { %v1810_v8 = vmul.f32 0.125, %v1808_v5  ;;  %v1442_v5 = vld [vmem:[%s4803_s28 + $0x38] sm:$0xff] }
 0x382   :  { %v1804_v17 = vpop.permute.xlu1 %1803  ;;  %v1792_v9 = vpop.permute.xlu0 %1791  ;;  %1661 = vmatpush.msrb.mxu0 %v1442_v5 }
 0x383   :  { %v1795_v11 = vmul.f32 %v1792_v9, %v4495_v4  ;;  %v1814_v12 = vsel %vm1812_vm0, %v1810_v8, -1e+09  ;;  %v1807_v14 = vmul.f32 %v1804_v17, %v4498_v1 }
 0x384   :  { %v1816_v13 = vsel %vm1558_vm14, %v1814_v12, -inf  ;;  %1662 = vmatpush.msrb.mxu0 %v1441_v7 }
 0x385   :  { %v1797_v15 = vadd.f32 %v1795_v11, %v1785_v10  ;;  %1817 = vmax.xlane.f32.xlu1 %v1816_v13  ;;  %v1440_v10 = vld [vmem:[%s4803_s28 + $0x28] sm:$0xff] }
 0x386   :  { %1663 = vmatpush.msrb.mxu0 %v1440_v10 }
 0x387   :  { %v1809_v18 = vadd.f32 %v1807_v14, %v1797_v15 }
 0x389   :  { %v1811_v20 = vmul.f32 0.125, %v1809_v18 }
 0x38b   :  { %v1815_v21 = vsel %vm1813_vm1, %v1811_v20, -1e+09  ;;  %v1439_v20 = vld [vmem:[%s4803_s28 + $0x20] sm:$0xff] }
 0x38c   :  { %v1819_v22 = vsel %vm1558_vm14, %v1815_v21, -inf  ;;  %1664 = vmatpush.msrb.mxu0 %v1439_v20  ;;  %v1434_v20 = vld [vmem:[#allocation18] sm:$0x7] }
 0x38d   :  { %1820 = vmax.xlane.f32.xlu2 %v1819_v22  ;;  %v1631_v22 = vperm.slane %v1434_v20, 0 }
 0x3e7   :  { %v1561_v23 = vpop.xlane.xlu2 %1560 }
 0x3e8   :  { %v1565_v24 = vsub.f32 %v1556_v45, %v1561_v23 }
 0x3ea   :  { %v1567_v25 = vmul.f32 1.442695, %v1565_v24 }
 0x3ec   :  { %3275 = vpow2.f32 %v1567_v25 }
 0x3f0   :  { %v1564_v29 = vpop.xlane.xlu0 %1563 }
 0x3f1   :  { %v1566_v30 = vsub.f32 %v1557_v62, %v1564_v29 }
 0x3f2   :  { %v3276_v31 = vpop.eup %3275 }
 0x3f3   :  { %v1569_v32 = vmul.f32 1.442695, %v1566_v30  ;;  %v1571_v33 = vsel %vm1558_vm14, %v3276_v31, 0.0  ;;  %v1438_v30 = vld [vmem:[%s4803_s28 + $0x18] sm:$0xff] }
 0x3f4   :  { %1572 = vadd.xlane.f32.xlu2 %v1571_v33  ;;  %1665 = vmatpush.msrb.mxu0 %v1438_v30 }
 0x3f5   :  { %3277 = vpow2.f32 %v1569_v32 }
 0x3f8   :  { %v1818_v36 = vpop.xlane.xlu1 %1817 }
 0x3f9   :  { %v1822_v34 = vsub.f32 %v1814_v12, %v1818_v36 }
 0x3fb   :  { %v4507_v35 = vpop.eup %3277  ;;  %v1824_v58 = vmul.f32 1.442695, %v1822_v34 }
 0x3fc   :  { %v1574_v39 = vsel %vm1558_vm14, %v4507_v35, 0.0 }
 0x3fd   :  { %3279 = vpow2.f32 %v1824_v58  ;;  %1575 = vadd.xlane.f32.xlu0 %v1574_v39 }
 0x400   :  { %v1821_v41 = vpop.xlane.xlu2 %1820 }
 0x401   :  { %v1823_v42 = vsub.f32 %v1815_v21, %v1821_v41 }
 0x403   :  { %v4511_v43 = vpop.eup %3279  ;;  %v1826_v44 = vmul.f32 1.442695, %v1823_v42 }
 0x404   :  { %v1828_v45 = vsel %vm1558_vm14, %v4511_v43, 0.0 }
 0x405   :  { %3281 = vpow2.f32 %v1826_v44  ;;  %1829 = vadd.xlane.f32.xlu1 %v1828_v45 }
 0x40b   :  { %v4515_v47 = vpop.eup %3281 }
 0x40c   :  { %v1831_v48 = vsel %vm1558_vm14, %v4515_v47, 0.0 }
 0x40d   :  { %1832 = vadd.xlane.f32.xlu2 %v1831_v48 }
 0x467   :  { %v1573_v49 = vpop.xlane.xlu2 %1572 }
 0x468   :  { %3283 = vrcp.f32 %v1573_v49  ;;  %v1588_v59 = vand.u32 2147483648, %v1573_v49  ;;  %v1586_v60 = vand.u32 2147483647, %v1573_v49  ;;  %vm1582_vm4 = vweird.f32 %v1573_v49 }
 0x46a   :  { %v1589_v63 = vor.u32 1.1754944e-38, %v1588_v59  ;;  %vm1587_vm6 = vcmp.eq.f32.partialorder %v1586_v60, 8.507059e+37 }
 0x46e   :  { %v3284_v50 = vpop.eup %3283 }
 0x46f   :  { %v1578_v51 = vmul.f32 %v3284_v50, %v1573_v49  ;;  %vm1583_vm2 = vweird.f32 %v3284_v50 }
 0x470   :  { %v1576_v52 = vpop.xlane.xlu0 %1575  ;;  %vm1584_vm5 = vmor %vm1582_vm4, %vm1583_vm2 }
 0x471   :  { %3285 = vrcp.f32 %v1576_v52  ;;  %v1579_v55 = vsub.f32 1.0, %v1578_v51  ;;  %v1603_v12 = vand.u32 2147483648, %v1576_v52  ;;  %v1601_v13 = vand.u32 2147483647, %v1576_v52 }
 0x472   :  { %vm1597_vm8 = vweird.f32 %v1576_v52 }
 0x473   :  { %v1580_v57 = vmul.f32 %v3284_v50, %v1579_v55  ;;  %v1604_v25 = vor.u32 1.1754944e-38, %v1603_v12  ;;  %vm1602_vm10 = vcmp.eq.f32.partialorder %v1601_v13, 8.507059e+37  ;;  %v1699_v12 = vld [vmem:[%s4806_s24 + $0x28] sm:$0xff]  ;;  %v1698_v13 = vld [vmem:[%s4806_s24 + $0x20] sm:$0xff] }
 0x475   :  { %v1581_v61 = vadd.f32 %v3284_v50, %v1580_v57 }
 0x477   :  { %v3286_v62 = vpop.eup %3285  ;;  %v1585_v3 = vsel %vm1584_vm5, %v3284_v50, %v1581_v61 }
 0x478   :  { %v1593_v0 = vmul.f32 %v3286_v62, %v1576_v52  ;;  %v1830_v2 = vpop.xlane.xlu1 %1829  ;;  %v1590_v17 = vsel %vm1587_vm6, %v1589_v63, %v1585_v3  ;;  %vm1598_vm7 = vweird.f32 %v3286_v62 }
 0x479   :  { %3287 = vrcp.f32 %v1830_v2  ;;  %v1591_v9 = vmul.f32 %v3276_v31, %v1590_v17  ;;  %vm4526_vm9 = vmor %vm1597_vm8, %vm1598_vm7  ;;  %v1845_v33 = vand.u32 2147483648, %v1830_v2  ;;  %v1843_v58 = vand.u32 2147483647, %v1830_v2 }
 0x47a   :  { %v1594_v8 = vsub.f32 1.0, %v1593_v0  ;;  %vm1839_vm12 = vweird.f32 %v1830_v2 }
 0x47b   :  { %v1623_v14 = vmul.f32 %v1591_v9, %v4457_v28  ;;  %v1615_v15 = vmul.f32 %v1591_v9, %v4454_v27  ;;  %v1607_v16 = vmul.f32 %v1591_v9, %v4451_v26  ;;  %v1846_v48 = vor.u32 1.1754944e-38, %v1845_v33 }
 0x47c   :  { %v1595_v11 = vmul.f32 %v3286_v62, %v1594_v8  ;;  %vm1844_vm15 = vcmp.eq.f32.partialorder %v1843_v58, 8.507059e+37 }
 0x47d   :  { %v1625_v23 = vsel %vm1558_vm14, %v1623_v14, 0.0  ;;  %v1617_v24 = vsel %vm1558_vm14, %v1615_v15, 0.0  ;;  %v1609_v28 = vsel %vm1558_vm14, %v1607_v16, 0.0  ;;  %v1697_v14 = vld [vmem:[%s4806_s24 + $0x18] sm:$0xff]  ;;  %v1696_v15 = vld [vmem:[%s4806_s24 + $0x10] sm:$0xff]  ;;  %v1695_v16 = vld [vmem:[%s4806_s24 + $0x8] sm:$0xff] }
 0x47e   :  { %v1596_v18 = vadd.f32 %v3286_v62, %v1595_v11  ;;  %1626 = vadd.xlane.f32.xlu2 %v1625_v23  ;;  %1618 = vadd.xlane.f32.xlu1 %v1617_v24  ;;  %v1700_v11 = vld [vmem:[%s4806_s24 + $0x30] sm:$0xff]  ;;  %v1639_v24 = vperm.slane %v1434_v20, 2 }
 0x47f   :  { %v3288_v21 = vpop.eup %3287  ;;  %1610 = vadd.xlane.f32.xlu0 %v1609_v28 }
 0x480   :  { %v1835_v27 = vmul.f32 %v3288_v21, %v1830_v2  ;;  %v1833_v26 = vpop.xlane.xlu2 %1832  ;;  %v1600_v29 = vsel %vm4526_vm9, %v3286_v62, %v1596_v18  ;;  %vm1840_vm11 = vweird.f32 %v3288_v21  ;;  %v1694_v18 = vld [vmem:[%s4806_s24] sm:$0xff] }
 0x481   :  { %3289 = vrcp.f32 %v1833_v26  ;;  %v1605_v32 = vsel %vm1602_vm10, %v1604_v25, %v1600_v29  ;;  %vm1841_vm13 = vmor %vm1839_vm12, %vm1840_vm11  ;;  %v1858_v55 = vand.u32 2147483647, %v1833_v26  ;;  %v1860_v57 = vand.u32 2147483648, %v1833_v26 }
 0x482   :  { %v1836_v31 = vsub.f32 1.0, %v1835_v27  ;;  %v1606_v36 = vmul.f32 %v4507_v35, %v1605_v32  ;;  %vm1854_vm1 = vweird.f32 %v1833_v26  ;;  %v2047_v32 = vld [vmem:[%s4807_s2 + $0x38] sm:$0xff]  ;;  %vm2376_vm10 = vcmask 261120  }
 0x483   :  { %vm1859_vm4 = vcmp.eq.f32.partialorder %v1858_v55, 8.507059e+37  ;;  %v2042_v55 = vld [vmem:[%s4807_s2 + $0x10] sm:$0xff] }
 0x484   :  { %v1837_v34 = vmul.f32 %v3288_v21, %v1836_v31  ;;  %v1624_v39 = vmul.f32 %v1606_v36, %v4470_v40  ;;  %v1616_v41 = vmul.f32 %v1606_v36, %v4467_v38  ;;  %v1608_v42 = vmul.f32 %v1606_v36, %v4464_v37 }
 0x486   :  { %v1838_v44 = vadd.f32 %v3288_v21, %v1837_v34  ;;  %v1628_v49 = vsel %vm1558_vm14, %v1624_v39, 0.0  ;;  %v1620_v50 = vsel %vm1558_vm14, %v1616_v41, 0.0  ;;  %v1612_v35 = vsel %vm1558_vm14, %v1608_v42, 0.0  ;;  %v2046_v34 = vld [vmem:[%s4807_s2 + $0x30] sm:$0xff]  ;;  %v1693_v42 = vld [vmem:[#allocation24] sm:$0x7] }
 0x487   :  { %v3290_v45 = vpop.eup %3289  ;;  %1629 = vadd.xlane.f32.xlu2 %v1628_v49  ;;  %1621 = vadd.xlane.f32.xlu1 %v1620_v50  ;;  %v2044_v49 = vld [vmem:[%s4807_s2 + $0x20] sm:$0xff]  ;;  %v1891_v50 = vperm.slane %v1693_v42, 1 }
 0x488   :  { %v1850_v51 = vmul.f32 %v3290_v45, %v1833_v26  ;;  %v1842_v40 = vsel %vm1841_vm13, %v3288_v21, %v1838_v44  ;;  %1613 = vadd.xlane.f32.xlu0 %v1612_v35  ;;  %vm1855_vm0 = vweird.f32 %v3290_v45  ;;  %v1634_v21 = vperm.slane %v1434_v20, 1  ;;  %v2045_v44 = vld [vmem:[%s4807_s2 + $0x28] sm:$0xff]  ;;  %v2112_v20 = vld [vmem:[#allocation29] sm:$0xff] }
 0x489   :  { %v1847_v38 = vsel %vm1844_vm15, %v1846_v48, %v1842_v40  ;;  %vm1856_vm2 = vmor %vm1854_vm1, %vm1855_vm0  ;;  %v2043_v40 = vld [vmem:[%s4807_s2 + $0x18] sm:$0xff]  ;;  %vm2408_vm15 = vcmask 293888  }
 0x48a   :  { %v1851_v52 = vsub.f32 1.0, %v1850_v51  ;;  %v1848_v37 = vmul.f32 %v4511_v43, %v1847_v38  ;;  %v1861_v43 = vor.u32 1.1754944e-38, %v1860_v57  ;;  %v1888_v51 = vperm.slane %v1693_v42, 0 }
 0x48b   :  { %v1896_v38 = vperm.slane %v1693_v42, 2  ;;  %v2203_v42 = vld [vmem:[%s4808_s29 + $0x38] sm:$0xff] }
 0x48c   :  { %v1852_v59 = vmul.f32 %v3290_v45, %v1851_v52  ;;  %v1880_v60 = vmul.f32 %v1848_v37, %v4484_v56  ;;  %v1872_v61 = vmul.f32 %v1848_v37, %v4481_v54  ;;  %v1864_v62 = vmul.f32 %v1848_v37, %v4478_v53 }
 0x48e   :  { %v1853_v63 = vadd.f32 %v3290_v45, %v1852_v59  ;;  %v1882_v0 = vsel %vm1558_vm14, %v1880_v60, 0.0  ;;  %v1874_v2 = vsel %vm1558_vm14, %v1872_v61, 0.0  ;;  %v1866_v3 = vsel %vm1558_vm14, %v1864_v62, 0.0 }
 0x48f   :  { %1883 = vadd.xlane.f32.xlu2 %v1882_v0  ;;  %1875 = vadd.xlane.f32.xlu1 %v1874_v2 }
 0x490   :  { %v1857_v56 = vsel %vm1856_vm2, %v3290_v45, %v1853_v63  ;;  %1867 = vadd.xlane.f32.xlu0 %v1866_v3 }
 0x491   :  { %v1862_v54 = vsel %vm1859_vm4, %v1861_v43, %v1857_v56 }
 0x492   :  { %v1863_v53 = vmul.f32 %v4515_v47, %v1862_v54  ;;  %v1437_v47 = vld [vmem:[%s4803_s28 + $0x10] sm:$0xff] }
 0x493   :  { %1666 = vmatpush.msrb.mxu0 %v1437_v47  ;;  %v2157_v47 = vld [vmem:[#allocation30 + $0x30] sm:$0xff] }
 0x494   :  { %v1881_v5 = vmul.f32 %v1863_v53, %v4498_v1  ;;  %v1873_v7 = vmul.f32 %v1863_v53, %v4495_v4  ;;  %v1865_v8 = vmul.f32 %v1863_v53, %v4492_v6  ;;  %v1436_v1 = vld [vmem:[%s4803_s28 + $0x8] sm:$0xff]  ;;  %v1435_v4 = vld [vmem:[%s4803_s28] sm:$0xff]  ;;  %v1701_v6 = vld [vmem:[%s4806_s24 + $0x38] sm:$0xff] }
 0x495   :  { %1667 = vmatpush.msrb.mxu0 %v1436_v1  ;;  %v2117_v1 = vld [vmem:[#allocation29 + $0x28] sm:$0xff] }
 0x496   :  { %v1885_v17 = vsel %vm1558_vm14, %v1881_v5, 0.0  ;;  %v1877_v9 = vsel %vm1558_vm14, %v1873_v7, 0.0  ;;  %v1869_v10 = vsel %vm1558_vm14, %v1865_v8, 0.0  ;;  %v2041_v7 = vld [vmem:[%s4807_s2 + $0x8] sm:$0xff]  ;;  %v2040_v8 = vld [vmem:[%s4807_s2] sm:$0xff] }
 0x497   :  { %1886 = vadd.xlane.f32.xlu2 %v1885_v17  ;;  %1878 = vadd.xlane.f32.xlu1 %v1877_v9  ;;  %v2119_v17 = vld [vmem:[#allocation29 + $0x38] sm:$0xff] }
 0x498   :  { %1870 = vadd.xlane.f32.xlu0 %v1869_v10  ;;  %1668 = vmatpush.msrb.mxu0 %v1435_v4  ;;  %v2158_v9 = vld [vmem:[#allocation30 + $0x38] sm:$0xff]  ;;  %v2118_v10 = vld [vmem:[#allocation29 + $0x30] sm:$0xff]  ;;  %v2156_v4 = vld [vmem:[#allocation30 + $0x28] sm:$0xff] }
 0x499   :  { %2134 = vmatpush.msrb.mxu3 %v2119_v17  ;;  %v2489_v17 = vld [vmem:[%s4810_s12 + $0x50] sm:$0xff] }
 0x49a   :  { %1918 = vmatpush.msra.mxu0 %v1701_v6  ;;  %v2116_v6 = vld [vmem:[#allocation29 + $0x20] sm:$0xff] }
 0x49b   :  { %2135 = vmatpush.msrb.mxu3 %v2118_v10 }
 0x49c   :  { %1919 = vmatpush.msra.mxu0 %v1700_v11  ;;  %v2155_v11 = vld [vmem:[#allocation30 + $0x20] sm:$0xff] }
 0x49d   :  { %2136 = vmatpush.msrb.mxu3 %v2117_v1  ;;  %v2291_v1 = vld [vmem:[%s4809_s6 + $0x48] sm:$0xff] }
 0x49e   :  { %1920 = vmatpush.msra.mxu0 %v1699_v12  ;;  %v2115_v12 = vld [vmem:[#allocation29 + $0x18] sm:$0xff] }
 0x49f   :  { %2137 = vmatpush.msrb.mxu3 %v2116_v6 }
 0x4a0   :  { %1921 = vmatpush.msra.mxu0 %v1698_v13  ;;  %v2154_v13 = vld [vmem:[#allocation30 + $0x18] sm:$0xff] }
 0x4a1   :  { %2138 = vmatpush.msrb.mxu3 %v2115_v12  ;;  %v2487_v12 = vld [vmem:[%s4810_s12 + $0x40] sm:$0xff] }
 0x4a2   :  { %1922 = vmatpush.msra.mxu0 %v1697_v14  ;;  %v2114_v14 = vld [vmem:[#allocation29 + $0x10] sm:$0xff] }
 0x4a3   :  { %2139 = vmatpush.msrb.mxu3 %v2114_v14 }
 0x4a4   :  { %1923 = vmatpush.msra.mxu0 %v1696_v15  ;;  %v2153_v15 = vld [vmem:[#allocation30 + $0x10] sm:$0xff] }
 0x4a6   :  { %1924 = vmatpush.msra.mxu0 %v1695_v16  ;;  %v2113_v16 = vld [vmem:[#allocation29 + $0x8] sm:$0xff] }
 0x4a7   :  { %2140 = vmatpush.msrb.mxu3 %v2113_v16  ;;  %v2289_v16 = vld [vmem:[%s4809_s6 + $0x38] sm:$0xff] }
 0x4a8   :  { %1925 = vmatpush.msra.mxu0 %v1694_v18  ;;  %v2152_v18 = vld [vmem:[#allocation30 + $0x8] sm:$0xff] }
 0x4a9   :  { %2141 = vmatpush.msrb.mxu3 %v2112_v20 }
 0x4f1   :  { %v1619_v23 = vpop.xlane.xlu1 %1618  ;;  %v1627_v28 = vpop.xlane.xlu2 %1626 }
 0x4f2   :  { %v1635_v25 = vmul.f32 %v1634_v21, %v1619_v23  ;;  %v1611_v27 = vpop.xlane.xlu0 %1610  ;;  %v1640_v29 = vmul.f32 %v1639_v24, %v1627_v28 }
 0x4f3   :  { %v1632_v26 = vmul.f32 %v1631_v22, %v1611_v27  ;;  %v3269_v27 = vld [vmem:[#allocation26] ss:$0 sm:$0xff] }
 0x4f5   :  { %v1637_v30 = vadd.f32 %v1635_v25, %v1632_v26 }
 0x4f7   :  { %v1642_v31 = vadd.f32 %v1640_v29, %v1637_v30 }
 0x4f9   :  { %3054 = vmatmul.msk.f32.vlgmr.msrb.gmra.mxu0 %vm1483_vm3, %v1642_v31 }
 0x4fa   :  { %v1630_v33 = vpop.xlane.xlu2 %1629  ;;  %v1622_v36 = vpop.xlane.xlu1 %1621  ;;  %2062 = vmatpush.msrb.mxu0 %v2047_v32  ;;  %v2210_v32 = vld [vmem:[%s4808_s29 + $0x70] sm:$0xff] }
 0x4fb   :  { %v1636_v58 = vmul.f32 %v1634_v21, %v1622_v36  ;;  %v1614_v39 = vpop.xlane.xlu0 %1613  ;;  %v1641_v45 = vmul.f32 %v1639_v24, %v1630_v33  ;;  %v2151_v21 = vld [vmem:[#allocation30] sm:$0xff]  ;;  %v2208_v36 = vld [vmem:[%s4808_s29 + $0x60] sm:$0xff]  ;;  %2232 = vmatpush.msra.mxu1 %v2210_v32 }
 0x4fc   :  { %v1633_v41 = vmul.f32 %v1631_v22, %v1614_v39  ;;  %2063 = vmatpush.msrb.mxu0 %v2046_v34  ;;  %v3268_v22 = vld [vmem:[#allocation20] ss:$0 sm:$0xff]  ;;  %v2209_v34 = vld [vmem:[%s4808_s29 + $0x68] sm:$0xff]  ;;  %v2204_v39 = vld [vmem:[%s4808_s29 + $0x40] sm:$0xff] }
 0x4fd   :  { %v2211_v33 = vld [vmem:[%s4808_s29 + $0x78] sm:$0xff]  ;;  %2233 = vmatpush.msra.mxu1 %v2208_v36  ;;  %v2483_v32 = vld [vmem:[%s4810_s12 + $0x20] sm:$0xff] }
 0x4fe   :  { %v1638_v48 = vadd.f32 %v1636_v58, %v1633_v41  ;;  %2064 = vmatpush.msrb.mxu0 %v2045_v44  ;;  %2255 = vmatpush.msrb.mxu2 %v2211_v33  ;;  %v2207_v58 = vld [vmem:[%s4808_s29 + $0x58] sm:$0xff]  ;;  %v2202_v41 = vld [vmem:[%s4808_s29 + $0x30] sm:$0xff]  ;;  %v2200_v44 = vld [vmem:[%s4808_s29 + $0x20] sm:$0xff] }
 0x500   :  { %v1643_v35 = vadd.f32 %v1641_v45, %v1638_v48  ;;  %2065 = vmatpush.msrb.mxu0 %v2044_v49  ;;  %2256 = vmatpush.msrb.mxu2 %v2209_v34  ;;  %v2201_v45 = vld [vmem:[%s4808_s29 + $0x28] sm:$0xff]  ;;  %v2198_v48 = vld [vmem:[%s4808_s29 + $0x10] sm:$0xff]  ;;  %v2199_v49 = vld [vmem:[%s4808_s29 + $0x18] sm:$0xff] }
 0x502   :  { %3055 = vmatmul.msk.f32.gmra.mxu0 %vm1483_vm3, %v1643_v35  ;;  %v1884_v52 = vpop.xlane.xlu2 %1883  ;;  %v1876_v37 = vpop.xlane.xlu1 %1875  ;;  %2257 = vmatpush.msrb.mxu2 %v2207_v58  ;;  %v2196_v35 = vld [vmem:[%s4808_s29] sm:$0xff]  ;;  %v2482_v58 = vld [vmem:[%s4810_s12 + $0x18] sm:$0xff] }
 0x503   :  { %v1892_v57 = vmul.f32 %v1891_v50, %v1876_v37  ;;  %v1868_v59 = vpop.xlane.xlu0 %1867  ;;  %2066 = vmatpush.msrb.mxu0 %v2043_v40  ;;  %v1897_v61 = vmul.f32 %v1896_v38, %v1884_v52  ;;  %v1981_v52 = vpop.f32.mrf.mxu1 }
 0x504   :  { %v1889_v60 = vmul.f32 %v1888_v51, %v1868_v59  ;;  %v2296_v59 = vld [vmem:[%s4809_s6 + $0x70] sm:$0xff] }
 0x505   :  { %2067 = vmatpush.msrb.mxu0 %v2042_v55  ;;  %v2297_v55 = vld [vmem:[%s4809_s6 + $0x78] sm:$0xff] }
 0x506   :  { %v1894_v62 = vadd.f32 %v1892_v57, %v1889_v60  ;;  %v2494_v57 = vld [vmem:[%s4810_s12 + $0x78] sm:$0xff]  ;;  %2316 = vmatpush.msra.mxu3 %v2297_v55  ;;  %v2493_v60 = vld [vmem:[%s4810_s12 + $0x70] sm:$0xff]  ;;  %v2479_v55 = vld [vmem:[%s4810_s12] sm:$0xff] }
 0x507   :  { %2068 = vmatpush.msrb.mxu0 %v2041_v7 }
 0x508   :  { %v1899_v63 = vadd.f32 %v1897_v61, %v1894_v62  ;;  %v2295_v61 = vld [vmem:[%s4809_s6 + $0x68] sm:$0xff]  ;;  %2317 = vmatpush.msra.mxu3 %v2296_v59 }
 0x509   :  { %2069 = vmatpush.msrb.mxu0 %v2040_v8  ;;  %v2492_v62 = vld [vmem:[%s4810_s12 + $0x68] sm:$0xff]  ;;  %v2292_v8 = vld [vmem:[%s4809_s6 + $0x50] sm:$0xff] }
 0x50a   :  { %3059 = vmatmul.msk.f32.vlgmr.msra.gmra.mxu0 %vm1483_vm3, %v1899_v63  ;;  %v1879_v0 = vpop.xlane.xlu1 %1878  ;;  %v1887_v2 = vpop.xlane.xlu2 %1886  ;;  %2318 = vmatpush.msra.mxu3 %v2295_v61  ;;  %v2299_v59 = vld [vmem:[%s4809_s6 + $0x88] sm:$0xff]  ;;  %v2502_v61 = vld [vmem:[%s4810_s12 + $0xb8] sm:$0xff] }
 0x50b   :  { %v1893_v3 = vmul.f32 %v1891_v50, %v1879_v0  ;;  %v1871_v43 = vpop.xlane.xlu0 %1870  ;;  %v1898_v54 = vmul.f32 %v1896_v38, %v1887_v2  ;;  %2167 = vmatpush.msra.mxu0 %v2158_v9  ;;  %v2004_v50 = vpop.f32.mrf.mxu2  ;;  %v2294_v2 = vld [vmem:[%s4809_s6 + $0x60] sm:$0xff]  ;;  %v2304_v9 = vld [vmem:[%s4809_s6 + $0xb0] sm:$0xff] }
 0x50c   :  { %v1890_v56 = vmul.f32 %v1888_v51, %v1871_v43  ;;  %v2197_v51 = vld [vmem:[%s4808_s29 + $0x8] sm:$0xff]  ;;  %v2034_v38 = vpop.f32.mrf.mxu3  ;;  %v2005_v63 = vadd.f32 %v2004_v50, %v1981_v52  ;;  %2319 = vmatpush.msra.mxu3 %v2294_v2  ;;  %v1984_v7 = vpop.f32.mrf.mxu1  ;;  %v2282_v52 = vld [vmem:[%s4809_s6] sm:$0xff]  ;;  %v2498_v2 = vld [vmem:[%s4810_s12 + $0x98] sm:$0xff] }
 0x50d   :  { %2168 = vmatpush.msra.mxu0 %v2157_v47  ;;  %v2303_v50 = vld [vmem:[%s4809_s6 + $0xa8] sm:$0xff] }
 0x50e   :  { %v1895_v53 = vadd.f32 %v1893_v3, %v1890_v56  ;;  %v2491_v3 = vld [vmem:[%s4810_s12 + $0x60] sm:$0xff]  ;;  %v2293_v56 = vld [vmem:[%s4809_s6 + $0x58] sm:$0xff] }
 0x50f   :  { %2169 = vmatpush.msra.mxu0 %v2156_v4  ;;  %2320 = vmatpush.msra.mxu3 %v2293_v56  ;;  %v2488_v4 = vld [vmem:[%s4810_s12 + $0x48] sm:$0xff]  ;;  %v2495_v56 = vld [vmem:[%s4810_s12 + $0x80] sm:$0xff] }
 0x510   :  { %v1900_v5 = vadd.f32 %v1898_v54, %v1895_v53  ;;  %v2490_v54 = vld [vmem:[%s4810_s12 + $0x58] sm:$0xff]  ;;  %v2035_v53 = vadd.f32 %v2034_v38, %v2005_v63  ;;  %v2480_v38 = vld [vmem:[%s4810_s12 + $0x8] sm:$0xff] }
 0x511   :  { %2170 = vmatpush.msra.mxu0 %v2155_v11  ;;  %2321 = vmatpush.msra.mxu3 %v2292_v8  ;;  %v2290_v11 = vld [vmem:[%s4809_s6 + $0x40] sm:$0xff]  ;;  %v2500_v63 = vld [vmem:[%s4810_s12 + $0xa8] sm:$0xff] }
 0x512   :  { %3060 = vmatmul.msk.f32.gmra.mxu0 %vm1483_vm3, %v1900_v5  ;;  %v2305_v5 = vld [vmem:[%s4809_s6 + $0xb8] sm:$0xff] }
 0x513   :  { %2171 = vmatpush.msra.mxu0 %v2154_v13  ;;  %v2007_v37 = vpop.f32.mrf.mxu2  ;;  %2322 = vmatpush.msra.mxu3 %v2291_v1 }
 0x514   :  { %v2037_v43 = vpop.f32.mrf.mxu3  ;;  %v2008_v6 = vadd.f32 %v2007_v37, %v1984_v7  ;;  %v2301_v37 = vld [vmem:[%s4809_s6 + $0x98] sm:$0xff] }
 0x515   :  { %2172 = vmatpush.msra.mxu0 %v2153_v15  ;;  %2323 = vmatpush.msra.mxu3 %v2290_v11 }
 0x516   :  { %v2038_v20 = vadd.f32 %v2037_v43, %v2008_v6  ;;  %v2496_v43 = vld [vmem:[%s4810_s12 + $0x88] sm:$0xff] }
 0x517   :  { %2173 = vmatpush.msra.mxu0 %v2152_v18  ;;  %v2486_v18 = vld [vmem:[%s4810_s12 + $0x38] sm:$0xff]  ;;  %2324 = vmatpush.msra.mxu3 %v2289_v16 }
 0x519   :  { %2174 = vmatpush.msra.mxu0 %v2151_v21 }
 0x51b   :  { %v2104_v47 = vpop.f32.mrf.mxu2 }
 0x576   :  { %v1670_v23 = vpop.f32.mrf.mxu0 }
 0x577   :  { %v1671_v24 = vadd.f32 %v3268_v22, %v1670_v23  ;;  %v2288_v23 = vld [vmem:[%s4809_s6 + $0x30] sm:$0xff] }
 0x578   :  { %2325 = vmatpush.msra.mxu3 %v2288_v23  ;;  %v2368_v23 = vld [vmem:[%s4811_s21] sm:$0xff] }
 0x579   :  { %3065 = vmatmul.msk.f32.vlgmr.msrb.gmra.mxu0 %vm1483_vm3, %v1671_v24  ;;  %v2485_v24 = vld [vmem:[%s4810_s12 + $0x30] sm:$0xff] }
 0x57a   :  { %2347 = vmatpush.msrb.mxu0 %v2305_v5 }
 0x57c   :  { %2348 = vmatpush.msrb.mxu0 %v2304_v9 }
 0x57e   :  { %2349 = vmatpush.msrb.mxu0 %v2303_v50 }
 0x57f   :  { %v1673_v28 = vpop.f32.mrf.mxu0 }
 0x580   :  { %v1674_v25 = vadd.f32 %v3268_v22, %v1673_v28  ;;  %v3270_v22 = vld [vmem:[#allocation32] ss:$0 sm:$0xff] }
 0x582   :  { %3066 = vmatmul.msk.f32.gmra.mxu0 %vm1483_vm3, %v1674_v25 }
 0x587   :  { %v1927_v26 = vpop.f32.mrf.mxu0 }
 0x588   :  { %v1928_v29 = vadd.f32 %v3269_v27, %v1927_v26  ;;  %v2484_v26 = vld [vmem:[%s4810_s12 + $0x28] sm:$0xff] }
 0x58a   :  { %3069 = vmatmul.msk.f32.vlgmr.msrb.gmra.mxu3 %vm1483_vm3, %v1928_v29  ;;  %3071 = vmatmul.msk.f32.vlgmr.msra.gmra.mxu0 %vm1483_vm3, %v4386_v19  ;;  %v2206_v19 = vld [vmem:[%s4808_s29 + $0x50] sm:$0xff] }
 0x58b   :  { %2234 = vmatpush.msra.mxu1 %v2206_v19  ;;  %v2285_v19 = vld [vmem:[%s4809_s6 + $0x18] sm:$0xff] }
 0x58d   :  { %2235 = vmatpush.msra.mxu1 %v2204_v39 }
 0x58f   :  { %v1930_v30 = vpop.f32.mrf.mxu0  ;;  %2236 = vmatpush.msra.mxu1 %v2202_v41 }
 0x590   :  { %v1931_v31 = vadd.f32 %v3269_v27, %v1930_v30  ;;  %v2287_v27 = vld [vmem:[%s4809_s6 + $0x28] sm:$0xff]  ;;  %v2107_v30 = vpop.f32.mrf.mxu2 }
 0x591   :  { %2237 = vmatpush.msra.mxu1 %v2200_v44  ;;  %2326 = vmatpush.msra.mxu3 %v2287_v27  ;;  %v2559_v27 = vld [vmem:[%s4170_s30] sm:$0xff] }
 0x592   :  { %3070 = vmatmul.msk.f32.gmra.mxu3 %vm1483_vm3, %v1931_v31  ;;  %3072 = vmatmul.msk.f32.gmra.mxu0 %vm1483_vm3, %v4398_v46  ;;  %v2205_v46 = vld [vmem:[%s4808_s29 + $0x48] sm:$0xff]  ;;  %v2286_v31 = vld [vmem:[%s4809_s6 + $0x20] sm:$0xff] }
 0x593   :  { %2258 = vmatpush.msrb.mxu2 %v2205_v46  ;;  %2238 = vmatpush.msra.mxu1 %v2198_v48 }
 0x594   :  { %2327 = vmatpush.msra.mxu3 %v2286_v31 }
 0x595   :  { %2259 = vmatpush.msrb.mxu2 %v2203_v42  ;;  %2239 = vmatpush.msra.mxu1 %v2196_v35  ;;  %v2481_v35 = vld [vmem:[%s4810_s12 + $0x10] sm:$0xff] }
 0x596   :  { %2328 = vmatpush.msra.mxu3 %v2285_v19 }
 0x597   :  { %2260 = vmatpush.msrb.mxu2 %v2201_v45 }
 0x599   :  { %2261 = vmatpush.msrb.mxu2 %v2199_v49  ;;  %v2284_v49 = vld [vmem:[%s4809_s6 + $0x10] sm:$0xff] }
 0x59a   :  { %2329 = vmatpush.msra.mxu3 %v2284_v49 }
 0x59b   :  { %2262 = vmatpush.msrb.mxu2 %v2197_v51  ;;  %v2283_v51 = vld [vmem:[%s4809_s6 + $0x8] sm:$0xff] }
 0x59c   :  { %2330 = vmatpush.msra.mxu3 %v2283_v51 }
 0x59d   :  { %2507 = vmatpush.msra.mxu2 %v2494_v57  ;;  %v2300_v57 = vld [vmem:[%s4809_s6 + $0x90] sm:$0xff] }
 0x59e   :  { %2331 = vmatpush.msra.mxu3 %v2282_v52 }
 0x59f   :  { %2508 = vmatpush.msra.mxu2 %v2493_v60  ;;  %v2298_v60 = vld [vmem:[%s4809_s6 + $0x80] sm:$0xff] }
 0x5a1   :  { %2509 = vmatpush.msra.mxu2 %v2492_v62  ;;  %v2501_v62 = vld [vmem:[%s4810_s12 + $0xb0] sm:$0xff] }
 0x5a3   :  { %2510 = vmatpush.msra.mxu2 %v2491_v3  ;;  %v2497_v3 = vld [vmem:[%s4810_s12 + $0x90] sm:$0xff] }
 0x5a5   :  { %2511 = vmatpush.msra.mxu2 %v2490_v54  ;;  %v2212_v54 = vld [vmem:[#allocation33] sm:$0x3] }
 0x5a7   :  { %2512 = vmatpush.msra.mxu2 %v2489_v17  ;;  %v2215_v17 = vperm.slane %v2212_v54, 1 }
 0x5a9   :  { %2513 = vmatpush.msra.mxu2 %v2488_v4 }
 0x5ab   :  { %2514 = vmatpush.msra.mxu2 %v2487_v12 }
 0x5ad   :  { %2515 = vmatpush.msra.mxu2 %v2486_v18 }
 0x5af   :  { %2516 = vmatpush.msra.mxu2 %v2485_v24  ;;  %v2562_v24 = vld [vmem:[%s4170_s30 + $0x18] sm:$0xff] }
 0x5b1   :  { %2517 = vmatpush.msra.mxu2 %v2484_v26  ;;  %v3271_v26 = vld [vmem:[#allocation35] ss:$0 sm:$0xff] }
 0x5b3   :  { %2518 = vmatpush.msra.mxu2 %v2483_v32 }
 0x5b5   :  { %2519 = vmatpush.msra.mxu2 %v2482_v58 }
 0x5b7   :  { %2520 = vmatpush.msra.mxu2 %v2481_v35 }
 0x5b9   :  { %2521 = vmatpush.msra.mxu2 %v2480_v38 }
 0x5bb   :  { %2522 = vmatpush.msra.mxu2 %v2479_v55 }
 0x5f6   :  { %v2071_v40 = vpop.f32.mrf.mxu0 }
 0x5f7   :  { %v2077_v10 = vadd.f32 %v2071_v40, %v2035_v53  ;;  %v2302_v40 = vld [vmem:[%s4809_s6 + $0xa0] sm:$0xff]  ;;  %v2214_v53 = vperm.slane %v2212_v54, 0 }
 0x5f8   :  { %2350 = vmatpush.msrb.mxu0 %v2302_v40 }
 0x5f9   :  { %v2110_v13 = vadd.f32 %v2104_v47, %v2077_v10 }
 0x5fa   :  { %2351 = vmatpush.msrb.mxu0 %v2301_v37 }
 0x5fc   :  { %2352 = vmatpush.msrb.mxu0 %v2300_v57 }
 0x5fe   :  { %2353 = vmatpush.msrb.mxu0 %v2299_v59 }
 0x5ff   :  { %v2074_v0 = vpop.f32.mrf.mxu0 }
 0x600   :  { %v2078_v28 = vadd.f32 %v2074_v0, %v2038_v20  ;;  %2354 = vmatpush.msrb.mxu0 %v2298_v60  ;;  %v2499_v0 = vld [vmem:[%s4810_s12 + $0xa0] sm:$0xff]  ;;  %v2371_v20 = vld [vmem:[%s4811_s21 + $0x18] sm:$0xff] }
 0x601   :  { %2395 = vmatpush.msrb.mxu1 %v2371_v20  ;;  %3173 = vmatpush.msrb.mxu3 %v2371_v20 }
 0x602   :  { %v2111_v36 = vadd.f32 %v2107_v30, %v2078_v28  ;;  %2538 = vmatpush.msra.mxu0 %v2502_v61  ;;  %v2561_v28 = vld [vmem:[%s4170_s30 + $0x10] sm:$0xff] }
 0x604   :  { %2539 = vmatpush.msra.mxu0 %v2501_v62 }
 0x606   :  { %2540 = vmatpush.msra.mxu0 %v2500_v63 }
 0x607   :  { %v2176_v14 = vpop.f32.mrf.mxu0 }
 0x608   :  { %2541 = vmatpush.msra.mxu0 %v2499_v0 }
 0x60a   :  { %2542 = vmatpush.msra.mxu0 %v2498_v2  ;;  %v2406_v2 = vlaneseq }
 0x60c   :  { %2543 = vmatpush.msra.mxu0 %v2497_v3  ;;  %v4682_v3 = vand.u32 127, %v2406_v2 }
 0x60d   :  { %v2143_v15 = vpop.f32.mrf.mxu3 }
 0x60e   :  { %v2149_v21 = vadd.f32 %v2143_v15, %v2110_v13  ;;  %2544 = vmatpush.msra.mxu0 %v2496_v43 }
 0x60f   :  { %v2179_v41 = vpop.f32.mrf.mxu0 }
 0x610   :  { %v2182_v25 = vadd.f32 %v2176_v14, %v2149_v21  ;;  %2545 = vmatpush.msra.mxu0 %v2495_v56  ;;  %v2370_v21 = vld [vmem:[%s4811_s21 + $0x10] sm:$0xff] }
 0x611   :  { %2396 = vmatpush.msrb.mxu1 %v2370_v21  ;;  %3174 = vmatpush.msrb.mxu3 %v2370_v21 }
 0x612   :  { %v2188_v29 = vadd.f32 %v3270_v22, %v2182_v25  ;;  %v2560_v25 = vld [vmem:[%s4170_s30 + $0x8] sm:$0xff]  ;;  %s4812_s30 = sld [smem:[#allocation79_spill]] }
 0x614   :  { %v2192_v33 = vmul.f32 0.01, %v2188_v29  ;;  %vm2190_vm14 = vcmp.ge.f32.partialorder %v2188_v29, 0.0 }
 0x615   :  { %v2146_v34 = vpop.f32.mrf.mxu3 }
 0x616   :  { %v2150_v39 = vadd.f32 %v2146_v34, %v2111_v36  ;;  %v2194_v46 = vsel %vm2190_vm14, %v2188_v29, %v2192_v33 }
 0x617   :  { %3073 = vmatmul.msk.f32.vlgmr.msra.gmra.mxu1 %vm1483_vm3, %v2194_v46  ;;  %3075 = vmatmul.msk.f32.vlgmr.msrb.gmra.mxu2 %vm1483_vm3, %v2194_v46  ;;  %v3272_v46 = vld [vmem:[%s4165_s9] ss:$0 sm:$0xff]  ;;  %s3926_s9 = smov [#allocation36]  }
 0x618   :  { %v2183_v42 = vadd.f32 %v2179_v41, %v2150_v39  ;;  %v3273_v57 = vld [vmem:[%s4812_s30] ss:$0 sm:$0xff]  ;;  %s2623_s20 = sshll.u32 %s3926_s9, 4  ;;  %s2624_s20 = int_to_ptr.vmem [resolvable:$true] %s2623_s20 }
 0x61a   :  { %v2189_v44 = vadd.f32 %v3270_v22, %v2183_v42  ;;  %v2369_v22 = vld [vmem:[%s4811_s21 + $0x8] sm:$0xff] }
 0x61b   :  { %2397 = vmatpush.msrb.mxu1 %v2369_v22  ;;  %3175 = vmatpush.msrb.mxu3 %v2369_v22 }
 0x61c   :  { %vm2191_vm5 = vcmp.ge.f32.partialorder %v2189_v44, 0.0  ;;  %v2193_v45 = vmul.f32 0.01, %v2189_v44 }
 0x61d   :  { %2398 = vmatpush.msrb.mxu1 %v2368_v23  ;;  %3176 = vmatpush.msrb.mxu3 %v2368_v23 }
 0x61e   :  { %v2195_v48 = vsel %vm2191_vm5, %v2189_v44, %v2193_v45 }
 0x61f   :  { %3074 = vmatmul.msk.f32.gmra.mxu1 %vm1483_vm3, %v2195_v48  ;;  %3076 = vmatmul.msk.f32.gmra.mxu2 %vm1483_vm3, %v2195_v48 }
 0x620   :  { %2585 = vmatpush.msra.mxu1 %v2562_v24 }
 0x622   :  { %2586 = vmatpush.msra.mxu1 %v2561_v28  ;;  %v3274_v28 = vld [vmem:[#allocation2] ss:$0 sm:$0xff] }
 0x624   :  { %2587 = vmatpush.msra.mxu1 %v2560_v25 }
 0x626   :  { %2588 = vmatpush.msra.mxu1 %v2559_v27 }
 0x694   :  { %v2241_v5 = vpop.f32.mrf.mxu1 }
 0x695   :  { %v2242_v7 = vadd.f32 %v2241_v5, %v2214_v53 }
 0x697   :  { %vm2270_vm6 = vcmp.ge.f32.partialorder %v2242_v7, 0.0  ;;  %v2274_v8 = vmul.f32 0.01, %v2242_v7 }
 0x699   :  { %v2278_v9 = vsel %vm2270_vm6, %v2242_v7, %v2274_v8  ;;  %vm2600_vm6 = vcmp.eq.s32.totalorder %v4682_v3, 2 }
 0x69a   :  { %v2264_v10 = vpop.f32.mrf.mxu2  ;;  %2332 = vmatmul.f32.vlgmr.msra.gmra.mxu3 %v2278_v9  ;;  %2523 = vmatmul.f32.vlgmr.msra.gmra.mxu2 %v2278_v9 }
 0x69b   :  { %v2265_v47 = vadd.f32 %v2264_v10, %v2215_v17 }
 0x69c   :  { %v2244_v1 = vpop.f32.mrf.mxu1 }
 0x69d   :  { %vm2271_vm7 = vcmp.ge.f32.partialorder %v2265_v47, 0.0  ;;  %v2275_v4 = vmul.f32 0.01, %v2265_v47  ;;  %v2245_v6 = vadd.f32 %v2244_v1, %v2214_v53 }
 0x69f   :  { %v2279_v11 = vsel %vm2271_vm7, %v2265_v47, %v2275_v4  ;;  %vm2272_vm8 = vcmp.ge.f32.partialorder %v2245_v6, 0.0  ;;  %v2276_v12 = vmul.f32 0.01, %v2245_v6  ;;  %vm2597_vm7 = vcmp.eq.s32.totalorder %v4682_v3, 1 }
 0x6a0   :  { %3077 = vmatmul.msk.f32.vlgmr.msrb.gmra.mxu0 %vm1483_vm3, %v2279_v11 }
 0x6a1   :  { %v2280_v13 = vsel %vm2272_vm8, %v2245_v6, %v2276_v12  ;;  %vm2596_vm8 = vcmp.eq.s32.totalorder %v4682_v3, 0 }
 0x6a2   :  { %v2267_v14 = vpop.f32.mrf.mxu2  ;;  %2335 = vmatmul.f32.gmra.mxu3 %v2280_v13  ;;  %2526 = vmatmul.f32.gmra.mxu2 %v2280_v13 }
 0x6a3   :  { %v2268_v15 = vadd.f32 %v2267_v14, %v2215_v17 }
 0x6a5   :  { %v2277_v16 = vmul.f32 0.01, %v2268_v15  ;;  %vm2273_vm9 = vcmp.ge.f32.partialorder %v2268_v15, 0.0 }
 0x6a7   :  { %v2281_v18 = vsel %vm2273_vm9, %v2268_v15, %v2277_v16 }
 0x6a8   :  { %3078 = vmatmul.msk.f32.gmra.mxu0 %vm1483_vm3, %v2281_v18 }
 0x6b0   :  { %3081 = vmatmul.msk.f32.vlgmr.msra.gmra.mxu0 %vm1483_vm3, %v2279_v11 }
 0x6b8   :  { %3082 = vmatmul.msk.f32.gmra.mxu0 %vm1483_vm3, %v2281_v18 }
 0x71d   :  { %v2333_v29 = vpop.f32.mrf.mxu3  ;;  %v2356_v30 = vpop.f32.mrf.mxu0 }
 0x71e   :  { %v2334_v31 = vadd.f32 %v3271_v26, %v2333_v29  ;;  %v2524_v39 = vpop.f32.mrf.mxu2 }
 0x71f   :  { %v2525_v44 = vadd.f32 %v3272_v46, %v2524_v39 }
 0x720   :  { %v2357_v32 = vadd.f32 %v2356_v30, %v2334_v31 }
 0x722   :  { %vm2362_vm3 = vcmp.ge.f32.partialorder %v2357_v32, 0.0  ;;  %v2364_v33 = vmul.f32 0.01, %v2357_v32 }
 0x724   :  { %v2366_v36 = vsel %vm2362_vm3, %v2357_v32, %v2364_v33 }
 0x725   :  { %v2336_v34 = vpop.f32.mrf.mxu3  ;;  %v2359_v19 = vpop.f32.mrf.mxu0  ;;  %3079 = vmatmul.msk.f32.vlgmr.msrb.gmra.mxu1 %vm2376_vm10, %v2366_v36 }
 0x726   :  { %v2337_v58 = vadd.f32 %v3271_v26, %v2336_v34  ;;  %v2527_v35 = vpop.f32.mrf.mxu2 }
 0x727   :  { %v2528_v40 = vadd.f32 %v3272_v46, %v2527_v35 }
 0x728   :  { %v2360_v41 = vadd.f32 %v2359_v19, %v2337_v58 }
 0x72a   :  { %vm2363_vm11 = vcmp.ge.f32.partialorder %v2360_v41, 0.0  ;;  %v2365_v42 = vmul.f32 0.01, %v2360_v41 }
 0x72c   :  { %v2367_v45 = vsel %vm2363_vm11, %v2360_v41, %v2365_v42 }
 0x72d   :  { %3080 = vmatmul.msk.f32.vlgmr.msrb.gmra.mxu3 %vm2376_vm10, %v2367_v45  ;;  %v2547_v48 = vpop.f32.mrf.mxu0 }
 0x72e   :  { %v2548_v49 = vadd.f32 %v2547_v48, %v2525_v44 }
 0x730   :  { %vm2553_vm12 = vcmp.ge.f32.partialorder %v2548_v49, 0.0  ;;  %v2555_v50 = vmul.f32 0.01, %v2548_v49 }
 0x732   :  { %v2557_v51 = vsel %vm2553_vm12, %v2548_v49, %v2555_v50 }
 0x733   :  { %3083 = vmatmul.msk.f32.vlgmr.msra.gmra.mxu1 %vm2376_vm10, %v2557_v51 }
 0x735   :  { %v2550_v38 = vpop.f32.mrf.mxu0 }
 0x736   :  { %v2551_v52 = vadd.f32 %v2550_v38, %v2528_v40 }
 0x738   :  { %v2556_v37 = vmul.f32 0.01, %v2551_v52  ;;  %vm2554_vm13 = vcmp.ge.f32.partialorder %v2551_v52, 0.0 }
 0x73a   :  { %v2558_v55 = vsel %vm2554_vm13, %v2551_v52, %v2556_v37 }
 0x73b   :  { %3084 = vmatmul.msk.f32.gmra.mxu1 %vm2376_vm10, %v2558_v55 }
 0x7a2   :  { %v2400_v59 = vpop.f32.mrf.mxu1 }
 0x7a3   :  { %v4674_v60 = vadd.f32 %v3273_v57, %v2400_v59 }
 0x7a5   :  { %v2409_v61 = vsel %vm2408_vm15, %v4674_v60, -inf }
 0x7a6   :  { %2410 = vmax.xlane.f32.xlu0 %v2409_v61 }
 0x7b0   :  { %v2403_v62 = vpop.f32.mrf.mxu3  ;;  %v2590_v25 = vpop.f32.mrf.mxu1 }
 0x7b1   :  { %v4678_v63 = vadd.f32 %v3273_v57, %v2403_v62  ;;  %v2591_v27 = vadd.f32 %v3274_v28, %v2590_v25 }
 0x7b3   :  { %v2412_v0 = vsel %vm2408_vm15, %v4678_v63, -inf }
 0x7b4   :  { %2413 = vmax.xlane.f32.xlu1 %v2412_v0 }
 0x7b8   :  { %v2593_v37 = vpop.f32.mrf.mxu1 }
 0x7b9   :  { %v2594_v55 = vadd.f32 %v3274_v28, %v2593_v37 }
 0x819   :  { %v2411_v43 = vpop.xlane.xlu0 %2410 }
 0x81a   :  { %vm2415_vm0 = vcmp.eq.f32.partialorder %v4674_v60, %v2411_v43  ;;  %v2449_v56 = vsub.f32 %v4674_v60, %v2411_v43 }
 0x81b   :  { %v2417_v54 = vsel %vm2415_vm0, %v4682_v3, 36 }
 0x81c   :  { %v2451_v53 = vmul.f32 1.442695, %v2449_v56  ;;  %v2419_v5 = vsel %vm2408_vm15, %v2417_v54, 2147483647 }
 0x81d   :  { %v2421_v7 = vshra.s32 %v2419_v5, 16  ;;  %v2420_v15 = vand.u32 65535, %v2419_v5 }
 0x81e   :  { %3291 = vpow2.f32 %v2451_v53 }
 0x81f   :  { %v2423_v8 = vcvt.s32.f32 %v2421_v7  ;;  %v2422_v18 = vcvt.s32.f32 %v2420_v15 }
 0x821   :  { %2424 = vmin.xlane.f32.xlu2 %v2423_v8 }
 0x824   :  { %v3292_v17 = vpop.eup %3291 }
 0x825   :  { %v2455_v9 = vsel %vm2408_vm15, %v3292_v17, 0.0 }
 0x826   :  { %2456 = vadd.xlane.f32.xlu1 %v2455_v9 }
 0x827   :  { %v2414_v10 = vpop.xlane.xlu1 %2413 }
 0x828   :  { %vm2416_vm1 = vcmp.eq.f32.partialorder %v4678_v63, %v2414_v10  ;;  %v2450_v47 = vsub.f32 %v4678_v63, %v2414_v10 }
 0x829   :  { %v2418_v1 = vsel %vm2416_vm1, %v4682_v3, 36 }
 0x82a   :  { %v2453_v4 = vmul.f32 1.442695, %v2450_v47  ;;  %v2434_v6 = vsel %vm2408_vm15, %v2418_v1, 2147483647 }
 0x82b   :  { %v2436_v11 = vshra.s32 %v2434_v6, 16  ;;  %v2435_v21 = vand.u32 65535, %v2434_v6 }
 0x82c   :  { %3293 = vpow2.f32 %v2453_v4 }
 0x82d   :  { %v2438_v12 = vcvt.s32.f32 %v2436_v11  ;;  %v2437_v23 = vcvt.s32.f32 %v2435_v21 }
 0x82f   :  { %2439 = vmin.xlane.f32.xlu0 %v2438_v12 }
 0x832   :  { %v3294_v13 = vpop.eup %3293 }
 0x833   :  { %v2458_v14 = vsel %vm2408_vm15, %v3294_v13, 0.0 }
 0x834   :  { %2459 = vadd.xlane.f32.xlu2 %v2458_v14 }
 0x894   :  { %v2425_v16 = vpop.xlane.xlu2 %2424 }
 0x895   :  { %vm2426_vm2 = vcmp.eq.f32.partialorder %v2423_v8, %v2425_v16  ;;  %v2431_v31 = vcvt.f32.s32 %v2425_v16 }
 0x896   :  { %v2427_v20 = vsel %vm2426_vm2, %v2422_v18, inf }
 0x897   :  { %2428 = vmin.xlane.f32.xlu0 %v2427_v20  ;;  %v2432_v34 = vshll.u32 %v2431_v31, 16 }
 0x899   :  { %v2457_v26 = vpop.xlane.xlu1 %2456 }
 0x89a   :  { %3295 = vlog2.f32 %v2457_v26 }
 0x8a0   :  { %v3296_v29 = vpop.eup %3295 }
 0x8a1   :  { %v2462_v30 = vmul.f32 0.6931472, %v3296_v29 }
 0x8a2   :  { %v2440_v22 = vpop.xlane.xlu0 %2439 }
 0x8a3   :  { %vm2441_vm4 = vcmp.eq.f32.partialorder %v2438_v12, %v2440_v22  ;;  %v2465_v33 = vadd.f32 %v2462_v30, %v2411_v43  ;;  %v2446_v45 = vcvt.f32.s32 %v2440_v22 }
 0x8a4   :  { %v2442_v24 = vsel %vm2441_vm4, %v2437_v23, inf }
 0x8a5   :  { %2443 = vmin.xlane.f32.xlu1 %v2442_v24  ;;  %v2469_v39 = vsub.f32 %v4674_v60, %v2465_v33  ;;  %v2447_v50 = vshll.u32 %v2446_v45, 16 }
 0x8a7   :  { %v2460_v32 = vpop.xlane.xlu2 %2459 }
 0x8a8   :  { %3297 = vlog2.f32 %v2460_v32 }
 0x8ae   :  { %v3298_v41 = vpop.eup %3297 }
 0x8af   :  { %v2464_v44 = vmul.f32 0.6931472, %v3298_v41 }
 0x8b1   :  { %v2466_v48 = vadd.f32 %v2464_v44, %v2414_v10 }
 0x8b3   :  { %v2470_v40 = vsub.f32 %v4678_v63, %v2466_v48 }
 0x8be   :  { %2607 = vperm.xlu1 %3261, %v2591_v27  }
 0x90a   :  { %v2429_v36 = vpop.xlane.xlu0 %2428 }
 0x90b   :  { %v2430_v19 = vcvt.f32.s32 %v2429_v36 }
 0x90d   :  { %v2433_v58 = vadd.s32 %v2432_v34, %v2430_v19 }
 0x90f   :  { %vm2467_vm14 = vcmp.eq.s32.totalorder %v4682_v3, %v2433_v58  ;;  %v2598_v57 = vcvt.s32.f32 %v2433_v58 }
 0x910   :  { %v2471_v46 = vsel %vm2467_vm14, %v2469_v39, 0.0 }
 0x911   :  { %v2473_v42 = vsel %vm2408_vm15, %v2471_v46, 0.0 }
 0x912   :  { %2474 = vadd.xlane.f32.xlu2 %v2473_v42 }
 0x918   :  { %v2444_v49 = vpop.xlane.xlu1 %2443 }
 0x919   :  { %v2445_v35 = vcvt.f32.s32 %v2444_v49 }
 0x91b   :  { %v2448_v51 = vadd.s32 %v2447_v50, %v2445_v35 }
 0x91d   :  { %vm2468_vm5 = vcmp.eq.s32.totalorder %v4682_v3, %v2448_v51  ;;  %v2599_v0 = vcvt.s32.f32 %v2448_v51 }
 0x91e   :  { %v2472_v38 = vsel %vm2468_vm5, %v2470_v40, 0.0 }
 0x91f   :  { %v2476_v52 = vsel %vm2408_vm15, %v2472_v38, 0.0 }
 0x920   :  { %2477 = vadd.xlane.f32.xlu0 %v2476_v52 }
 0x92a   :  { %2612 = vperm.xlu2 %3260, %v2594_v55  }
 0x930   :  { %v2608_v61 = vpop.permute.xlu1 %2607 }
 0x985   :  { %v2475_v59 = vpop.xlane.xlu2 %2474 }
 0x986   :  { %v2601_v60 = vsel %vm2600_vm6, %v2475_v59, 0.0 }
 0x987   :  { %v2603_v62 = vsel %vm2597_vm7, %v2598_v57, %v2601_v60 }
 0x988   :  { %v2615_v63 = vsel %vm2596_vm8, %v2608_v61, %v2603_v62 }
 0x989   :  { %2617 = vst [vmem:[#allocation36] sm:$0xff] %v2615_v63 }
 0x98d   :  { %v2613_v56 = vpop.permute.xlu2 %2612 }
 0x993   :  { %v2478_v2 = vpop.xlane.xlu0 %2477 }
 0x994   :  { %v2602_v43 = vsel %vm2600_vm6, %v2478_v2, 0.0 }
 0x995   :  { %v2604_v54 = vsel %vm2597_vm7, %v2599_v0, %v2602_v43 }
 0x996   :  { %v2616_v53 = vsel %vm2596_vm8, %v2613_v56, %v2604_v54 }
 0x997   :  { %2618 = vst [vmem:[#allocation36 + $0x8] sm:$0xff] %v2616_v53 }
 0x998   :  { %3826 = shalt.err (!%p3823_p11)
}
 0x999   :  { %2631 = dma.vmem_to_hbm [thread:$0]  %s2624_s20, 256, %s2626_s11, [#allocation5], %s3909_s7, %s3909_s7, %s3910_s0  }
 0x99a   :  { %3849 = dma.done.wait [#allocation5], 256  }
 0x99b   :  { %3850 = vsyncadd [#allocation5], 4294967040 }
 0x99c   :  { %2636 = vsyncpa [#allocation4], 1 }
 0x99d   :  { %2637 = vsyncpa [#allocation7], 1 }
 0x99e   :  { %2638 = vsyncpa [#allocation10], 1 }
 0x99f   :  { %2639 = vsyncpa [#allocation13], 1 }
 0x9a0   :  { %2640 = vsyncpa [#allocation16], 1 }
 0x9a1   :  { %2641 = vsyncpa [#allocation19], 1 }
 0x9a2   :  { %2642 = vsyncpa [#allocation22], 1 }
 0x9a3   :  { %2643 = vsyncpa [#allocation25], 1 }
 0x9a4   :  { %2644 = vsyncpa [#allocation28], 1 }
 0x9a5   :  { %2645 = vsyncpa [#allocation31], 1 }
 0x9a6   :  { %2646 = vsyncpa [#allocation34], 1 }
 0x9a7   :  { %2647 = vsyncpa [#allocation5], 1 }

</bundles_post_ra>
